<compile_context>
chip_gen: v6e
topology: v6e:2x2x1
jax: 0.10.0
libtpu: 0.0.40
codegen_flags: <defaults>
</compile_context>

<pallas_src>
import functools

import jax
import jax.numpy as jnp
from jax import lax
from jax.experimental import pallas as pl
from jax.experimental.pallas import tpu as pltpu


# ----------------------------- Fused Pallas kernel ---------------------------


def make_fused_kernel(T, B, H, num_layers):
    """Builds the fused StockLSTM forward kernel for static (T, B, H, layers)."""

    def kernel(*refs):
        refs = list(refs)
        x_ref = refs[0]
        pos = 1
        lstm_refs = []
        for _ in range(num_layers):
            lstm_refs.append(tuple(refs[pos:pos + 3]))     # (W_ih^T, W_hh^T, b)
            pos += 3
        gru_refs = []
        for _ in range(num_layers):
            gru_refs.append(tuple(refs[pos:pos + 4]))      # (W_ih^T, W_hh^T, b_ih, b_hh)
            pos += 4
        w1_ref, b1_ref, w2_ref, b2_ref = refs[pos:pos + 4]
        pos += 4
        out_ref = refs[pos]

        x = x_ref[...]                                     # (T*B, I), time-major rows
        lstm_seq = x
        gru_seq = x

        h_l = jnp.zeros((B, H), jnp.float32)
        c_l = jnp.zeros((B, H), jnp.float32)
        h_g = jnp.zeros((B, H), jnp.float32)

        for layer in range(num_layers):
            l_wih_ref, l_whh_ref, l_b_ref = lstm_refs[layer]
            g_wih_ref, g_whh_ref, g_bih_ref, g_bhh_ref = gru_refs[layer]

            l_whh = l_whh_ref[...]                         # (H, 4H)
            g_whh = g_whh_ref[...]                         # (H, 3H)
            g_bhh = g_bhh_ref[...]                         # (1, 3H)

            # Batched input->hidden projections for ALL timesteps (off the
            # serial recurrent chain).
            l_gi = jnp.dot(lstm_seq, l_wih_ref[...],
                           preferred_element_type=jnp.float32) + l_b_ref[...]    # (T*B, 4H)
            g_gi = jnp.dot(gru_seq, g_wih_ref[...],
                           preferred_element_type=jnp.float32) + g_bih_ref[...]  # (T*B, 3H)

            h_l = jnp.zeros((B, H), jnp.float32)
            c_l = jnp.zeros((B, H), jnp.float32)
            h_g = jnp.zeros((B, H), jnp.float32)
            l_hs = []
            g_hs = []

            for t in range(T):                             # static, fully unrolled
                # ---------------- LSTM step (gate order i, f, g, o) ----------
                gates = l_gi[t * B:(t + 1) * B, :] + jnp.dot(
                    h_l, l_whh, preferred_element_type=jnp.float32)   # (B, 4H)
                sig = jax.nn.sigmoid(gates)                # one full-tile pass
                th = jnp.tanh(gates)                       # one full-tile pass
                i_g = sig[:, 0:H]
                f_g = sig[:, H:2 * H]
                g_g = th[:, 2 * H:3 * H]
                o_g = sig[:, 3 * H:4 * H]
                c_l = f_g * c_l + i_g * g_g
                h_l = o_g * jnp.tanh(c_l)

                # ---------------- GRU step (gate order r, z, n) ---------------
                gh = jnp.dot(h_g, g_whh,
                             preferred_element_type=jnp.float32) + g_bhh  # (B, 3H)
                gi_t = g_gi[t * B:(t + 1) * B, :]
                rz = jax.nn.sigmoid(gi_t[:, 0:2 * H] + gh[:, 0:2 * H])
                r = rz[:, 0:H]
                z = rz[:, H:2 * H]
                n = jnp.tanh(gi_t[:, 2 * H:3 * H] + r * gh[:, 2 * H:3 * H])
                h_g = (1.0 - z) * n + z * h_g

                if layer + 1 < num_layers:
                    l_hs.append(h_l)
                    g_hs.append(h_g)

            if layer + 1 < num_layers:
                lstm_seq = jnp.concatenate(l_hs, axis=0)   # (T*B, H)
                gru_seq = jnp.concatenate(g_hs, axis=0)    # (T*B, H)

        # -------- head: concat last states -> Linear(2H->H) -> ReLU -> Linear(H->O)
        last = jnp.concatenate([h_l, h_g], axis=-1)        # (B, 2H)
        hid = jnp.dot(last, w1_ref[...],
                      preferred_element_type=jnp.float32) + b1_ref[...]
        hid = jnp.maximum(hid, 0.0)
        out = jnp.dot(hid, w2_ref[...],
                      preferred_element_type=jnp.float32) + b2_ref[...]
        out_ref[...] = out.astype(out_ref.dtype)

    return kernel


# ------------------------------- Wrapper --------------------------------------


def prepare_params(params):
    """One-time weight transpose / bias combine (PyTorch layout -> kernel layout)."""
    prepped = {"lstm": [], "gru": []}
    for p in params["lstm"]:
        prepped["lstm"].append((
            jnp.transpose(p["w_ih"]),                      # (in, 4H)
            jnp.transpose(p["w_hh"]),                      # (H, 4H)
            (p["b_ih"] + p["b_hh"])[None, :],              # (1, 4H)
        ))
    for p in params["gru"]:
        prepped["gru"].append((
            jnp.transpose(p["w_ih"]),                      # (in, 3H)
            jnp.transpose(p["w_hh"]),                      # (H, 3H)
            p["b_ih"][None, :],                            # (1, 3H)
            p["b_hh"][None, :],                            # (1, 3H)
        ))
    prepped["head"] = (
        jnp.transpose(params["hidden_w"]),                 # (2H, H)
        params["hidden_b"][None, :],                       # (1, H)
        jnp.transpose(params["fc_w"]),                     # (H, O)
        params["fc_b"][None, :],                           # (1, O)
    )
    return prepped


def stock_lstm_forward(prepped, x_bti, hidden_size, num_layers, output_size):
    """Fused Pallas forward.  x_bti: (B, T, I) float32 -> (B, output_size, 1)."""
    B, T, I = x_bti.shape
    H = hidden_size

    # Time-major flattening: row t*B + b is (timestep t, batch b).
    x_flat = jnp.transpose(x_bti, (1, 0, 2)).reshape(T * B, I)

    args = [x_flat]
    for lp in prepped["lstm"]:
        args.extend(lp)
    for gp in prepped["gru"]:
        args.extend(gp)
    args.extend(prepped["head"])

    vmem = pltpu.MemorySpace.VMEM
    out = pl.pallas_call(
        make_fused_kernel(T, B, H, num_layers),
        out_shape=jax.ShapeDtypeStruct((B, output_size), jnp.float32),
        in_specs=[pl.BlockSpec(memory_space=vmem)] * len(args),
        out_specs=pl.BlockSpec(memory_space=vmem),
    )(*args)
    return out.reshape(B, -1, 1)                           # (B, O, 1)


# --------------------------- Parameter construction ---------------------------


def init_params(key, input_size, hidden_size, num_layers, output_size):
    """Deterministic init mimicking PyTorch's U(-1/sqrt(H), 1/sqrt(H))."""
    params = {"lstm": [], "gru": []}
    bound = 1.0 / jnp.sqrt(hidden_size)

    def uni(k, shape, b):
        return jax.random.uniform(k, shape, jnp.float32, -b, b)

    for layer in range(num_layers):
        in_sz = input_size if layer == 0 else hidden_size
        key, *ks = jax.random.split(key, 9)
        params["lstm"].append(dict(
            w_ih=uni(ks[0], (4 * hidden_size, in_sz), bound),
            w_hh=uni(ks[1], (4 * hidden_size, hidden_size), bound),
            b_ih=uni(ks[2], (4 * hidden_size,), bound),
            b_hh=uni(ks[3], (4 * hidden_size,), bound),
        ))
        params["gru"].append(dict(
            w_ih=uni(ks[4], (3 * hidden_size, in_sz), bound),
            w_hh=uni(ks[5], (3 * hidden_size, hidden_size), bound),
            b_ih=uni(ks[6], (3 * hidden_size,), bound),
            b_hh=uni(ks[7], (3 * hidden_size,), bound),
        ))

    key, k1, k2, k3, k4 = jax.random.split(key, 5)
    b_lin = 1.0 / jnp.sqrt(2 * hidden_size)
    params["hidden_w"] = uni(k1, (hidden_size, 2 * hidden_size), b_lin)
    params["hidden_b"] = uni(k2, (hidden_size,), b_lin)
    b_fc = 1.0 / jnp.sqrt(hidden_size)
    params["fc_w"] = uni(k3, (output_size, hidden_size), b_fc)
    params["fc_b"] = uni(k4, (output_size,), b_fc)
    return params


# --------------------------- Pure-JAX reference --------------------------------


def _ref_forward(params, x_bti, hidden_size, num_layers):
    B, T, I = x_bti.shape
    H = hidden_size

    def lstm_layer(p, xs):  # xs: (T, B, in)
        def step(carry, x_t):
            h, c = carry
            g = x_t @ p["w_ih"].T + h @ p["w_hh"].T + p["b_ih"] + p["b_hh"]
            i = jax.nn.sigmoid(g[:, :H]); f = jax.nn.sigmoid(g[:, H:2 * H])
            gg = jnp.tanh(g[:, 2 * H:3 * H]); o = jax.nn.sigmoid(g[:, 3 * H:])
            c = f * c + i * gg
            h = o * jnp.tanh(c)
            return (h, c), h
        _, ys = lax.scan(step, (jnp.zeros((B, H)), jnp.zeros((B, H))), xs)
        return ys

    def gru_layer(p, xs):
        def step(h, x_t):
            gi = x_t @ p["w_ih"].T + p["b_ih"]
            gh = h @ p["w_hh"].T + p["b_hh"]
            r = jax.nn.sigmoid(gi[:, :H] + gh[:, :H])
            z = jax.nn.sigmoid(gi[:, H:2 * H] + gh[:, H:2 * H])
            n = jnp.tanh(gi[:, 2 * H:] + r * gh[:, 2 * H:])
            h = (1 - z) * n + z * h
            return h, h
        _, ys = lax.scan(step, jnp.zeros((B, H)), xs)
        return ys

    xs = jnp.transpose(x_bti, (1, 0, 2))
    l = xs
    for layer in range(num_layers):
        l = lstm_layer(params["lstm"][layer], l)
    g = xs
    for layer in range(num_layers):
        g = gru_layer(params["gru"][layer], g)
    last = jnp.concatenate([l[-1], g[-1]], axis=-1)
    hid = jnp.maximum(last @ params["hidden_w"].T + params["hidden_b"], 0.0)
    out = hid @ params["fc_w"].T + params["fc_b"]
    return out.reshape(out.shape[0], -1, 1)


# ----------------------------------- Main ---------------------------------------


if __name__ == "__main__":
    B, T = 2, 8
    input_size, hidden_size, num_layers, output_size = 4, 32, 2, 1
    dropout = 0.2  # identity at inference

    key = jax.random.PRNGKey(0)
    key_x, key_p = jax.random.split(key)
    x = jax.random.normal(key_x, (B, T, input_size), dtype=jnp.float32)
    params = init_params(key_p, input_size, hidden_size, num_layers, output_size)

    prepped = prepare_params(params)   # one-time transpose / bias-combine

    fwd = jax.jit(functools.partial(
        stock_lstm_forward,
        hidden_size=hidden_size, num_layers=num_layers, output_size=output_size))
    out = fwd(prepped, x)
    jax.block_until_ready(out)

    ref = _ref_forward(params, x, hidden_size, num_layers)
    assert out.shape == (B, output_size, 1), out.shape
    assert jnp.allclose(out, ref, rtol=1e-3, atol=1e-3), (out, ref)
    print("KERNEL_OK")
</pallas_src>

<mosaic_0001>
module attributes {stable_mosaic.version = 11 : i64} {
  func.func @kernel(%arg0: memref<16x4xf32, #tpu.memory_space<vmem>>, %arg1: memref<4x128xf32, #tpu.memory_space<vmem>>, %arg2: memref<32x128xf32, #tpu.memory_space<vmem>>, %arg3: memref<1x128xf32, #tpu.memory_space<vmem>>, %arg4: memref<32x128xf32, #tpu.memory_space<vmem>>, %arg5: memref<32x128xf32, #tpu.memory_space<vmem>>, %arg6: memref<1x128xf32, #tpu.memory_space<vmem>>, %arg7: memref<4x96xf32, #tpu.memory_space<vmem>>, %arg8: memref<32x96xf32, #tpu.memory_space<vmem>>, %arg9: memref<1x96xf32, #tpu.memory_space<vmem>>, %arg10: memref<1x96xf32, #tpu.memory_space<vmem>>, %arg11: memref<32x96xf32, #tpu.memory_space<vmem>>, %arg12: memref<32x96xf32, #tpu.memory_space<vmem>>, %arg13: memref<1x96xf32, #tpu.memory_space<vmem>>, %arg14: memref<1x96xf32, #tpu.memory_space<vmem>>, %arg15: memref<64x32xf32, #tpu.memory_space<vmem>>, %arg16: memref<1x32xf32, #tpu.memory_space<vmem>>, %arg17: memref<32x1xf32, #tpu.memory_space<vmem>>, %arg18: memref<1x1xf32, #tpu.memory_space<vmem>>, %arg19: memref<2x1xf32, #tpu.memory_space<vmem>>) attributes {dimension_semantics = [], scalar_prefetch = 0 : i64, scratch_operands = 0 : i64, tpu.core_type = #tpu.core_type<tc>} {
    %c0 = arith.constant 0 : index
    %c0_0 = arith.constant 0 : index
    %0 = vector.load %arg0[%c0, %c0_0] : memref<16x4xf32, #tpu.memory_space<vmem>>, vector<16x4xf32>
    %c0_1 = arith.constant 0 : index
    %c0_2 = arith.constant 0 : index
    %1 = vector.load %arg2[%c0_1, %c0_2] : memref<32x128xf32, #tpu.memory_space<vmem>>, vector<32x128xf32>
    %c0_3 = arith.constant 0 : index
    %c0_4 = arith.constant 0 : index
    %2 = vector.load %arg8[%c0_3, %c0_4] : memref<32x96xf32, #tpu.memory_space<vmem>>, vector<32x96xf32>
    %c0_5 = arith.constant 0 : index
    %c0_6 = arith.constant 0 : index
    %3 = vector.load %arg10[%c0_5, %c0_6] : memref<1x96xf32, #tpu.memory_space<vmem>>, vector<1x96xf32>
    %c0_7 = arith.constant 0 : index
    %c0_8 = arith.constant 0 : index
    %4 = vector.load %arg1[%c0_7, %c0_8] : memref<4x128xf32, #tpu.memory_space<vmem>>, vector<4x128xf32>
    %cst = arith.constant dense<0.000000e+00> : vector<16x128xf32>
    %5 = tpu.matmul %0, %4, %cst {dimension_numbers = #tpu.dot_dimension_numbers<[1], [0], [0], [1], [0, 0, 1, 1], [], []>} : vector<16x4xf32>, vector<4x128xf32>, vector<16x128xf32> -> vector<16x128xf32>
    %c0_9 = arith.constant 0 : index
    %c0_10 = arith.constant 0 : index
    %6 = vector.load %arg3[%c0_9, %c0_10] : memref<1x128xf32, #tpu.memory_space<vmem>>, vector<1x128xf32>
    %7 = vector.broadcast %6 : vector<1x128xf32> to vector<16x128xf32>
    %8 = arith.addf %5, %7 : vector<16x128xf32>
    %c0_11 = arith.constant 0 : index
    %c0_12 = arith.constant 0 : index
    %9 = vector.load %arg7[%c0_11, %c0_12] : memref<4x96xf32, #tpu.memory_space<vmem>>, vector<4x96xf32>
    %cst_13 = arith.constant dense<0.000000e+00> : vector<16x96xf32>
    %10 = tpu.matmul %0, %9, %cst_13 {dimension_numbers = #tpu.dot_dimension_numbers<[1], [0], [0], [1], [0, 0, 1, 1], [], []>} : vector<16x4xf32>, vector<4x96xf32>, vector<16x96xf32> -> vector<16x96xf32>
    %c0_14 = arith.constant 0 : index
    %c0_15 = arith.constant 0 : index
    %11 = vector.load %arg9[%c0_14, %c0_15] : memref<1x96xf32, #tpu.memory_space<vmem>>, vector<1x96xf32>
    %12 = vector.broadcast %11 : vector<1x96xf32> to vector<16x96xf32>
    %13 = arith.addf %10, %12 : vector<16x96xf32>
    %cst_16 = arith.constant 0.000000e+00 : f32
    %14 = vector.broadcast %cst_16 : f32 to vector<2x32xf32>
    %cst_17 = arith.constant 0.000000e+00 : f32
    %15 = vector.broadcast %cst_17 : f32 to vector<2x32xf32>
    %cst_18 = arith.constant 0.000000e+00 : f32
    %16 = vector.broadcast %cst_18 : f32 to vector<2x32xf32>
    %17 = vector.extract_strided_slice %8 {offsets = [0, 0], sizes = [2, 128], strides = [1, 1]} : vector<16x128xf32> to vector<2x128xf32>
    %cst_19 = arith.constant dense<0.000000e+00> : vector<2x128xf32>
    %18 = tpu.matmul %14, %1, %cst_19 {dimension_numbers = #tpu.dot_dimension_numbers<[1], [0], [0], [1], [0, 0, 1, 1], [], []>} : vector<2x32xf32>, vector<32x128xf32>, vector<2x128xf32> -> vector<2x128xf32>
    %19 = arith.addf %17, %18 : vector<2x128xf32>
    %20 = arith.negf %19 : vector<2x128xf32>
    %21 = math.exp %20 : vector<2x128xf32>
    %cst_20 = arith.constant 1.000000e+00 : f32
    %22 = vector.broadcast %cst_20 : f32 to vector<2x128xf32>
    %23 = arith.addf %22, %21 : vector<2x128xf32>
    %24 = arith.divf %22, %23 : vector<2x128xf32>
    %25 = math.tanh %19 : vector<2x128xf32>
    %26 = vector.extract_strided_slice %24 {offsets = [0, 0], sizes = [2, 32], strides = [1, 1]} : vector<2x128xf32> to vector<2x32xf32>
    %27 = vector.extract_strided_slice %24 {offsets = [0, 32], sizes = [2, 32], strides = [1, 1]} : vector<2x128xf32> to vector<2x32xf32>
    %28 = vector.extract_strided_slice %25 {offsets = [0, 64], sizes = [2, 32], strides = [1, 1]} : vector<2x128xf32> to vector<2x32xf32>
    %29 = vector.extract_strided_slice %24 {offsets = [0, 96], sizes = [2, 32], strides = [1, 1]} : vector<2x128xf32> to vector<2x32xf32>
    %30 = arith.mulf %27, %15 : vector<2x32xf32>
    %31 = arith.mulf %26, %28 : vector<2x32xf32>
    %32 = arith.addf %30, %31 : vector<2x32xf32>
    %33 = math.tanh %32 : vector<2x32xf32>
    %34 = arith.mulf %29, %33 : vector<2x32xf32>
    %cst_21 = arith.constant dense<0.000000e+00> : vector<2x96xf32>
    %35 = tpu.matmul %16, %2, %cst_21 {dimension_numbers = #tpu.dot_dimension_numbers<[1], [0], [0], [1], [0, 0, 1, 1], [], []>} : vector<2x32xf32>, vector<32x96xf32>, vector<2x96xf32> -> vector<2x96xf32>
    %36 = vector.broadcast %3 : vector<1x96xf32> to vector<2x96xf32>
    %37 = arith.addf %35, %36 : vector<2x96xf32>
    %38 = vector.extract_strided_slice %13 {offsets = [0, 0], sizes = [2, 96], strides = [1, 1]} : vector<16x96xf32> to vector<2x96xf32>
    %39 = vector.extract_strided_slice %38 {offsets = [0, 0], sizes = [2, 64], strides = [1, 1]} : vector<2x96xf32> to vector<2x64xf32>
    %40 = vector.extract_strided_slice %37 {offsets = [0, 0], sizes = [2, 64], strides = [1, 1]} : vector<2x96xf32> to vector<2x64xf32>
    %41 = arith.addf %39, %40 : vector<2x64xf32>
    %42 = arith.negf %41 : vector<2x64xf32>
    %43 = math.exp %42 : vector<2x64xf32>
    %cst_22 = arith.constant 1.000000e+00 : f32
    %44 = vector.broadcast %cst_22 : f32 to vector<2x64xf32>
    %45 = arith.addf %44, %43 : vector<2x64xf32>
    %46 = arith.divf %44, %45 : vector<2x64xf32>
    %47 = vector.extract_strided_slice %46 {offsets = [0, 0], sizes = [2, 32], strides = [1, 1]} : vector<2x64xf32> to vector<2x32xf32>
    %48 = vector.extract_strided_slice %46 {offsets = [0, 32], sizes = [2, 32], strides = [1, 1]} : vector<2x64xf32> to vector<2x32xf32>
    %49 = vector.extract_strided_slice %38 {offsets = [0, 64], sizes = [2, 32], strides = [1, 1]} : vector<2x96xf32> to vector<2x32xf32>
    %50 = vector.extract_strided_slice %37 {offsets = [0, 64], sizes = [2, 32], strides = [1, 1]} : vector<2x96xf32> to vector<2x32xf32>
    %51 = arith.mulf %47, %50 : vector<2x32xf32>
    %52 = arith.addf %49, %51 : vector<2x32xf32>
    %53 = math.tanh %52 : vector<2x32xf32>
    %cst_23 = arith.constant 1.000000e+00 : f32
    %54 = vector.broadcast %cst_23 : f32 to vector<2x32xf32>
    %55 = arith.subf %54, %48 : vector<2x32xf32>
    %56 = arith.mulf %55, %53 : vector<2x32xf32>
    %57 = arith.mulf %48, %16 : vector<2x32xf32>
    %58 = arith.addf %56, %57 : vector<2x32xf32>
    %59 = vector.extract_strided_slice %8 {offsets = [2, 0], sizes = [2, 128], strides = [1, 1]} : vector<16x128xf32> to vector<2x128xf32>
    %cst_24 = arith.constant dense<0.000000e+00> : vector<2x128xf32>
    %60 = tpu.matmul %34, %1, %cst_24 {dimension_numbers = #tpu.dot_dimension_numbers<[1], [0], [0], [1], [0, 0, 1, 1], [], []>} : vector<2x32xf32>, vector<32x128xf32>, vector<2x128xf32> -> vector<2x128xf32>
    %61 = arith.addf %59, %60 : vector<2x128xf32>
    %62 = arith.negf %61 : vector<2x128xf32>
    %63 = math.exp %62 : vector<2x128xf32>
    %cst_25 = arith.constant 1.000000e+00 : f32
    %64 = vector.broadcast %cst_25 : f32 to vector<2x128xf32>
    %65 = arith.addf %64, %63 : vector<2x128xf32>
    %66 = arith.divf %64, %65 : vector<2x128xf32>
    %67 = math.tanh %61 : vector<2x128xf32>
    %68 = vector.extract_strided_slice %66 {offsets = [0, 0], sizes = [2, 32], strides = [1, 1]} : vector<2x128xf32> to vector<2x32xf32>
    %69 = vector.extract_strided_slice %66 {offsets = [0, 32], sizes = [2, 32], strides = [1, 1]} : vector<2x128xf32> to vector<2x32xf32>
    %70 = vector.extract_strided_slice %67 {offsets = [0, 64], sizes = [2, 32], strides = [1, 1]} : vector<2x128xf32> to vector<2x32xf32>
    %71 = vector.extract_strided_slice %66 {offsets = [0, 96], sizes = [2, 32], strides = [1, 1]} : vector<2x128xf32> to vector<2x32xf32>
    %72 = arith.mulf %69, %32 : vector<2x32xf32>
    %73 = arith.mulf %68, %70 : vector<2x32xf32>
    %74 = arith.addf %72, %73 : vector<2x32xf32>
    %75 = math.tanh %74 : vector<2x32xf32>
    %76 = arith.mulf %71, %75 : vector<2x32xf32>
    %cst_26 = arith.constant dense<0.000000e+00> : vector<2x96xf32>
    %77 = tpu.matmul %58, %2, %cst_26 {dimension_numbers = #tpu.dot_dimension_numbers<[1], [0], [0], [1], [0, 0, 1, 1], [], []>} : vector<2x32xf32>, vector<32x96xf32>, vector<2x96xf32> -> vector<2x96xf32>
    %78 = vector.broadcast %3 : vector<1x96xf32> to vector<2x96xf32>
    %79 = arith.addf %77, %78 : vector<2x96xf32>
    %80 = vector.extract_strided_slice %13 {offsets = [2, 0], sizes = [2, 96], strides = [1, 1]} : vector<16x96xf32> to vector<2x96xf32>
    %81 = vector.extract_strided_slice %80 {offsets = [0, 0], sizes = [2, 64], strides = [1, 1]} : vector<2x96xf32> to vector<2x64xf32>
    %82 = vector.extract_strided_slice %79 {offsets = [0, 0], sizes = [2, 64], strides = [1, 1]} : vector<2x96xf32> to vector<2x64xf32>
    %83 = arith.addf %81, %82 : vector<2x64xf32>
    %84 = arith.negf %83 : vector<2x64xf32>
    %85 = math.exp %84 : vector<2x64xf32>
    %cst_27 = arith.constant 1.000000e+00 : f32
    %86 = vector.broadcast %cst_27 : f32 to vector<2x64xf32>
    %87 = arith.addf %86, %85 : vector<2x64xf32>
    %88 = arith.divf %86, %87 : vector<2x64xf32>
    %89 = vector.extract_strided_slice %88 {offsets = [0, 0], sizes = [2, 32], strides = [1, 1]} : vector<2x64xf32> to vector<2x32xf32>
    %90 = vector.extract_strided_slice %88 {offsets = [0, 32], sizes = [2, 32], strides = [1, 1]} : vector<2x64xf32> to vector<2x32xf32>
    %91 = vector.extract_strided_slice %80 {offsets = [0, 64], sizes = [2, 32], strides = [1, 1]} : vector<2x96xf32> to vector<2x32xf32>
    %92 = vector.extract_strided_slice %79 {offsets = [0, 64], sizes = [2, 32], strides = [1, 1]} : vector<2x96xf32> to vector<2x32xf32>
    %93 = arith.mulf %89, %92 : vector<2x32xf32>
    %94 = arith.addf %91, %93 : vector<2x32xf32>
    %95 = math.tanh %94 : vector<2x32xf32>
    %cst_28 = arith.constant 1.000000e+00 : f32
    %96 = vector.broadcast %cst_28 : f32 to vector<2x32xf32>
    %97 = arith.subf %96, %90 : vector<2x32xf32>
    %98 = arith.mulf %97, %95 : vector<2x32xf32>
    %99 = arith.mulf %90, %58 : vector<2x32xf32>
    %100 = arith.addf %98, %99 : vector<2x32xf32>
    %101 = vector.extract_strided_slice %8 {offsets = [4, 0], sizes = [2, 128], strides = [1, 1]} : vector<16x128xf32> to vector<2x128xf32>
    %cst_29 = arith.constant dense<0.000000e+00> : vector<2x128xf32>
    %102 = tpu.matmul %76, %1, %cst_29 {dimension_numbers = #tpu.dot_dimension_numbers<[1], [0], [0], [1], [0, 0, 1, 1], [], []>} : vector<2x32xf32>, vector<32x128xf32>, vector<2x128xf32> -> vector<2x128xf32>
    %103 = arith.addf %101, %102 : vector<2x128xf32>
    %104 = arith.negf %103 : vector<2x128xf32>
    %105 = math.exp %104 : vector<2x128xf32>
    %cst_30 = arith.constant 1.000000e+00 : f32
    %106 = vector.broadcast %cst_30 : f32 to vector<2x128xf32>
    %107 = arith.addf %106, %105 : vector<2x128xf32>
    %108 = arith.divf %106, %107 : vector<2x128xf32>
    %109 = math.tanh %103 : vector<2x128xf32>
    %110 = vector.extract_strided_slice %108 {offsets = [0, 0], sizes = [2, 32], strides = [1, 1]} : vector<2x128xf32> to vector<2x32xf32>
    %111 = vector.extract_strided_slice %108 {offsets = [0, 32], sizes = [2, 32], strides = [1, 1]} : vector<2x128xf32> to vector<2x32xf32>
    %112 = vector.extract_strided_slice %109 {offsets = [0, 64], sizes = [2, 32], strides = [1, 1]} : vector<2x128xf32> to vector<2x32xf32>
    %113 = vector.extract_strided_slice %108 {offsets = [0, 96], sizes = [2, 32], strides = [1, 1]} : vector<2x128xf32> to vector<2x32xf32>
    %114 = arith.mulf %111, %74 : vector<2x32xf32>
    %115 = arith.mulf %110, %112 : vector<2x32xf32>
    %116 = arith.addf %114, %115 : vector<2x32xf32>
    %117 = math.tanh %116 : vector<2x32xf32>
    %118 = arith.mulf %113, %117 : vector<2x32xf32>
    %cst_31 = arith.constant dense<0.000000e+00> : vector<2x96xf32>
    %119 = tpu.matmul %100, %2, %cst_31 {dimension_numbers = #tpu.dot_dimension_numbers<[1], [0], [0], [1], [0, 0, 1, 1], [], []>} : vector<2x32xf32>, vector<32x96xf32>, vector<2x96xf32> -> vector<2x96xf32>
    %120 = vector.broadcast %3 : vector<1x96xf32> to vector<2x96xf32>
    %121 = arith.addf %119, %120 : vector<2x96xf32>
    %122 = vector.extract_strided_slice %13 {offsets = [4, 0], sizes = [2, 96], strides = [1, 1]} : vector<16x96xf32> to vector<2x96xf32>
    %123 = vector.extract_strided_slice %122 {offsets = [0, 0], sizes = [2, 64], strides = [1, 1]} : vector<2x96xf32> to vector<2x64xf32>
    %124 = vector.extract_strided_slice %121 {offsets = [0, 0], sizes = [2, 64], strides = [1, 1]} : vector<2x96xf32> to vector<2x64xf32>
    %125 = arith.addf %123, %124 : vector<2x64xf32>
    %126 = arith.negf %125 : vector<2x64xf32>
    %127 = math.exp %126 : vector<2x64xf32>
    %cst_32 = arith.constant 1.000000e+00 : f32
    %128 = vector.broadcast %cst_32 : f32 to vector<2x64xf32>
    %129 = arith.addf %128, %127 : vector<2x64xf32>
    %130 = arith.divf %128, %129 : vector<2x64xf32>
    %131 = vector.extract_strided_slice %130 {offsets = [0, 0], sizes = [2, 32], strides = [1, 1]} : vector<2x64xf32> to vector<2x32xf32>
    %132 = vector.extract_strided_slice %130 {offsets = [0, 32], sizes = [2, 32], strides = [1, 1]} : vector<2x64xf32> to vector<2x32xf32>
    %133 = vector.extract_strided_slice %122 {offsets = [0, 64], sizes = [2, 32], strides = [1, 1]} : vector<2x96xf32> to vector<2x32xf32>
    %134 = vector.extract_strided_slice %121 {offsets = [0, 64], sizes = [2, 32], strides = [1, 1]} : vector<2x96xf32> to vector<2x32xf32>
    %135 = arith.mulf %131, %134 : vector<2x32xf32>
    %136 = arith.addf %133, %135 : vector<2x32xf32>
    %137 = math.tanh %136 : vector<2x32xf32>
    %cst_33 = arith.constant 1.000000e+00 : f32
    %138 = vector.broadcast %cst_33 : f32 to vector<2x32xf32>
    %139 = arith.subf %138, %132 : vector<2x32xf32>
    %140 = arith.mulf %139, %137 : vector<2x32xf32>
    %141 = arith.mulf %132, %100 : vector<2x32xf32>
    %142 = arith.addf %140, %141 : vector<2x32xf32>
    %143 = vector.extract_strided_slice %8 {offsets = [6, 0], sizes = [2, 128], strides = [1, 1]} : vector<16x128xf32> to vector<2x128xf32>
    %cst_34 = arith.constant dense<0.000000e+00> : vector<2x128xf32>
    %144 = tpu.matmul %118, %1, %cst_34 {dimension_numbers = #tpu.dot_dimension_numbers<[1], [0], [0], [1], [0, 0, 1, 1], [], []>} : vector<2x32xf32>, vector<32x128xf32>, vector<2x128xf32> -> vector<2x128xf32>
    %145 = arith.addf %143, %144 : vector<2x128xf32>
    %146 = arith.negf %145 : vector<2x128xf32>
    %147 = math.exp %146 : vector<2x128xf32>
    %cst_35 = arith.constant 1.000000e+00 : f32
    %148 = vector.broadcast %cst_35 : f32 to vector<2x128xf32>
    %149 = arith.addf %148, %147 : vector<2x128xf32>
    %150 = arith.divf %148, %149 : vector<2x128xf32>
    %151 = math.tanh %145 : vector<2x128xf32>
    %152 = vector.extract_strided_slice %150 {offsets = [0, 0], sizes = [2, 32], strides = [1, 1]} : vector<2x128xf32> to vector<2x32xf32>
    %153 = vector.extract_strided_slice %150 {offsets = [0, 32], sizes = [2, 32], strides = [1, 1]} : vector<2x128xf32> to vector<2x32xf32>
    %154 = vector.extract_strided_slice %151 {offsets = [0, 64], sizes = [2, 32], strides = [1, 1]} : vector<2x128xf32> to vector<2x32xf32>
    %155 = vector.extract_strided_slice %150 {offsets = [0, 96], sizes = [2, 32], strides = [1, 1]} : vector<2x128xf32> to vector<2x32xf32>
    %156 = arith.mulf %153, %116 : vector<2x32xf32>
    %157 = arith.mulf %152, %154 : vector<2x32xf32>
    %158 = arith.addf %156, %157 : vector<2x32xf32>
    %159 = math.tanh %158 : vector<2x32xf32>
    %160 = arith.mulf %155, %159 : vector<2x32xf32>
    %cst_36 = arith.constant dense<0.000000e+00> : vector<2x96xf32>
    %161 = tpu.matmul %142, %2, %cst_36 {dimension_numbers = #tpu.dot_dimension_numbers<[1], [0], [0], [1], [0, 0, 1, 1], [], []>} : vector<2x32xf32>, vector<32x96xf32>, vector<2x96xf32> -> vector<2x96xf32>
    %162 = vector.broadcast %3 : vector<1x96xf32> to vector<2x96xf32>
    %163 = arith.addf %161, %162 : vector<2x96xf32>
    %164 = vector.extract_strided_slice %13 {offsets = [6, 0], sizes = [2, 96], strides = [1, 1]} : vector<16x96xf32> to vector<2x96xf32>
    %165 = vector.extract_strided_slice %164 {offsets = [0, 0], sizes = [2, 64], strides = [1, 1]} : vector<2x96xf32> to vector<2x64xf32>
    %166 = vector.extract_strided_slice %163 {offsets = [0, 0], sizes = [2, 64], strides = [1, 1]} : vector<2x96xf32> to vector<2x64xf32>
    %167 = arith.addf %165, %166 : vector<2x64xf32>
    %168 = arith.negf %167 : vector<2x64xf32>
    %169 = math.exp %168 : vector<2x64xf32>
    %cst_37 = arith.constant 1.000000e+00 : f32
    %170 = vector.broadcast %cst_37 : f32 to vector<2x64xf32>
    %171 = arith.addf %170, %169 : vector<2x64xf32>
    %172 = arith.divf %170, %171 : vector<2x64xf32>
    %173 = vector.extract_strided_slice %172 {offsets = [0, 0], sizes = [2, 32], strides = [1, 1]} : vector<2x64xf32> to vector<2x32xf32>
    %174 = vector.extract_strided_slice %172 {offsets = [0, 32], sizes = [2, 32], strides = [1, 1]} : vector<2x64xf32> to vector<2x32xf32>
    %175 = vector.extract_strided_slice %164 {offsets = [0, 64], sizes = [2, 32], strides = [1, 1]} : vector<2x96xf32> to vector<2x32xf32>
    %176 = vector.extract_strided_slice %163 {offsets = [0, 64], sizes = [2, 32], strides = [1, 1]} : vector<2x96xf32> to vector<2x32xf32>
    %177 = arith.mulf %173, %176 : vector<2x32xf32>
    %178 = arith.addf %175, %177 : vector<2x32xf32>
    %179 = math.tanh %178 : vector<2x32xf32>
    %cst_38 = arith.constant 1.000000e+00 : f32
    %180 = vector.broadcast %cst_38 : f32 to vector<2x32xf32>
    %181 = arith.subf %180, %174 : vector<2x32xf32>
    %182 = arith.mulf %181, %179 : vector<2x32xf32>
    %183 = arith.mulf %174, %142 : vector<2x32xf32>
    %184 = arith.addf %182, %183 : vector<2x32xf32>
    %185 = vector.extract_strided_slice %8 {offsets = [8, 0], sizes = [2, 128], strides = [1, 1]} : vector<16x128xf32> to vector<2x128xf32>
    %cst_39 = arith.constant dense<0.000000e+00> : vector<2x128xf32>
    %186 = tpu.matmul %160, %1, %cst_39 {dimension_numbers = #tpu.dot_dimension_numbers<[1], [0], [0], [1], [0, 0, 1, 1], [], []>} : vector<2x32xf32>, vector<32x128xf32>, vector<2x128xf32> -> vector<2x128xf32>
    %187 = arith.addf %185, %186 : vector<2x128xf32>
    %188 = arith.negf %187 : vector<2x128xf32>
    %189 = math.exp %188 : vector<2x128xf32>
    %cst_40 = arith.constant 1.000000e+00 : f32
    %190 = vector.broadcast %cst_40 : f32 to vector<2x128xf32>
    %191 = arith.addf %190, %189 : vector<2x128xf32>
    %192 = arith.divf %190, %191 : vector<2x128xf32>
    %193 = math.tanh %187 : vector<2x128xf32>
    %194 = vector.extract_strided_slice %192 {offsets = [0, 0], sizes = [2, 32], strides = [1, 1]} : vector<2x128xf32> to vector<2x32xf32>
    %195 = vector.extract_strided_slice %192 {offsets = [0, 32], sizes = [2, 32], strides = [1, 1]} : vector<2x128xf32> to vector<2x32xf32>
    %196 = vector.extract_strided_slice %193 {offsets = [0, 64], sizes = [2, 32], strides = [1, 1]} : vector<2x128xf32> to vector<2x32xf32>
    %197 = vector.extract_strided_slice %192 {offsets = [0, 96], sizes = [2, 32], strides = [1, 1]} : vector<2x128xf32> to vector<2x32xf32>
    %198 = arith.mulf %195, %158 : vector<2x32xf32>
    %199 = arith.mulf %194, %196 : vector<2x32xf32>
    %200 = arith.addf %198, %199 : vector<2x32xf32>
    %201 = math.tanh %200 : vector<2x32xf32>
    %202 = arith.mulf %197, %201 : vector<2x32xf32>
    %cst_41 = arith.constant dense<0.000000e+00> : vector<2x96xf32>
    %203 = tpu.matmul %184, %2, %cst_41 {dimension_numbers = #tpu.dot_dimension_numbers<[1], [0], [0], [1], [0, 0, 1, 1], [], []>} : vector<2x32xf32>, vector<32x96xf32>, vector<2x96xf32> -> vector<2x96xf32>
    %204 = vector.broadcast %3 : vector<1x96xf32> to vector<2x96xf32>
    %205 = arith.addf %203, %204 : vector<2x96xf32>
    %206 = vector.extract_strided_slice %13 {offsets = [8, 0], sizes = [2, 96], strides = [1, 1]} : vector<16x96xf32> to vector<2x96xf32>
    %207 = vector.extract_strided_slice %206 {offsets = [0, 0], sizes = [2, 64], strides = [1, 1]} : vector<2x96xf32> to vector<2x64xf32>
    %208 = vector.extract_strided_slice %205 {offsets = [0, 0], sizes = [2, 64], strides = [1, 1]} : vector<2x96xf32> to vector<2x64xf32>
    %209 = arith.addf %207, %208 : vector<2x64xf32>
    %210 = arith.negf %209 : vector<2x64xf32>
    %211 = math.exp %210 : vector<2x64xf32>
    %cst_42 = arith.constant 1.000000e+00 : f32
    %212 = vector.broadcast %cst_42 : f32 to vector<2x64xf32>
    %213 = arith.addf %212, %211 : vector<2x64xf32>
    %214 = arith.divf %212, %213 : vector<2x64xf32>
    %215 = vector.extract_strided_slice %214 {offsets = [0, 0], sizes = [2, 32], strides = [1, 1]} : vector<2x64xf32> to vector<2x32xf32>
    %216 = vector.extract_strided_slice %214 {offsets = [0, 32], sizes = [2, 32], strides = [1, 1]} : vector<2x64xf32> to vector<2x32xf32>
    %217 = vector.extract_strided_slice %206 {offsets = [0, 64], sizes = [2, 32], strides = [1, 1]} : vector<2x96xf32> to vector<2x32xf32>
    %218 = vector.extract_strided_slice %205 {offsets = [0, 64], sizes = [2, 32], strides = [1, 1]} : vector<2x96xf32> to vector<2x32xf32>
    %219 = arith.mulf %215, %218 : vector<2x32xf32>
    %220 = arith.addf %217, %219 : vector<2x32xf32>
    %221 = math.tanh %220 : vector<2x32xf32>
    %cst_43 = arith.constant 1.000000e+00 : f32
    %222 = vector.broadcast %cst_43 : f32 to vector<2x32xf32>
    %223 = arith.subf %222, %216 : vector<2x32xf32>
    %224 = arith.mulf %223, %221 : vector<2x32xf32>
    %225 = arith.mulf %216, %184 : vector<2x32xf32>
    %226 = arith.addf %224, %225 : vector<2x32xf32>
    %227 = vector.extract_strided_slice %8 {offsets = [10, 0], sizes = [2, 128], strides = [1, 1]} : vector<16x128xf32> to vector<2x128xf32>
    %cst_44 = arith.constant dense<0.000000e+00> : vector<2x128xf32>
    %228 = tpu.matmul %202, %1, %cst_44 {dimension_numbers = #tpu.dot_dimension_numbers<[1], [0], [0], [1], [0, 0, 1, 1], [], []>} : vector<2x32xf32>, vector<32x128xf32>, vector<2x128xf32> -> vector<2x128xf32>
    %229 = arith.addf %227, %228 : vector<2x128xf32>
    %230 = arith.negf %229 : vector<2x128xf32>
    %231 = math.exp %230 : vector<2x128xf32>
    %cst_45 = arith.constant 1.000000e+00 : f32
    %232 = vector.broadcast %cst_45 : f32 to vector<2x128xf32>
    %233 = arith.addf %232, %231 : vector<2x128xf32>
    %234 = arith.divf %232, %233 : vector<2x128xf32>
    %235 = math.tanh %229 : vector<2x128xf32>
    %236 = vector.extract_strided_slice %234 {offsets = [0, 0], sizes = [2, 32], strides = [1, 1]} : vector<2x128xf32> to vector<2x32xf32>
    %237 = vector.extract_strided_slice %234 {offsets = [0, 32], sizes = [2, 32], strides = [1, 1]} : vector<2x128xf32> to vector<2x32xf32>
    %238 = vector.extract_strided_slice %235 {offsets = [0, 64], sizes = [2, 32], strides = [1, 1]} : vector<2x128xf32> to vector<2x32xf32>
    %239 = vector.extract_strided_slice %234 {offsets = [0, 96], sizes = [2, 32], strides = [1, 1]} : vector<2x128xf32> to vector<2x32xf32>
    %240 = arith.mulf %237, %200 : vector<2x32xf32>
    %241 = arith.mulf %236, %238 : vector<2x32xf32>
    %242 = arith.addf %240, %241 : vector<2x32xf32>
    %243 = math.tanh %242 : vector<2x32xf32>
    %244 = arith.mulf %239, %243 : vector<2x32xf32>
    %cst_46 = arith.constant dense<0.000000e+00> : vector<2x96xf32>
    %245 = tpu.matmul %226, %2, %cst_46 {dimension_numbers = #tpu.dot_dimension_numbers<[1], [0], [0], [1], [0, 0, 1, 1], [], []>} : vector<2x32xf32>, vector<32x96xf32>, vector<2x96xf32> -> vector<2x96xf32>
    %246 = vector.broadcast %3 : vector<1x96xf32> to vector<2x96xf32>
    %247 = arith.addf %245, %246 : vector<2x96xf32>
    %248 = vector.extract_strided_slice %13 {offsets = [10, 0], sizes = [2, 96], strides = [1, 1]} : vector<16x96xf32> to vector<2x96xf32>
    %249 = vector.extract_strided_slice %248 {offsets = [0, 0], sizes = [2, 64], strides = [1, 1]} : vector<2x96xf32> to vector<2x64xf32>
    %250 = vector.extract_strided_slice %247 {offsets = [0, 0], sizes = [2, 64], strides = [1, 1]} : vector<2x96xf32> to vector<2x64xf32>
    %251 = arith.addf %249, %250 : vector<2x64xf32>
    %252 = arith.negf %251 : vector<2x64xf32>
    %253 = math.exp %252 : vector<2x64xf32>
    %cst_47 = arith.constant 1.000000e+00 : f32
    %254 = vector.broadcast %cst_47 : f32 to vector<2x64xf32>
    %255 = arith.addf %254, %253 : vector<2x64xf32>
    %256 = arith.divf %254, %255 : vector<2x64xf32>
    %257 = vector.extract_strided_slice %256 {offsets = [0, 0], sizes = [2, 32], strides = [1, 1]} : vector<2x64xf32> to vector<2x32xf32>
    %258 = vector.extract_strided_slice %256 {offsets = [0, 32], sizes = [2, 32], strides = [1, 1]} : vector<2x64xf32> to vector<2x32xf32>
    %259 = vector.extract_strided_slice %248 {offsets = [0, 64], sizes = [2, 32], strides = [1, 1]} : vector<2x96xf32> to vector<2x32xf32>
    %260 = vector.extract_strided_slice %247 {offsets = [0, 64], sizes = [2, 32], strides = [1, 1]} : vector<2x96xf32> to vector<2x32xf32>
    %261 = arith.mulf %257, %260 : vector<2x32xf32>
    %262 = arith.addf %259, %261 : vector<2x32xf32>
    %263 = math.tanh %262 : vector<2x32xf32>
    %cst_48 = arith.constant 1.000000e+00 : f32
    %264 = vector.broadcast %cst_48 : f32 to vector<2x32xf32>
    %265 = arith.subf %264, %258 : vector<2x32xf32>
    %266 = arith.mulf %265, %263 : vector<2x32xf32>
    %267 = arith.mulf %258, %226 : vector<2x32xf32>
    %268 = arith.addf %266, %267 : vector<2x32xf32>
    %269 = vector.extract_strided_slice %8 {offsets = [12, 0], sizes = [2, 128], strides = [1, 1]} : vector<16x128xf32> to vector<2x128xf32>
    %cst_49 = arith.constant dense<0.000000e+00> : vector<2x128xf32>
    %270 = tpu.matmul %244, %1, %cst_49 {dimension_numbers = #tpu.dot_dimension_numbers<[1], [0], [0], [1], [0, 0, 1, 1], [], []>} : vector<2x32xf32>, vector<32x128xf32>, vector<2x128xf32> -> vector<2x128xf32>
    %271 = arith.addf %269, %270 : vector<2x128xf32>
    %272 = arith.negf %271 : vector<2x128xf32>
    %273 = math.exp %272 : vector<2x128xf32>
    %cst_50 = arith.constant 1.000000e+00 : f32
    %274 = vector.broadcast %cst_50 : f32 to vector<2x128xf32>
    %275 = arith.addf %274, %273 : vector<2x128xf32>
    %276 = arith.divf %274, %275 : vector<2x128xf32>
    %277 = math.tanh %271 : vector<2x128xf32>
    %278 = vector.extract_strided_slice %276 {offsets = [0, 0], sizes = [2, 32], strides = [1, 1]} : vector<2x128xf32> to vector<2x32xf32>
    %279 = vector.extract_strided_slice %276 {offsets = [0, 32], sizes = [2, 32], strides = [1, 1]} : vector<2x128xf32> to vector<2x32xf32>
    %280 = vector.extract_strided_slice %277 {offsets = [0, 64], sizes = [2, 32], strides = [1, 1]} : vector<2x128xf32> to vector<2x32xf32>
    %281 = vector.extract_strided_slice %276 {offsets = [0, 96], sizes = [2, 32], strides = [1, 1]} : vector<2x128xf32> to vector<2x32xf32>
    %282 = arith.mulf %279, %242 : vector<2x32xf32>
    %283 = arith.mulf %278, %280 : vector<2x32xf32>
    %284 = arith.addf %282, %283 : vector<2x32xf32>
    %285 = math.tanh %284 : vector<2x32xf32>
    %286 = arith.mulf %281, %285 : vector<2x32xf32>
    %cst_51 = arith.constant dense<0.000000e+00> : vector<2x96xf32>
    %287 = tpu.matmul %268, %2, %cst_51 {dimension_numbers = #tpu.dot_dimension_numbers<[1], [0], [0], [1], [0, 0, 1, 1], [], []>} : vector<2x32xf32>, vector<32x96xf32>, vector<2x96xf32> -> vector<2x96xf32>
    %288 = vector.broadcast %3 : vector<1x96xf32> to vector<2x96xf32>
    %289 = arith.addf %287, %288 : vector<2x96xf32>
    %290 = vector.extract_strided_slice %13 {offsets = [12, 0], sizes = [2, 96], strides = [1, 1]} : vector<16x96xf32> to vector<2x96xf32>
    %291 = vector.extract_strided_slice %290 {offsets = [0, 0], sizes = [2, 64], strides = [1, 1]} : vector<2x96xf32> to vector<2x64xf32>
    %292 = vector.extract_strided_slice %289 {offsets = [0, 0], sizes = [2, 64], strides = [1, 1]} : vector<2x96xf32> to vector<2x64xf32>
    %293 = arith.addf %291, %292 : vector<2x64xf32>
    %294 = arith.negf %293 : vector<2x64xf32>
    %295 = math.exp %294 : vector<2x64xf32>
    %cst_52 = arith.constant 1.000000e+00 : f32
    %296 = vector.broadcast %cst_52 : f32 to vector<2x64xf32>
    %297 = arith.addf %296, %295 : vector<2x64xf32>
    %298 = arith.divf %296, %297 : vector<2x64xf32>
    %299 = vector.extract_strided_slice %298 {offsets = [0, 0], sizes = [2, 32], strides = [1, 1]} : vector<2x64xf32> to vector<2x32xf32>
    %300 = vector.extract_strided_slice %298 {offsets = [0, 32], sizes = [2, 32], strides = [1, 1]} : vector<2x64xf32> to vector<2x32xf32>
    %301 = vector.extract_strided_slice %290 {offsets = [0, 64], sizes = [2, 32], strides = [1, 1]} : vector<2x96xf32> to vector<2x32xf32>
    %302 = vector.extract_strided_slice %289 {offsets = [0, 64], sizes = [2, 32], strides = [1, 1]} : vector<2x96xf32> to vector<2x32xf32>
    %303 = arith.mulf %299, %302 : vector<2x32xf32>
    %304 = arith.addf %301, %303 : vector<2x32xf32>
    %305 = math.tanh %304 : vector<2x32xf32>
    %cst_53 = arith.constant 1.000000e+00 : f32
    %306 = vector.broadcast %cst_53 : f32 to vector<2x32xf32>
    %307 = arith.subf %306, %300 : vector<2x32xf32>
    %308 = arith.mulf %307, %305 : vector<2x32xf32>
    %309 = arith.mulf %300, %268 : vector<2x32xf32>
    %310 = arith.addf %308, %309 : vector<2x32xf32>
    %311 = vector.extract_strided_slice %8 {offsets = [14, 0], sizes = [2, 128], strides = [1, 1]} : vector<16x128xf32> to vector<2x128xf32>
    %cst_54 = arith.constant dense<0.000000e+00> : vector<2x128xf32>
    %312 = tpu.matmul %286, %1, %cst_54 {dimension_numbers = #tpu.dot_dimension_numbers<[1], [0], [0], [1], [0, 0, 1, 1], [], []>} : vector<2x32xf32>, vector<32x128xf32>, vector<2x128xf32> -> vector<2x128xf32>
    %313 = arith.addf %311, %312 : vector<2x128xf32>
    %314 = arith.negf %313 : vector<2x128xf32>
    %315 = math.exp %314 : vector<2x128xf32>
    %cst_55 = arith.constant 1.000000e+00 : f32
    %316 = vector.broadcast %cst_55 : f32 to vector<2x128xf32>
    %317 = arith.addf %316, %315 : vector<2x128xf32>
    %318 = arith.divf %316, %317 : vector<2x128xf32>
    %319 = math.tanh %313 : vector<2x128xf32>
    %320 = vector.extract_strided_slice %318 {offsets = [0, 0], sizes = [2, 32], strides = [1, 1]} : vector<2x128xf32> to vector<2x32xf32>
    %321 = vector.extract_strided_slice %318 {offsets = [0, 32], sizes = [2, 32], strides = [1, 1]} : vector<2x128xf32> to vector<2x32xf32>
    %322 = vector.extract_strided_slice %319 {offsets = [0, 64], sizes = [2, 32], strides = [1, 1]} : vector<2x128xf32> to vector<2x32xf32>
    %323 = vector.extract_strided_slice %318 {offsets = [0, 96], sizes = [2, 32], strides = [1, 1]} : vector<2x128xf32> to vector<2x32xf32>
    %324 = arith.mulf %321, %284 : vector<2x32xf32>
    %325 = arith.mulf %320, %322 : vector<2x32xf32>
    %326 = arith.addf %324, %325 : vector<2x32xf32>
    %327 = math.tanh %326 : vector<2x32xf32>
    %328 = arith.mulf %323, %327 : vector<2x32xf32>
    %cst_56 = arith.constant dense<0.000000e+00> : vector<2x96xf32>
    %329 = tpu.matmul %310, %2, %cst_56 {dimension_numbers = #tpu.dot_dimension_numbers<[1], [0], [0], [1], [0, 0, 1, 1], [], []>} : vector<2x32xf32>, vector<32x96xf32>, vector<2x96xf32> -> vector<2x96xf32>
    %330 = vector.broadcast %3 : vector<1x96xf32> to vector<2x96xf32>
    %331 = arith.addf %329, %330 : vector<2x96xf32>
    %332 = vector.extract_strided_slice %13 {offsets = [14, 0], sizes = [2, 96], strides = [1, 1]} : vector<16x96xf32> to vector<2x96xf32>
    %333 = vector.extract_strided_slice %332 {offsets = [0, 0], sizes = [2, 64], strides = [1, 1]} : vector<2x96xf32> to vector<2x64xf32>
    %334 = vector.extract_strided_slice %331 {offsets = [0, 0], sizes = [2, 64], strides = [1, 1]} : vector<2x96xf32> to vector<2x64xf32>
    %335 = arith.addf %333, %334 : vector<2x64xf32>
    %336 = arith.negf %335 : vector<2x64xf32>
    %337 = math.exp %336 : vector<2x64xf32>
    %cst_57 = arith.constant 1.000000e+00 : f32
    %338 = vector.broadcast %cst_57 : f32 to vector<2x64xf32>
    %339 = arith.addf %338, %337 : vector<2x64xf32>
    %340 = arith.divf %338, %339 : vector<2x64xf32>
    %341 = vector.extract_strided_slice %340 {offsets = [0, 0], sizes = [2, 32], strides = [1, 1]} : vector<2x64xf32> to vector<2x32xf32>
    %342 = vector.extract_strided_slice %340 {offsets = [0, 32], sizes = [2, 32], strides = [1, 1]} : vector<2x64xf32> to vector<2x32xf32>
    %343 = vector.extract_strided_slice %332 {offsets = [0, 64], sizes = [2, 32], strides = [1, 1]} : vector<2x96xf32> to vector<2x32xf32>
    %344 = vector.extract_strided_slice %331 {offsets = [0, 64], sizes = [2, 32], strides = [1, 1]} : vector<2x96xf32> to vector<2x32xf32>
    %345 = arith.mulf %341, %344 : vector<2x32xf32>
    %346 = arith.addf %343, %345 : vector<2x32xf32>
    %347 = math.tanh %346 : vector<2x32xf32>
    %cst_58 = arith.constant 1.000000e+00 : f32
    %348 = vector.broadcast %cst_58 : f32 to vector<2x32xf32>
    %349 = arith.subf %348, %342 : vector<2x32xf32>
    %350 = arith.mulf %349, %347 : vector<2x32xf32>
    %351 = arith.mulf %342, %310 : vector<2x32xf32>
    %352 = arith.addf %350, %351 : vector<2x32xf32>
    %353 = tpu.concatenate %34, %76, %118, %160, %202, %244, %286, %328 in 0 : vector<2x32xf32>, vector<2x32xf32>, vector<2x32xf32>, vector<2x32xf32>, vector<2x32xf32>, vector<2x32xf32>, vector<2x32xf32>, vector<2x32xf32> -> vector<16x32xf32>
    %354 = tpu.concatenate %58, %100, %142, %184, %226, %268, %310, %352 in 0 : vector<2x32xf32>, vector<2x32xf32>, vector<2x32xf32>, vector<2x32xf32>, vector<2x32xf32>, vector<2x32xf32>, vector<2x32xf32>, vector<2x32xf32> -> vector<16x32xf32>
    %c0_59 = arith.constant 0 : index
    %c0_60 = arith.constant 0 : index
    %355 = vector.load %arg5[%c0_59, %c0_60] : memref<32x128xf32, #tpu.memory_space<vmem>>, vector<32x128xf32>
    %c0_61 = arith.constant 0 : index
    %c0_62 = arith.constant 0 : index
    %356 = vector.load %arg12[%c0_61, %c0_62] : memref<32x96xf32, #tpu.memory_space<vmem>>, vector<32x96xf32>
    %c0_63 = arith.constant 0 : index
    %c0_64 = arith.constant 0 : index
    %357 = vector.load %arg14[%c0_63, %c0_64] : memref<1x96xf32, #tpu.memory_space<vmem>>, vector<1x96xf32>
    %c0_65 = arith.constant 0 : index
    %c0_66 = arith.constant 0 : index
    %358 = vector.load %arg4[%c0_65, %c0_66] : memref<32x128xf32, #tpu.memory_space<vmem>>, vector<32x128xf32>
    %cst_67 = arith.constant dense<0.000000e+00> : vector<16x128xf32>
    %359 = tpu.matmul %353, %358, %cst_67 {dimension_numbers = #tpu.dot_dimension_numbers<[1], [0], [0], [1], [0, 0, 1, 1], [], []>} : vector<16x32xf32>, vector<32x128xf32>, vector<16x128xf32> -> vector<16x128xf32>
    %c0_68 = arith.constant 0 : index
    %c0_69 = arith.constant 0 : index
    %360 = vector.load %arg6[%c0_68, %c0_69] : memref<1x128xf32, #tpu.memory_space<vmem>>, vector<1x128xf32>
    %361 = vector.broadcast %360 : vector<1x128xf32> to vector<16x128xf32>
    %362 = arith.addf %359, %361 : vector<16x128xf32>
    %c0_70 = arith.constant 0 : index
    %c0_71 = arith.constant 0 : index
    %363 = vector.load %arg11[%c0_70, %c0_71] : memref<32x96xf32, #tpu.memory_space<vmem>>, vector<32x96xf32>
    %cst_72 = arith.constant dense<0.000000e+00> : vector<16x96xf32>
    %364 = tpu.matmul %354, %363, %cst_72 {dimension_numbers = #tpu.dot_dimension_numbers<[1], [0], [0], [1], [0, 0, 1, 1], [], []>} : vector<16x32xf32>, vector<32x96xf32>, vector<16x96xf32> -> vector<16x96xf32>
    %c0_73 = arith.constant 0 : index
    %c0_74 = arith.constant 0 : index
    %365 = vector.load %arg13[%c0_73, %c0_74] : memref<1x96xf32, #tpu.memory_space<vmem>>, vector<1x96xf32>
    %366 = vector.broadcast %365 : vector<1x96xf32> to vector<16x96xf32>
    %367 = arith.addf %364, %366 : vector<16x96xf32>
    %cst_75 = arith.constant 0.000000e+00 : f32
    %368 = vector.broadcast %cst_75 : f32 to vector<2x32xf32>
    %cst_76 = arith.constant 0.000000e+00 : f32
    %369 = vector.broadcast %cst_76 : f32 to vector<2x32xf32>
    %cst_77 = arith.constant 0.000000e+00 : f32
    %370 = vector.broadcast %cst_77 : f32 to vector<2x32xf32>
    %371 = vector.extract_strided_slice %362 {offsets = [0, 0], sizes = [2, 128], strides = [1, 1]} : vector<16x128xf32> to vector<2x128xf32>
    %cst_78 = arith.constant dense<0.000000e+00> : vector<2x128xf32>
    %372 = tpu.matmul %368, %355, %cst_78 {dimension_numbers = #tpu.dot_dimension_numbers<[1], [0], [0], [1], [0, 0, 1, 1], [], []>} : vector<2x32xf32>, vector<32x128xf32>, vector<2x128xf32> -> vector<2x128xf32>
    %373 = arith.addf %371, %372 : vector<2x128xf32>
    %374 = arith.negf %373 : vector<2x128xf32>
    %375 = math.exp %374 : vector<2x128xf32>
    %cst_79 = arith.constant 1.000000e+00 : f32
    %376 = vector.broadcast %cst_79 : f32 to vector<2x128xf32>
    %377 = arith.addf %376, %375 : vector<2x128xf32>
    %378 = arith.divf %376, %377 : vector<2x128xf32>
    %379 = math.tanh %373 : vector<2x128xf32>
    %380 = vector.extract_strided_slice %378 {offsets = [0, 0], sizes = [2, 32], strides = [1, 1]} : vector<2x128xf32> to vector<2x32xf32>
    %381 = vector.extract_strided_slice %378 {offsets = [0, 32], sizes = [2, 32], strides = [1, 1]} : vector<2x128xf32> to vector<2x32xf32>
    %382 = vector.extract_strided_slice %379 {offsets = [0, 64], sizes = [2, 32], strides = [1, 1]} : vector<2x128xf32> to vector<2x32xf32>
    %383 = vector.extract_strided_slice %378 {offsets = [0, 96], sizes = [2, 32], strides = [1, 1]} : vector<2x128xf32> to vector<2x32xf32>
    %384 = arith.mulf %381, %369 : vector<2x32xf32>
    %385 = arith.mulf %380, %382 : vector<2x32xf32>
    %386 = arith.addf %384, %385 : vector<2x32xf32>
    %387 = math.tanh %386 : vector<2x32xf32>
    %388 = arith.mulf %383, %387 : vector<2x32xf32>
    %cst_80 = arith.constant dense<0.000000e+00> : vector<2x96xf32>
    %389 = tpu.matmul %370, %356, %cst_80 {dimension_numbers = #tpu.dot_dimension_numbers<[1], [0], [0], [1], [0, 0, 1, 1], [], []>} : vector<2x32xf32>, vector<32x96xf32>, vector<2x96xf32> -> vector<2x96xf32>
    %390 = vector.broadcast %357 : vector<1x96xf32> to vector<2x96xf32>
    %391 = arith.addf %389, %390 : vector<2x96xf32>
    %392 = vector.extract_strided_slice %367 {offsets = [0, 0], sizes = [2, 96], strides = [1, 1]} : vector<16x96xf32> to vector<2x96xf32>
    %393 = vector.extract_strided_slice %392 {offsets = [0, 0], sizes = [2, 64], strides = [1, 1]} : vector<2x96xf32> to vector<2x64xf32>
    %394 = vector.extract_strided_slice %391 {offsets = [0, 0], sizes = [2, 64], strides = [1, 1]} : vector<2x96xf32> to vector<2x64xf32>
    %395 = arith.addf %393, %394 : vector<2x64xf32>
    %396 = arith.negf %395 : vector<2x64xf32>
    %397 = math.exp %396 : vector<2x64xf32>
    %cst_81 = arith.constant 1.000000e+00 : f32
    %398 = vector.broadcast %cst_81 : f32 to vector<2x64xf32>
    %399 = arith.addf %398, %397 : vector<2x64xf32>
    %400 = arith.divf %398, %399 : vector<2x64xf32>
    %401 = vector.extract_strided_slice %400 {offsets = [0, 0], sizes = [2, 32], strides = [1, 1]} : vector<2x64xf32> to vector<2x32xf32>
    %402 = vector.extract_strided_slice %400 {offsets = [0, 32], sizes = [2, 32], strides = [1, 1]} : vector<2x64xf32> to vector<2x32xf32>
    %403 = vector.extract_strided_slice %392 {offsets = [0, 64], sizes = [2, 32], strides = [1, 1]} : vector<2x96xf32> to vector<2x32xf32>
    %404 = vector.extract_strided_slice %391 {offsets = [0, 64], sizes = [2, 32], strides = [1, 1]} : vector<2x96xf32> to vector<2x32xf32>
    %405 = arith.mulf %401, %404 : vector<2x32xf32>
    %406 = arith.addf %403, %405 : vector<2x32xf32>
    %407 = math.tanh %406 : vector<2x32xf32>
    %cst_82 = arith.constant 1.000000e+00 : f32
    %408 = vector.broadcast %cst_82 : f32 to vector<2x32xf32>
    %409 = arith.subf %408, %402 : vector<2x32xf32>
    %410 = arith.mulf %409, %407 : vector<2x32xf32>
    %411 = arith.mulf %402, %370 : vector<2x32xf32>
    %412 = arith.addf %410, %411 : vector<2x32xf32>
    %413 = vector.extract_strided_slice %362 {offsets = [2, 0], sizes = [2, 128], strides = [1, 1]} : vector<16x128xf32> to vector<2x128xf32>
    %cst_83 = arith.constant dense<0.000000e+00> : vector<2x128xf32>
    %414 = tpu.matmul %388, %355, %cst_83 {dimension_numbers = #tpu.dot_dimension_numbers<[1], [0], [0], [1], [0, 0, 1, 1], [], []>} : vector<2x32xf32>, vector<32x128xf32>, vector<2x128xf32> -> vector<2x128xf32>
    %415 = arith.addf %413, %414 : vector<2x128xf32>
    %416 = arith.negf %415 : vector<2x128xf32>
    %417 = math.exp %416 : vector<2x128xf32>
    %cst_84 = arith.constant 1.000000e+00 : f32
    %418 = vector.broadcast %cst_84 : f32 to vector<2x128xf32>
    %419 = arith.addf %418, %417 : vector<2x128xf32>
    %420 = arith.divf %418, %419 : vector<2x128xf32>
    %421 = math.tanh %415 : vector<2x128xf32>
    %422 = vector.extract_strided_slice %420 {offsets = [0, 0], sizes = [2, 32], strides = [1, 1]} : vector<2x128xf32> to vector<2x32xf32>
    %423 = vector.extract_strided_slice %420 {offsets = [0, 32], sizes = [2, 32], strides = [1, 1]} : vector<2x128xf32> to vector<2x32xf32>
    %424 = vector.extract_strided_slice %421 {offsets = [0, 64], sizes = [2, 32], strides = [1, 1]} : vector<2x128xf32> to vector<2x32xf32>
    %425 = vector.extract_strided_slice %420 {offsets = [0, 96], sizes = [2, 32], strides = [1, 1]} : vector<2x128xf32> to vector<2x32xf32>
    %426 = arith.mulf %423, %386 : vector<2x32xf32>
    %427 = arith.mulf %422, %424 : vector<2x32xf32>
    %428 = arith.addf %426, %427 : vector<2x32xf32>
    %429 = math.tanh %428 : vector<2x32xf32>
    %430 = arith.mulf %425, %429 : vector<2x32xf32>
    %cst_85 = arith.constant dense<0.000000e+00> : vector<2x96xf32>
    %431 = tpu.matmul %412, %356, %cst_85 {dimension_numbers = #tpu.dot_dimension_numbers<[1], [0], [0], [1], [0, 0, 1, 1], [], []>} : vector<2x32xf32>, vector<32x96xf32>, vector<2x96xf32> -> vector<2x96xf32>
    %432 = vector.broadcast %357 : vector<1x96xf32> to vector<2x96xf32>
    %433 = arith.addf %431, %432 : vector<2x96xf32>
    %434 = vector.extract_strided_slice %367 {offsets = [2, 0], sizes = [2, 96], strides = [1, 1]} : vector<16x96xf32> to vector<2x96xf32>
    %435 = vector.extract_strided_slice %434 {offsets = [0, 0], sizes = [2, 64], strides = [1, 1]} : vector<2x96xf32> to vector<2x64xf32>
    %436 = vector.extract_strided_slice %433 {offsets = [0, 0], sizes = [2, 64], strides = [1, 1]} : vector<2x96xf32> to vector<2x64xf32>
    %437 = arith.addf %435, %436 : vector<2x64xf32>
    %438 = arith.negf %437 : vector<2x64xf32>
    %439 = math.exp %438 : vector<2x64xf32>
    %cst_86 = arith.constant 1.000000e+00 : f32
    %440 = vector.broadcast %cst_86 : f32 to vector<2x64xf32>
    %441 = arith.addf %440, %439 : vector<2x64xf32>
    %442 = arith.divf %440, %441 : vector<2x64xf32>
    %443 = vector.extract_strided_slice %442 {offsets = [0, 0], sizes = [2, 32], strides = [1, 1]} : vector<2x64xf32> to vector<2x32xf32>
    %444 = vector.extract_strided_slice %442 {offsets = [0, 32], sizes = [2, 32], strides = [1, 1]} : vector<2x64xf32> to vector<2x32xf32>
    %445 = vector.extract_strided_slice %434 {offsets = [0, 64], sizes = [2, 32], strides = [1, 1]} : vector<2x96xf32> to vector<2x32xf32>
    %446 = vector.extract_strided_slice %433 {offsets = [0, 64], sizes = [2, 32], strides = [1, 1]} : vector<2x96xf32> to vector<2x32xf32>
    %447 = arith.mulf %443, %446 : vector<2x32xf32>
    %448 = arith.addf %445, %447 : vector<2x32xf32>
    %449 = math.tanh %448 : vector<2x32xf32>
    %cst_87 = arith.constant 1.000000e+00 : f32
    %450 = vector.broadcast %cst_87 : f32 to vector<2x32xf32>
    %451 = arith.subf %450, %444 : vector<2x32xf32>
    %452 = arith.mulf %451, %449 : vector<2x32xf32>
    %453 = arith.mulf %444, %412 : vector<2x32xf32>
    %454 = arith.addf %452, %453 : vector<2x32xf32>
    %455 = vector.extract_strided_slice %362 {offsets = [4, 0], sizes = [2, 128], strides = [1, 1]} : vector<16x128xf32> to vector<2x128xf32>
    %cst_88 = arith.constant dense<0.000000e+00> : vector<2x128xf32>
    %456 = tpu.matmul %430, %355, %cst_88 {dimension_numbers = #tpu.dot_dimension_numbers<[1], [0], [0], [1], [0, 0, 1, 1], [], []>} : vector<2x32xf32>, vector<32x128xf32>, vector<2x128xf32> -> vector<2x128xf32>
    %457 = arith.addf %455, %456 : vector<2x128xf32>
    %458 = arith.negf %457 : vector<2x128xf32>
    %459 = math.exp %458 : vector<2x128xf32>
    %cst_89 = arith.constant 1.000000e+00 : f32
    %460 = vector.broadcast %cst_89 : f32 to vector<2x128xf32>
    %461 = arith.addf %460, %459 : vector<2x128xf32>
    %462 = arith.divf %460, %461 : vector<2x128xf32>
    %463 = math.tanh %457 : vector<2x128xf32>
    %464 = vector.extract_strided_slice %462 {offsets = [0, 0], sizes = [2, 32], strides = [1, 1]} : vector<2x128xf32> to vector<2x32xf32>
    %465 = vector.extract_strided_slice %462 {offsets = [0, 32], sizes = [2, 32], strides = [1, 1]} : vector<2x128xf32> to vector<2x32xf32>
    %466 = vector.extract_strided_slice %463 {offsets = [0, 64], sizes = [2, 32], strides = [1, 1]} : vector<2x128xf32> to vector<2x32xf32>
    %467 = vector.extract_strided_slice %462 {offsets = [0, 96], sizes = [2, 32], strides = [1, 1]} : vector<2x128xf32> to vector<2x32xf32>
    %468 = arith.mulf %465, %428 : vector<2x32xf32>
    %469 = arith.mulf %464, %466 : vector<2x32xf32>
    %470 = arith.addf %468, %469 : vector<2x32xf32>
    %471 = math.tanh %470 : vector<2x32xf32>
    %472 = arith.mulf %467, %471 : vector<2x32xf32>
    %cst_90 = arith.constant dense<0.000000e+00> : vector<2x96xf32>
    %473 = tpu.matmul %454, %356, %cst_90 {dimension_numbers = #tpu.dot_dimension_numbers<[1], [0], [0], [1], [0, 0, 1, 1], [], []>} : vector<2x32xf32>, vector<32x96xf32>, vector<2x96xf32> -> vector<2x96xf32>
    %474 = vector.broadcast %357 : vector<1x96xf32> to vector<2x96xf32>
    %475 = arith.addf %473, %474 : vector<2x96xf32>
    %476 = vector.extract_strided_slice %367 {offsets = [4, 0], sizes = [2, 96], strides = [1, 1]} : vector<16x96xf32> to vector<2x96xf32>
    %477 = vector.extract_strided_slice %476 {offsets = [0, 0], sizes = [2, 64], strides = [1, 1]} : vector<2x96xf32> to vector<2x64xf32>
    %478 = vector.extract_strided_slice %475 {offsets = [0, 0], sizes = [2, 64], strides = [1, 1]} : vector<2x96xf32> to vector<2x64xf32>
    %479 = arith.addf %477, %478 : vector<2x64xf32>
    %480 = arith.negf %479 : vector<2x64xf32>
    %481 = math.exp %480 : vector<2x64xf32>
    %cst_91 = arith.constant 1.000000e+00 : f32
    %482 = vector.broadcast %cst_91 : f32 to vector<2x64xf32>
    %483 = arith.addf %482, %481 : vector<2x64xf32>
    %484 = arith.divf %482, %483 : vector<2x64xf32>
    %485 = vector.extract_strided_slice %484 {offsets = [0, 0], sizes = [2, 32], strides = [1, 1]} : vector<2x64xf32> to vector<2x32xf32>
    %486 = vector.extract_strided_slice %484 {offsets = [0, 32], sizes = [2, 32], strides = [1, 1]} : vector<2x64xf32> to vector<2x32xf32>
    %487 = vector.extract_strided_slice %476 {offsets = [0, 64], sizes = [2, 32], strides = [1, 1]} : vector<2x96xf32> to vector<2x32xf32>
    %488 = vector.extract_strided_slice %475 {offsets = [0, 64], sizes = [2, 32], strides = [1, 1]} : vector<2x96xf32> to vector<2x32xf32>
    %489 = arith.mulf %485, %488 : vector<2x32xf32>
    %490 = arith.addf %487, %489 : vector<2x32xf32>
    %491 = math.tanh %490 : vector<2x32xf32>
    %cst_92 = arith.constant 1.000000e+00 : f32
    %492 = vector.broadcast %cst_92 : f32 to vector<2x32xf32>
    %493 = arith.subf %492, %486 : vector<2x32xf32>
    %494 = arith.mulf %493, %491 : vector<2x32xf32>
    %495 = arith.mulf %486, %454 : vector<2x32xf32>
    %496 = arith.addf %494, %495 : vector<2x32xf32>
    %497 = vector.extract_strided_slice %362 {offsets = [6, 0], sizes = [2, 128], strides = [1, 1]} : vector<16x128xf32> to vector<2x128xf32>
    %cst_93 = arith.constant dense<0.000000e+00> : vector<2x128xf32>
    %498 = tpu.matmul %472, %355, %cst_93 {dimension_numbers = #tpu.dot_dimension_numbers<[1], [0], [0], [1], [0, 0, 1, 1], [], []>} : vector<2x32xf32>, vector<32x128xf32>, vector<2x128xf32> -> vector<2x128xf32>
    %499 = arith.addf %497, %498 : vector<2x128xf32>
    %500 = arith.negf %499 : vector<2x128xf32>
    %501 = math.exp %500 : vector<2x128xf32>
    %cst_94 = arith.constant 1.000000e+00 : f32
    %502 = vector.broadcast %cst_94 : f32 to vector<2x128xf32>
    %503 = arith.addf %502, %501 : vector<2x128xf32>
    %504 = arith.divf %502, %503 : vector<2x128xf32>
    %505 = math.tanh %499 : vector<2x128xf32>
    %506 = vector.extract_strided_slice %504 {offsets = [0, 0], sizes = [2, 32], strides = [1, 1]} : vector<2x128xf32> to vector<2x32xf32>
    %507 = vector.extract_strided_slice %504 {offsets = [0, 32], sizes = [2, 32], strides = [1, 1]} : vector<2x128xf32> to vector<2x32xf32>
    %508 = vector.extract_strided_slice %505 {offsets = [0, 64], sizes = [2, 32], strides = [1, 1]} : vector<2x128xf32> to vector<2x32xf32>
    %509 = vector.extract_strided_slice %504 {offsets = [0, 96], sizes = [2, 32], strides = [1, 1]} : vector<2x128xf32> to vector<2x32xf32>
    %510 = arith.mulf %507, %470 : vector<2x32xf32>
    %511 = arith.mulf %506, %508 : vector<2x32xf32>
    %512 = arith.addf %510, %511 : vector<2x32xf32>
    %513 = math.tanh %512 : vector<2x32xf32>
    %514 = arith.mulf %509, %513 : vector<2x32xf32>
    %cst_95 = arith.constant dense<0.000000e+00> : vector<2x96xf32>
    %515 = tpu.matmul %496, %356, %cst_95 {dimension_numbers = #tpu.dot_dimension_numbers<[1], [0], [0], [1], [0, 0, 1, 1], [], []>} : vector<2x32xf32>, vector<32x96xf32>, vector<2x96xf32> -> vector<2x96xf32>
    %516 = vector.broadcast %357 : vector<1x96xf32> to vector<2x96xf32>
    %517 = arith.addf %515, %516 : vector<2x96xf32>
    %518 = vector.extract_strided_slice %367 {offsets = [6, 0], sizes = [2, 96], strides = [1, 1]} : vector<16x96xf32> to vector<2x96xf32>
    %519 = vector.extract_strided_slice %518 {offsets = [0, 0], sizes = [2, 64], strides = [1, 1]} : vector<2x96xf32> to vector<2x64xf32>
    %520 = vector.extract_strided_slice %517 {offsets = [0, 0], sizes = [2, 64], strides = [1, 1]} : vector<2x96xf32> to vector<2x64xf32>
    %521 = arith.addf %519, %520 : vector<2x64xf32>
    %522 = arith.negf %521 : vector<2x64xf32>
    %523 = math.exp %522 : vector<2x64xf32>
    %cst_96 = arith.constant 1.000000e+00 : f32
    %524 = vector.broadcast %cst_96 : f32 to vector<2x64xf32>
    %525 = arith.addf %524, %523 : vector<2x64xf32>
    %526 = arith.divf %524, %525 : vector<2x64xf32>
    %527 = vector.extract_strided_slice %526 {offsets = [0, 0], sizes = [2, 32], strides = [1, 1]} : vector<2x64xf32> to vector<2x32xf32>
    %528 = vector.extract_strided_slice %526 {offsets = [0, 32], sizes = [2, 32], strides = [1, 1]} : vector<2x64xf32> to vector<2x32xf32>
    %529 = vector.extract_strided_slice %518 {offsets = [0, 64], sizes = [2, 32], strides = [1, 1]} : vector<2x96xf32> to vector<2x32xf32>
    %530 = vector.extract_strided_slice %517 {offsets = [0, 64], sizes = [2, 32], strides = [1, 1]} : vector<2x96xf32> to vector<2x32xf32>
    %531 = arith.mulf %527, %530 : vector<2x32xf32>
    %532 = arith.addf %529, %531 : vector<2x32xf32>
    %533 = math.tanh %532 : vector<2x32xf32>
    %cst_97 = arith.constant 1.000000e+00 : f32
    %534 = vector.broadcast %cst_97 : f32 to vector<2x32xf32>
    %535 = arith.subf %534, %528 : vector<2x32xf32>
    %536 = arith.mulf %535, %533 : vector<2x32xf32>
    %537 = arith.mulf %528, %496 : vector<2x32xf32>
    %538 = arith.addf %536, %537 : vector<2x32xf32>
    %539 = vector.extract_strided_slice %362 {offsets = [8, 0], sizes = [2, 128], strides = [1, 1]} : vector<16x128xf32> to vector<2x128xf32>
    %cst_98 = arith.constant dense<0.000000e+00> : vector<2x128xf32>
    %540 = tpu.matmul %514, %355, %cst_98 {dimension_numbers = #tpu.dot_dimension_numbers<[1], [0], [0], [1], [0, 0, 1, 1], [], []>} : vector<2x32xf32>, vector<32x128xf32>, vector<2x128xf32> -> vector<2x128xf32>
    %541 = arith.addf %539, %540 : vector<2x128xf32>
    %542 = arith.negf %541 : vector<2x128xf32>
    %543 = math.exp %542 : vector<2x128xf32>
    %cst_99 = arith.constant 1.000000e+00 : f32
    %544 = vector.broadcast %cst_99 : f32 to vector<2x128xf32>
    %545 = arith.addf %544, %543 : vector<2x128xf32>
    %546 = arith.divf %544, %545 : vector<2x128xf32>
    %547 = math.tanh %541 : vector<2x128xf32>
    %548 = vector.extract_strided_slice %546 {offsets = [0, 0], sizes = [2, 32], strides = [1, 1]} : vector<2x128xf32> to vector<2x32xf32>
    %549 = vector.extract_strided_slice %546 {offsets = [0, 32], sizes = [2, 32], strides = [1, 1]} : vector<2x128xf32> to vector<2x32xf32>
    %550 = vector.extract_strided_slice %547 {offsets = [0, 64], sizes = [2, 32], strides = [1, 1]} : vector<2x128xf32> to vector<2x32xf32>
    %551 = vector.extract_strided_slice %546 {offsets = [0, 96], sizes = [2, 32], strides = [1, 1]} : vector<2x128xf32> to vector<2x32xf32>
    %552 = arith.mulf %549, %512 : vector<2x32xf32>
    %553 = arith.mulf %548, %550 : vector<2x32xf32>
    %554 = arith.addf %552, %553 : vector<2x32xf32>
    %555 = math.tanh %554 : vector<2x32xf32>
    %556 = arith.mulf %551, %555 : vector<2x32xf32>
    %cst_100 = arith.constant dense<0.000000e+00> : vector<2x96xf32>
    %557 = tpu.matmul %538, %356, %cst_100 {dimension_numbers = #tpu.dot_dimension_numbers<[1], [0], [0], [1], [0, 0, 1, 1], [], []>} : vector<2x32xf32>, vector<32x96xf32>, vector<2x96xf32> -> vector<2x96xf32>
    %558 = vector.broadcast %357 : vector<1x96xf32> to vector<2x96xf32>
    %559 = arith.addf %557, %558 : vector<2x96xf32>
    %560 = vector.extract_strided_slice %367 {offsets = [8, 0], sizes = [2, 96], strides = [1, 1]} : vector<16x96xf32> to vector<2x96xf32>
    %561 = vector.extract_strided_slice %560 {offsets = [0, 0], sizes = [2, 64], strides = [1, 1]} : vector<2x96xf32> to vector<2x64xf32>
    %562 = vector.extract_strided_slice %559 {offsets = [0, 0], sizes = [2, 64], strides = [1, 1]} : vector<2x96xf32> to vector<2x64xf32>
    %563 = arith.addf %561, %562 : vector<2x64xf32>
    %564 = arith.negf %563 : vector<2x64xf32>
    %565 = math.exp %564 : vector<2x64xf32>
    %cst_101 = arith.constant 1.000000e+00 : f32
    %566 = vector.broadcast %cst_101 : f32 to vector<2x64xf32>
    %567 = arith.addf %566, %565 : vector<2x64xf32>
    %568 = arith.divf %566, %567 : vector<2x64xf32>
    %569 = vector.extract_strided_slice %568 {offsets = [0, 0], sizes = [2, 32], strides = [1, 1]} : vector<2x64xf32> to vector<2x32xf32>
    %570 = vector.extract_strided_slice %568 {offsets = [0, 32], sizes = [2, 32], strides = [1, 1]} : vector<2x64xf32> to vector<2x32xf32>
    %571 = vector.extract_strided_slice %560 {offsets = [0, 64], sizes = [2, 32], strides = [1, 1]} : vector<2x96xf32> to vector<2x32xf32>
    %572 = vector.extract_strided_slice %559 {offsets = [0, 64], sizes = [2, 32], strides = [1, 1]} : vector<2x96xf32> to vector<2x32xf32>
    %573 = arith.mulf %569, %572 : vector<2x32xf32>
    %574 = arith.addf %571, %573 : vector<2x32xf32>
    %575 = math.tanh %574 : vector<2x32xf32>
    %cst_102 = arith.constant 1.000000e+00 : f32
    %576 = vector.broadcast %cst_102 : f32 to vector<2x32xf32>
    %577 = arith.subf %576, %570 : vector<2x32xf32>
    %578 = arith.mulf %577, %575 : vector<2x32xf32>
    %579 = arith.mulf %570, %538 : vector<2x32xf32>
    %580 = arith.addf %578, %579 : vector<2x32xf32>
    %581 = vector.extract_strided_slice %362 {offsets = [10, 0], sizes = [2, 128], strides = [1, 1]} : vector<16x128xf32> to vector<2x128xf32>
    %cst_103 = arith.constant dense<0.000000e+00> : vector<2x128xf32>
    %582 = tpu.matmul %556, %355, %cst_103 {dimension_numbers = #tpu.dot_dimension_numbers<[1], [0], [0], [1], [0, 0, 1, 1], [], []>} : vector<2x32xf32>, vector<32x128xf32>, vector<2x128xf32> -> vector<2x128xf32>
    %583 = arith.addf %581, %582 : vector<2x128xf32>
    %584 = arith.negf %583 : vector<2x128xf32>
    %585 = math.exp %584 : vector<2x128xf32>
    %cst_104 = arith.constant 1.000000e+00 : f32
    %586 = vector.broadcast %cst_104 : f32 to vector<2x128xf32>
    %587 = arith.addf %586, %585 : vector<2x128xf32>
    %588 = arith.divf %586, %587 : vector<2x128xf32>
    %589 = math.tanh %583 : vector<2x128xf32>
    %590 = vector.extract_strided_slice %588 {offsets = [0, 0], sizes = [2, 32], strides = [1, 1]} : vector<2x128xf32> to vector<2x32xf32>
    %591 = vector.extract_strided_slice %588 {offsets = [0, 32], sizes = [2, 32], strides = [1, 1]} : vector<2x128xf32> to vector<2x32xf32>
    %592 = vector.extract_strided_slice %589 {offsets = [0, 64], sizes = [2, 32], strides = [1, 1]} : vector<2x128xf32> to vector<2x32xf32>
    %593 = vector.extract_strided_slice %588 {offsets = [0, 96], sizes = [2, 32], strides = [1, 1]} : vector<2x128xf32> to vector<2x32xf32>
    %594 = arith.mulf %591, %554 : vector<2x32xf32>
    %595 = arith.mulf %590, %592 : vector<2x32xf32>
    %596 = arith.addf %594, %595 : vector<2x32xf32>
    %597 = math.tanh %596 : vector<2x32xf32>
    %598 = arith.mulf %593, %597 : vector<2x32xf32>
    %cst_105 = arith.constant dense<0.000000e+00> : vector<2x96xf32>
    %599 = tpu.matmul %580, %356, %cst_105 {dimension_numbers = #tpu.dot_dimension_numbers<[1], [0], [0], [1], [0, 0, 1, 1], [], []>} : vector<2x32xf32>, vector<32x96xf32>, vector<2x96xf32> -> vector<2x96xf32>
    %600 = vector.broadcast %357 : vector<1x96xf32> to vector<2x96xf32>
    %601 = arith.addf %599, %600 : vector<2x96xf32>
    %602 = vector.extract_strided_slice %367 {offsets = [10, 0], sizes = [2, 96], strides = [1, 1]} : vector<16x96xf32> to vector<2x96xf32>
    %603 = vector.extract_strided_slice %602 {offsets = [0, 0], sizes = [2, 64], strides = [1, 1]} : vector<2x96xf32> to vector<2x64xf32>
    %604 = vector.extract_strided_slice %601 {offsets = [0, 0], sizes = [2, 64], strides = [1, 1]} : vector<2x96xf32> to vector<2x64xf32>
    %605 = arith.addf %603, %604 : vector<2x64xf32>
    %606 = arith.negf %605 : vector<2x64xf32>
    %607 = math.exp %606 : vector<2x64xf32>
    %cst_106 = arith.constant 1.000000e+00 : f32
    %608 = vector.broadcast %cst_106 : f32 to vector<2x64xf32>
    %609 = arith.addf %608, %607 : vector<2x64xf32>
    %610 = arith.divf %608, %609 : vector<2x64xf32>
    %611 = vector.extract_strided_slice %610 {offsets = [0, 0], sizes = [2, 32], strides = [1, 1]} : vector<2x64xf32> to vector<2x32xf32>
    %612 = vector.extract_strided_slice %610 {offsets = [0, 32], sizes = [2, 32], strides = [1, 1]} : vector<2x64xf32> to vector<2x32xf32>
    %613 = vector.extract_strided_slice %602 {offsets = [0, 64], sizes = [2, 32], strides = [1, 1]} : vector<2x96xf32> to vector<2x32xf32>
    %614 = vector.extract_strided_slice %601 {offsets = [0, 64], sizes = [2, 32], strides = [1, 1]} : vector<2x96xf32> to vector<2x32xf32>
    %615 = arith.mulf %611, %614 : vector<2x32xf32>
    %616 = arith.addf %613, %615 : vector<2x32xf32>
    %617 = math.tanh %616 : vector<2x32xf32>
    %cst_107 = arith.constant 1.000000e+00 : f32
    %618 = vector.broadcast %cst_107 : f32 to vector<2x32xf32>
    %619 = arith.subf %618, %612 : vector<2x32xf32>
    %620 = arith.mulf %619, %617 : vector<2x32xf32>
    %621 = arith.mulf %612, %580 : vector<2x32xf32>
    %622 = arith.addf %620, %621 : vector<2x32xf32>
    %623 = vector.extract_strided_slice %362 {offsets = [12, 0], sizes = [2, 128], strides = [1, 1]} : vector<16x128xf32> to vector<2x128xf32>
    %cst_108 = arith.constant dense<0.000000e+00> : vector<2x128xf32>
    %624 = tpu.matmul %598, %355, %cst_108 {dimension_numbers = #tpu.dot_dimension_numbers<[1], [0], [0], [1], [0, 0, 1, 1], [], []>} : vector<2x32xf32>, vector<32x128xf32>, vector<2x128xf32> -> vector<2x128xf32>
    %625 = arith.addf %623, %624 : vector<2x128xf32>
    %626 = arith.negf %625 : vector<2x128xf32>
    %627 = math.exp %626 : vector<2x128xf32>
    %cst_109 = arith.constant 1.000000e+00 : f32
    %628 = vector.broadcast %cst_109 : f32 to vector<2x128xf32>
    %629 = arith.addf %628, %627 : vector<2x128xf32>
    %630 = arith.divf %628, %629 : vector<2x128xf32>
    %631 = math.tanh %625 : vector<2x128xf32>
    %632 = vector.extract_strided_slice %630 {offsets = [0, 0], sizes = [2, 32], strides = [1, 1]} : vector<2x128xf32> to vector<2x32xf32>
    %633 = vector.extract_strided_slice %630 {offsets = [0, 32], sizes = [2, 32], strides = [1, 1]} : vector<2x128xf32> to vector<2x32xf32>
    %634 = vector.extract_strided_slice %631 {offsets = [0, 64], sizes = [2, 32], strides = [1, 1]} : vector<2x128xf32> to vector<2x32xf32>
    %635 = vector.extract_strided_slice %630 {offsets = [0, 96], sizes = [2, 32], strides = [1, 1]} : vector<2x128xf32> to vector<2x32xf32>
    %636 = arith.mulf %633, %596 : vector<2x32xf32>
    %637 = arith.mulf %632, %634 : vector<2x32xf32>
    %638 = arith.addf %636, %637 : vector<2x32xf32>
    %639 = math.tanh %638 : vector<2x32xf32>
    %640 = arith.mulf %635, %639 : vector<2x32xf32>
    %cst_110 = arith.constant dense<0.000000e+00> : vector<2x96xf32>
    %641 = tpu.matmul %622, %356, %cst_110 {dimension_numbers = #tpu.dot_dimension_numbers<[1], [0], [0], [1], [0, 0, 1, 1], [], []>} : vector<2x32xf32>, vector<32x96xf32>, vector<2x96xf32> -> vector<2x96xf32>
    %642 = vector.broadcast %357 : vector<1x96xf32> to vector<2x96xf32>
    %643 = arith.addf %641, %642 : vector<2x96xf32>
    %644 = vector.extract_strided_slice %367 {offsets = [12, 0], sizes = [2, 96], strides = [1, 1]} : vector<16x96xf32> to vector<2x96xf32>
    %645 = vector.extract_strided_slice %644 {offsets = [0, 0], sizes = [2, 64], strides = [1, 1]} : vector<2x96xf32> to vector<2x64xf32>
    %646 = vector.extract_strided_slice %643 {offsets = [0, 0], sizes = [2, 64], strides = [1, 1]} : vector<2x96xf32> to vector<2x64xf32>
    %647 = arith.addf %645, %646 : vector<2x64xf32>
    %648 = arith.negf %647 : vector<2x64xf32>
    %649 = math.exp %648 : vector<2x64xf32>
    %cst_111 = arith.constant 1.000000e+00 : f32
    %650 = vector.broadcast %cst_111 : f32 to vector<2x64xf32>
    %651 = arith.addf %650, %649 : vector<2x64xf32>
    %652 = arith.divf %650, %651 : vector<2x64xf32>
    %653 = vector.extract_strided_slice %652 {offsets = [0, 0], sizes = [2, 32], strides = [1, 1]} : vector<2x64xf32> to vector<2x32xf32>
    %654 = vector.extract_strided_slice %652 {offsets = [0, 32], sizes = [2, 32], strides = [1, 1]} : vector<2x64xf32> to vector<2x32xf32>
    %655 = vector.extract_strided_slice %644 {offsets = [0, 64], sizes = [2, 32], strides = [1, 1]} : vector<2x96xf32> to vector<2x32xf32>
    %656 = vector.extract_strided_slice %643 {offsets = [0, 64], sizes = [2, 32], strides = [1, 1]} : vector<2x96xf32> to vector<2x32xf32>
    %657 = arith.mulf %653, %656 : vector<2x32xf32>
    %658 = arith.addf %655, %657 : vector<2x32xf32>
    %659 = math.tanh %658 : vector<2x32xf32>
    %cst_112 = arith.constant 1.000000e+00 : f32
    %660 = vector.broadcast %cst_112 : f32 to vector<2x32xf32>
    %661 = arith.subf %660, %654 : vector<2x32xf32>
    %662 = arith.mulf %661, %659 : vector<2x32xf32>
    %663 = arith.mulf %654, %622 : vector<2x32xf32>
    %664 = arith.addf %662, %663 : vector<2x32xf32>
    %665 = vector.extract_strided_slice %362 {offsets = [14, 0], sizes = [2, 128], strides = [1, 1]} : vector<16x128xf32> to vector<2x128xf32>
    %cst_113 = arith.constant dense<0.000000e+00> : vector<2x128xf32>
    %666 = tpu.matmul %640, %355, %cst_113 {dimension_numbers = #tpu.dot_dimension_numbers<[1], [0], [0], [1], [0, 0, 1, 1], [], []>} : vector<2x32xf32>, vector<32x128xf32>, vector<2x128xf32> -> vector<2x128xf32>
    %667 = arith.addf %665, %666 : vector<2x128xf32>
    %668 = arith.negf %667 : vector<2x128xf32>
    %669 = math.exp %668 : vector<2x128xf32>
    %cst_114 = arith.constant 1.000000e+00 : f32
    %670 = vector.broadcast %cst_114 : f32 to vector<2x128xf32>
    %671 = arith.addf %670, %669 : vector<2x128xf32>
    %672 = arith.divf %670, %671 : vector<2x128xf32>
    %673 = math.tanh %667 : vector<2x128xf32>
    %674 = vector.extract_strided_slice %672 {offsets = [0, 0], sizes = [2, 32], strides = [1, 1]} : vector<2x128xf32> to vector<2x32xf32>
    %675 = vector.extract_strided_slice %672 {offsets = [0, 32], sizes = [2, 32], strides = [1, 1]} : vector<2x128xf32> to vector<2x32xf32>
    %676 = vector.extract_strided_slice %673 {offsets = [0, 64], sizes = [2, 32], strides = [1, 1]} : vector<2x128xf32> to vector<2x32xf32>
    %677 = vector.extract_strided_slice %672 {offsets = [0, 96], sizes = [2, 32], strides = [1, 1]} : vector<2x128xf32> to vector<2x32xf32>
    %678 = arith.mulf %675, %638 : vector<2x32xf32>
    %679 = arith.mulf %674, %676 : vector<2x32xf32>
    %680 = arith.addf %678, %679 : vector<2x32xf32>
    %681 = math.tanh %680 : vector<2x32xf32>
    %682 = arith.mulf %677, %681 : vector<2x32xf32>
    %cst_115 = arith.constant dense<0.000000e+00> : vector<2x96xf32>
    %683 = tpu.matmul %664, %356, %cst_115 {dimension_numbers = #tpu.dot_dimension_numbers<[1], [0], [0], [1], [0, 0, 1, 1], [], []>} : vector<2x32xf32>, vector<32x96xf32>, vector<2x96xf32> -> vector<2x96xf32>
    %684 = vector.broadcast %357 : vector<1x96xf32> to vector<2x96xf32>
    %685 = arith.addf %683, %684 : vector<2x96xf32>
    %686 = vector.extract_strided_slice %367 {offsets = [14, 0], sizes = [2, 96], strides = [1, 1]} : vector<16x96xf32> to vector<2x96xf32>
    %687 = vector.extract_strided_slice %686 {offsets = [0, 0], sizes = [2, 64], strides = [1, 1]} : vector<2x96xf32> to vector<2x64xf32>
    %688 = vector.extract_strided_slice %685 {offsets = [0, 0], sizes = [2, 64], strides = [1, 1]} : vector<2x96xf32> to vector<2x64xf32>
    %689 = arith.addf %687, %688 : vector<2x64xf32>
    %690 = arith.negf %689 : vector<2x64xf32>
    %691 = math.exp %690 : vector<2x64xf32>
    %cst_116 = arith.constant 1.000000e+00 : f32
    %692 = vector.broadcast %cst_116 : f32 to vector<2x64xf32>
    %693 = arith.addf %692, %691 : vector<2x64xf32>
    %694 = arith.divf %692, %693 : vector<2x64xf32>
    %695 = vector.extract_strided_slice %694 {offsets = [0, 0], sizes = [2, 32], strides = [1, 1]} : vector<2x64xf32> to vector<2x32xf32>
    %696 = vector.extract_strided_slice %694 {offsets = [0, 32], sizes = [2, 32], strides = [1, 1]} : vector<2x64xf32> to vector<2x32xf32>
    %697 = vector.extract_strided_slice %686 {offsets = [0, 64], sizes = [2, 32], strides = [1, 1]} : vector<2x96xf32> to vector<2x32xf32>
    %698 = vector.extract_strided_slice %685 {offsets = [0, 64], sizes = [2, 32], strides = [1, 1]} : vector<2x96xf32> to vector<2x32xf32>
    %699 = arith.mulf %695, %698 : vector<2x32xf32>
    %700 = arith.addf %697, %699 : vector<2x32xf32>
    %701 = math.tanh %700 : vector<2x32xf32>
    %cst_117 = arith.constant 1.000000e+00 : f32
    %702 = vector.broadcast %cst_117 : f32 to vector<2x32xf32>
    %703 = arith.subf %702, %696 : vector<2x32xf32>
    %704 = arith.mulf %703, %701 : vector<2x32xf32>
    %705 = arith.mulf %696, %664 : vector<2x32xf32>
    %706 = arith.addf %704, %705 : vector<2x32xf32>
    %707 = tpu.concatenate %682, %706 in 1 : vector<2x32xf32>, vector<2x32xf32> -> vector<2x64xf32>
    %c0_118 = arith.constant 0 : index
    %c0_119 = arith.constant 0 : index
    %708 = vector.load %arg15[%c0_118, %c0_119] : memref<64x32xf32, #tpu.memory_space<vmem>>, vector<64x32xf32>
    %cst_120 = arith.constant dense<0.000000e+00> : vector<2x32xf32>
    %709 = tpu.matmul %707, %708, %cst_120 {dimension_numbers = #tpu.dot_dimension_numbers<[1], [0], [0], [1], [0, 0, 1, 1], [], []>} : vector<2x64xf32>, vector<64x32xf32>, vector<2x32xf32> -> vector<2x32xf32>
    %c0_121 = arith.constant 0 : index
    %c0_122 = arith.constant 0 : index
    %710 = vector.load %arg16[%c0_121, %c0_122] : memref<1x32xf32, #tpu.memory_space<vmem>>, vector<1x32xf32>
    %711 = vector.broadcast %710 : vector<1x32xf32> to vector<2x32xf32>
    %712 = arith.addf %709, %711 : vector<2x32xf32>
    %cst_123 = arith.constant 0.000000e+00 : f32
    %713 = vector.broadcast %cst_123 : f32 to vector<2x32xf32>
    %714 = arith.maximumf %712, %713 : vector<2x32xf32>
    %c0_124 = arith.constant 0 : index
    %c0_125 = arith.constant 0 : index
    %715 = vector.load %arg17[%c0_124, %c0_125] : memref<32x1xf32, #tpu.memory_space<vmem>>, vector<32x1xf32>
    %cst_126 = arith.constant dense<0.000000e+00> : vector<2x1xf32>
    %716 = tpu.matmul %714, %715, %cst_126 {dimension_numbers = #tpu.dot_dimension_numbers<[1], [0], [0], [1], [0, 0, 1, 1], [], []>} : vector<2x32xf32>, vector<32x1xf32>, vector<2x1xf32> -> vector<2x1xf32>
    %c0_127 = arith.constant 0 : index
    %c0_128 = arith.constant 0 : index
    %717 = vector.load %arg18[%c0_127, %c0_128] : memref<1x1xf32, #tpu.memory_space<vmem>>, vector<1x1xf32>
    %718 = vector.broadcast %717 : vector<1x1xf32> to vector<2x1xf32>
    %719 = arith.addf %716, %718 : vector<2x1xf32>
    %c0_129 = arith.constant 0 : index
    %c0_130 = arith.constant 0 : index
    %720 = vector.load %arg19[%c0_129, %c0_130] : memref<2x1xf32, #tpu.memory_space<vmem>>, vector<2x1xf32>
    tpu.vector_store %arg19[%c0_129, %c0_130], %719 {strides = array<i32>} : memref<2x1xf32, #tpu.memory_space<vmem>>, vector<2x1xf32>,
    return
  }
}

</mosaic_0001>

<bundles_post_ra>
// kernel: stock_lstm_forward.1
= control target key start
LH: loop header
LB: loop body
LE: loop exit
PB: predicated region body
PF: predicated region fallthrough
CT: control target
= control target key end

     0   :  { %s6197_s0 = inlined_call_operand.vmem [shape: f32[16,4], index: 0, kind: input, shape index: {}]   ;;  %s6198_s1 = inlined_call_operand.vmem [shape: f32[4,128], index: 1, kind: input, shape index: {}]   ;;  %s6199_s2 = inlined_call_operand.vmem [shape: f32[32,128], index: 2, kind: input, shape index: {}]   ;;  %s6200_s3 = inlined_call_operand.vmem [shape: f32[1,128], index: 3, kind: input, shape index: {}]   ;;  %s6201_s4 = inlined_call_operand.vmem [shape: f32[32,128], index: 4, kind: input, shape index: {}]   ;;  %s6202_s5 = inlined_call_operand.vmem [shape: f32[32,128], index: 5, kind: input, shape index: {}]   ;;  %s6203_s6 = inlined_call_operand.vmem [shape: f32[1,128], index: 6, kind: input, shape index: {}]   ;;  %s6204_s7 = inlined_call_operand.hbm [shape: f32[4,96], index: 7, kind: input, shape index: {}]   ;;  %s6205_s8 = inlined_call_operand.vmem [shape: f32[32,96], index: 8, kind: input, shape index: {}]   ;;  %s6206_s9 = inlined_call_operand.hbm [shape: f32[1,96], index: 9, kind: input, shape index: {}]   ;;  %s6207_s10 = inlined_call_operand.hbm [shape: f32[1,96], index: 10, kind: input, shape index: {}]   ;;  %s6208_s11 = inlined_call_operand.vmem [shape: f32[32,96], index: 11, kind: input, shape index: {}]   ;;  %s6209_s12 = inlined_call_operand.hbm [shape: f32[32,96], index: 12, kind: input, shape index: {}]   ;;  %s6210_s13 = inlined_call_operand.hbm [shape: f32[1,96], index: 13, kind: input, shape index: {}]   ;;  %s6211_s14 = inlined_call_operand.hbm [shape: f32[1,96], index: 14, kind: input, shape index: {}]   ;;  %s6212_s15 = inlined_call_operand.vmem [shape: f32[64,32], index: 15, kind: input, shape index: {}]   ;;  %s6213_s16 = inlined_call_operand.vmem [shape: f32[1,32], index: 16, kind: input, shape index: {}]   ;;  %s6214_s17 = inlined_call_operand.vmem [shape: f32[32,1], index: 17, kind: input, shape index: {}]   ;;  %s6215_s18 = inlined_call_operand.<no memory space> [shape: f32[1,1], index: 18, kind: input, shape index: {}]   ;;  %s6216_s19 = inlined_call_operand.vmem [shape: f32[2,1], index: 19, kind: output, shape index: {}]  }
   0x1   :  { %6219 = sst [smem:[#allocation17_spill]] %s6197_s0  ;;  %v24_v0 = vstv %s6215_s18 }
   0x2   :  { %6220 = sst [smem:[#allocation18_spill]] %s6198_s1  ;;  %25 = vst [vmem:[#allocation2] sm:$0x1] %v24_v0 }
   0x3   :  { %6221 = sst [smem:[#allocation19_spill]] %s6199_s2 }
   0x4   :  { %6222 = sst [smem:[#allocation20_spill]] %s6200_s3 }
   0x5   :  { %26 = vsyncpa [#allocation4], 0 }
   0x6   :  { %27 = vsyncpa [#allocation6], 0 }
   0x7   :  { %28 = vsyncpa [#allocation9], 0 }
   0x8   :  { %29 = vsyncpa [#allocation12], 0  ;;  %s5145_s20 = smov [#allocation5]   ;;  %s5146_s1 = smov [#allocation8]  }
   0x9   :  { %s62_s21 = sshll.u32 %s5145_s20, 4  ;;  %s83_s22 = sshll.u32 %s5146_s1, 4  ;;  %s63_s21 = int_to_ptr.vmem [resolvable:$true] %s62_s21  ;;  %s84_s22 = int_to_ptr.vmem [resolvable:$true] %s83_s22 }
   0xa   :  { %s5025_s2 = scalar_lea.vmem %s63_s21, 16  ;;  %s5029_s23 = scalar_lea.vmem %s63_s21, 32 }
   0xb   :  { %p5026_p0 = scmp.ne.s32.totalorder %s63_s21, %s5025_s2  ;;  %p5030_p1 = scmp.lt.s32.totalorder %s63_s21, %s63_s21 }
   0xc   :  { %p5031_p2 = scmp.lt.s32.totalorder %s5029_s23, %s5025_s2 }
   0xe   :  { %p5032_p3 = por %p5031_p2, %p5030_p1 }
  0x10   :  { %p5033_p4 = pnand %p5032_p3, %p5026_p0 }
  0x12   :  { %5036 = shalt.err (!%p5033_p4)
}
  0x13   :  { %65 = dma.hbm_to_vmem [thread:$0]  %s6206_s9, 16, %s63_s21, [#allocation6]  }
  0x14   :  { %s5045_s25 = scalar_lea.vmem %s84_s22, 512  ;;  %p5050_p6 = scmp.lt.s32.totalorder %s84_s22, %s84_s22 }
  0x15   :  { %p5046_p5 = scmp.ne.s32.totalorder %s84_s22, %s5045_s25  ;;  %p5051_p7 = scmp.lt.s32.totalorder %s5045_s25, %s5045_s25 }
  0x17   :  { %p5052_p8 = por %p5051_p7, %p5050_p6 }
  0x19   :  { %p5053_p9 = pnand %p5052_p8, %p5046_p5 }
  0x1b   :  { %5056 = shalt.err (!%p5053_p9)
}
  0x1c   :  { %s5147_s3 = smov 128   ;;  %s5148_s26 = smov 8  }
  0x1d   :  { %89 = dma.hbm_to_vmem [thread:$0]  %s6209_s12, 512, %s84_s22, [#allocation9], %s5147_s3, %s5147_s3, %s5148_s26  }
  0x1e   :  { %s5149_s29 = smov [#allocation3]   ;;  %s5150_s30 = smov [#allocation7]  }
  0x1f   :  { %s50_s0 = sshll.u32 %s5149_s29, 4  ;;  %s72_s20 = sshll.u32 %s5150_s30, 4  ;;  %s51_s0 = int_to_ptr.vmem [resolvable:$true] %s50_s0  ;;  %s73_s20 = int_to_ptr.vmem [resolvable:$true] %s72_s20 }
  0x20   :  { %s5065_s9 = scalar_lea.vmem %s51_s0, 64  ;;  %p5070_p11 = scmp.lt.s32.totalorder %s51_s0, %s51_s0 }
  0x21   :  { %p5066_p10 = scmp.ne.s32.totalorder %s51_s0, %s5065_s9  ;;  %p5071_p12 = scmp.lt.s32.totalorder %s5065_s9, %s5065_s9 }
  0x23   :  { %p5072_p13 = por %p5071_p12, %p5070_p11 }
  0x25   :  { %p5073_p0 = pnand %p5072_p13, %p5066_p10 }
  0x27   :  { %5076 = shalt.err (!%p5073_p0)
}
  0x28   :  { %53 = dma.hbm_to_vmem [thread:$0]  %s6204_s7, 64, %s51_s0, [#allocation4]  }
  0x29   :  { %s5085_s2 = scalar_lea.vmem %s73_s20, 16  ;;  %s5089_s12 = scalar_lea.vmem %s73_s20, 32 }
  0x2a   :  { %p5086_p1 = scmp.ne.s32.totalorder %s73_s20, %s5085_s2  ;;  %p5090_p2 = scmp.lt.s32.totalorder %s73_s20, %s73_s20 }
  0x2b   :  { %p5091_p3 = scmp.lt.s32.totalorder %s5089_s12, %s5085_s2 }
  0x2d   :  { %p5092_p4 = por %p5091_p3, %p5090_p2 }
  0x2f   :  { %p5093_p5 = pnand %p5092_p4, %p5086_p1 }
  0x31   :  { %5096 = shalt.err (!%p5093_p5)
}
  0x32   :  { %75 = dma.hbm_to_vmem [thread:$0]  %s6207_s10, 16, %s73_s20, [#allocation6]  }
  0x33   :  { %s5151_s18 = smov [#allocation10]   ;;  %s5152_s25 = smov [#allocation11]  }
  0x34   :  { %s96_s24 = sshll.u32 %s5151_s18, 4  ;;  %s106_s3 = sshll.u32 %s5152_s25, 4  ;;  %s97_s24 = int_to_ptr.vmem [resolvable:$true] %s96_s24  ;;  %s107_s3 = int_to_ptr.vmem [resolvable:$true] %s106_s3 }
  0x35   :  { %s5105_s26 = scalar_lea.vmem %s97_s24, 16  ;;  %s5109_s7 = scalar_lea.vmem %s97_s24, 32 }
  0x36   :  { %p5106_p6 = scmp.ne.s32.totalorder %s97_s24, %s5105_s26  ;;  %p5110_p7 = scmp.lt.s32.totalorder %s97_s24, %s97_s24 }
  0x37   :  { %p5111_p8 = scmp.lt.s32.totalorder %s5109_s7, %s5105_s26 }
  0x39   :  { %p5112_p9 = por %p5111_p8, %p5110_p7 }
  0x3b   :  { %p5113_p10 = pnand %p5112_p9, %p5106_p6 }
  0x3d   :  { %5116 = shalt.err (!%p5113_p10)
}
  0x3e   :  { %99 = dma.hbm_to_vmem [thread:$0]  %s6210_s13, 16, %s97_s24, [#allocation9]  }
  0x3f   :  { %s5125_s29 = scalar_lea.vmem %s107_s3, 16  ;;  %s5129_s10 = scalar_lea.vmem %s107_s3, 32 }
  0x40   :  { %p5126_p11 = scmp.ne.s32.totalorder %s107_s3, %s5125_s29  ;;  %p5130_p12 = scmp.lt.s32.totalorder %s107_s3, %s107_s3 }
  0x41   :  { %p5131_p13 = scmp.lt.s32.totalorder %s5129_s10, %s5125_s29 }
  0x43   :  { %p5132_p0 = por %p5131_p13, %p5130_p12 }
  0x45   :  { %p5133_p1 = pnand %p5132_p0, %p5126_p11 }
  0x47   :  { %5136 = shalt.err (!%p5133_p1)
}
  0x48   :  { %109 = dma.hbm_to_vmem [thread:$0]  %s6211_s14, 16, %s107_s3, [#allocation12]  }
  0x49   :  { %5137 = dma.done.wait [#allocation4], 64  }
  0x4a   :  { %5138 = vsyncadd [#allocation4], 4294967232 }
  0x4b   :  { %5139 = dma.done.wait [#allocation6], 32  }
  0x4c   :  { %5140 = vsyncadd [#allocation6], 4294967264 }
  0x4d   :  { %5141 = dma.done.wait [#allocation9], 528  }
  0x4e   :  { %5142 = vsyncadd [#allocation9], 4294966768 }
  0x4f   :  { %5143 = dma.done.wait [#allocation12], 16  }
  0x50   :  { %5144 = vsyncadd [#allocation12], 4294967280  ;;  %v5153_v1 = vmov 0.0   ;;  %vm5154_vm0 = vmmov 0   ;;  %vm162_vm1 = vcmask 1043456   ;;  %vm155_vm2 = vcmask 31744  }
  0x51   :  { %4374 = vmatprep.subr.mxu0 %v5153_v1  ;;  %4382 = vmatprep.mubr.msk.f32.mxu0 %vm5154_vm0, %v5153_v1  ;;  %s6223_s14 = sld [smem:[#allocation18_spill]]  ;;  %v241_v9 = vld [vmem:[#allocation3] sm:$0xf]  ;;  %v5342_v10 = vld [vmem:[%s6205_s8 + $0x18] sm:$0xff]  ;;  %v5351_v11 = vld [vmem:[%s6205_s8 + $0x10] sm:$0xff]  ;;  %s5156_s2 = smov 32  }
  0x52   :  { %s6224_s1 = sld [smem:[#allocation19_spill]]  ;;  %v5356_v12 = vld [vmem:[%s6205_s8 + $0x8] sm:$0xff]  ;;  %v5363_v13 = vld [vmem:[%s6205_s8] sm:$0xff]  ;;  %vm327_vm3 = vcmask 261120   ;;  %s5157_s12 = smov 96   ;;  %vm2009_vm4 = vcmask 1041408  }
  0x53   :  { %s6225_s22 = sld [smem:[#allocation17_spill]]  ;;  %v4096_v23 = vld [vmem:[#allocation5] ss:$0 sm:$0xff]  ;;  %v5391_v34 = vld [vmem:[#allocation7] ss:$0 sm:$0xff]  ;;  %vm2012_vm5 = vcmask 1045504  }
  0x54   :  { %s6226_s21 = sld [smem:[#allocation20_spill]]  ;;  %vm3924_vm6 = vcmask 523264   ;;  %vm4082_vm7 = vcmask 1024  }
  0x57   :  { %v147_v2 = vld [vmem:[%s6223_s14] sm:$0xf] }
  0x58   :  { %v5288_v3 = vld [vmem:[%s6224_s1 + $0x18] sm:$0xff]  ;;  %4364 = vmatprep.subr.msk.mxu1 %vm162_vm1, %v147_v2  ;;  %v5301_v6 = vld [vmem:[%s6224_s1 + $0x10] sm:$0xff]  ;;  %v5310_v7 = vld [vmem:[%s6224_s1 + $0x8] sm:$0xff] }
  0x59   :  { %v136_v4 = vld [vmem:[%s6225_s22] sm:$0xff]  ;;  %4375 = vmatpush3.msra.mxu0 %v5288_v3  ;;  %v137_v5 = vld [vmem:[%s6225_s22 + $0x8] sm:$0xff]  ;;  %4365 = vmatpush3.msk.msra.mxu1 %vm162_vm1, %v147_v2 }
  0x5a   :  { %4366 = vmatprep.mubr.msk.f32.mxu1 %vm155_vm2, %v136_v4  ;;  %4376 = vmatprep.subr.mxu0 %v5153_v1  ;;  %v5318_v8 = vld [vmem:[%s6224_s1] sm:$0xff]  ;;  %s5155_s1 = smov 64  }
  0x5b   :  { %4367 = vmatmul.mubr.msk.f32.vlgmr.msra.gmra.mxu1 %vm155_vm2, %v137_v5  ;;  %4377 = vmatpush3.msra.mxu0 %v5301_v6  ;;  %v4092_v14 = vld [vmem:[%s6226_s21] ss:$0 sm:$0xff] }
  0x5c   :  { %4371 = vmatprep.mubr.msk.f32.mxu1 %vm155_vm2, %v136_v4  ;;  %4378 = vmatprep.subr.mxu0 %v5153_v1 }
  0x5d   :  { %4379 = vmatpush3.msra.mxu0 %v5310_v7  ;;  %4369 = vmatprep.subr.msk.mxu1 %vm162_vm1, %v241_v9 }
  0x5e   :  { %4380 = vmatprep.subr.mxu0 %v5153_v1  ;;  %4370 = vmatpush3.msk.msra.mxu1 %vm162_vm1, %v241_v9 }
  0x5f   :  { %4381 = vmatpush3.msra.mxu0 %v5318_v8  ;;  %4385 = vmatprep.subr.mxu1 %v5153_v1 }
  0x60   :  { %4383 = vmatmul.mubr.f32.vlgmr.msra.gmra.mxu0 %v5153_v1  ;;  %4396 = vmatprep.subr.mxu0 %v5153_v1 }
  0x61   :  { %4397 = vmatpush3.msra.mxu0 %v5288_v3  ;;  %4404 = vmatprep.mubr.msk.f32.mxu0 %vm5154_vm0, %v5153_v1 }
  0x62   :  { %4398 = vmatprep.subr.mxu0 %v5153_v1  ;;  %4372 = vmatmul.mubr.msk.f32.vlgmr.msra.gmra.mxu1 %vm155_vm2, %v137_v5 }
  0x63   :  { %4399 = vmatpush3.msra.mxu0 %v5301_v6  ;;  %4386 = vmatpush3.msra.mxu1 %v5342_v10 }
  0x64   :  { %4400 = vmatprep.subr.mxu0 %v5153_v1  ;;  %4393 = vmatprep.mubr.msk.f32.mxu1 %vm5154_vm0, %v5153_v1 }
  0x65   :  { %4401 = vmatpush3.msra.mxu0 %v5310_v7  ;;  %4387 = vmatprep.subr.mxu1 %v5153_v1 }
  0x66   :  { %4402 = vmatprep.subr.mxu0 %v5153_v1  ;;  %4388 = vmatpush3.msra.mxu1 %v5351_v11 }
  0x67   :  { %4403 = vmatpush3.msra.mxu0 %v5318_v8  ;;  %4389 = vmatprep.subr.mxu1 %v5153_v1 }
  0x68   :  { %4418 = vmatprep.subr.mxu0 %v5153_v1  ;;  %4390 = vmatpush3.msra.mxu1 %v5356_v12 }
  0x69   :  { %4391 = vmatprep.subr.mxu1 %v5153_v1 }
  0x6a   :  { %4392 = vmatpush3.msra.mxu1 %v5363_v13 }
  0x6b   :  { %4394 = vmatmul.mubr.f32.vlgmr.msra.gmra.mxu1 %v5153_v1  ;;  %4407 = vmatprep.subr.mxu1 %v5153_v1 }
  0x6c   :  { %4408 = vmatpush3.msra.mxu1 %v5342_v10  ;;  %4415 = vmatprep.mubr.msk.f32.mxu1 %vm5154_vm0, %v5153_v1 }
  0x6d   :  { %4409 = vmatprep.subr.mxu1 %v5153_v1 }
  0x6e   :  { %4410 = vmatpush3.msra.mxu1 %v5351_v11 }
  0x6f   :  { %4411 = vmatprep.subr.mxu1 %v5153_v1 }
  0x70   :  { %4412 = vmatpush3.msra.mxu1 %v5356_v12 }
  0x71   :  { %4413 = vmatprep.subr.mxu1 %v5153_v1 }
  0x72   :  { %4414 = vmatpush3.msra.mxu1 %v5363_v13 }
  0x73   :  { %4429 = vmatprep.subr.mxu1 %v5153_v1 }
 0x11b   :  { %v4368_v15 = vpop.f32.mrf.mxu1 }
 0x11c   :  { %v5383_v16 = vadd.f32 %v4368_v15, %v4092_v14 }
 0x11d   :  { %v232_v17 = vpop.f32.mrf.mxu1 }
 0x11e   :  { %v5385_v18 = vadd.f32 %v4092_v14, %v232_v17 }
 0x120   :  { %v397_v19 = vpop.f32.mrf.mxu0 }
 0x121   :  { %v401_v20 = vadd.f32 %v397_v19, %v5385_v18 }
 0x122   :  { %v4384_v21 = vpop.f32.mrf.mxu0  ;;  %v4373_v24 = vpop.f32.mrf.mxu1 }
 0x123   :  { %4791 = vtanh.f32 %v401_v20  ;;  %v5389_v25 = vadd.f32 %v4373_v24, %v4096_v23  ;;  %v4100_v29 = vmul.f32 -1.442695, %v401_v20 }
 0x124   :  { %v318_v26 = vpop.f32.mrf.mxu1 }
 0x125   :  { %4793 = vpow2.f32 %v4100_v29  ;;  %v5400_v41 = vadd.f32 %v4096_v23, %v318_v26 }
 0x12b   :  { %v498_v27 = vpop.f32.mrf.mxu1 }
 0x12c   :  { %v499_v36 = vadd.f32 %v5391_v34, %v498_v27 }
 0x12d   :  { %v4395_v28 = vpop.f32.mrf.mxu1 }
 0x12e   :  { %v502_v42 = vadd.f32 %v499_v36, %v5400_v41 }
 0x130   :  { %v4792_v22 = vpop.eup %4791  ;;  %v4102_v43 = vmul.f32 -1.442695, %v502_v42 }
 0x131   :  { %411 = vrot.lane.b32.xlu0 %v4792_v22, %s5155_s1 }
 0x132   :  { %v4794_v30 = vpop.eup %4793 }
 0x133   :  { %v405_v31 = vadd.f32 1.0, %v4794_v30 }
 0x135   :  { %4795 = vrcp.f32 %v405_v31 }
 0x142   :  { %v4796_v32 = vpop.eup %4795 }
 0x143   :  { %v409_v37 = vmul.f32 0.0, %v4796_v32 }
 0x1a3   :  { %v412_v33 = vpop.permute.xlu0 %411 }
 0x1a4   :  { %v414_v35 = vmul.f32 %v4796_v32, %v412_v33 }
 0x1a6   :  { %416 = vrot.lane.b32.xlu0 %v414_v35, %s5156_s2 }
 0x1aa   :  { %510 = vrot.lane.b32.xlu0 %v499_v36, %s5155_s1 }
 0x218   :  { %v417_v38 = vpop.permute.xlu0 %416 }
 0x219   :  { %v5396_v39 = vadd.f32 %v417_v38, %v409_v37 }
 0x21b   :  { %4797 = vtanh.f32 %v5396_v39  ;;  %v615_v19 = vrot.slane %v5396_v39, 6 }
 0x21c   :  { %4799 = vpow2.f32 %v4102_v43  ;;  %v511_v49 = vpop.permute.xlu0 %510 }
 0x228   :  { %v4798_v40 = vpop.eup %4797 }
 0x229   :  { %422 = vrot.lane.b32.xlu1 %v4798_v40, %s5155_s1  ;;  %v4800_v44 = vpop.eup %4799 }
 0x22a   :  { %v506_v45 = vadd.f32 1.0, %v4800_v44 }
 0x22c   :  { %4801 = vrcp.f32 %v506_v45 }
 0x239   :  { %v4802_v48 = vpop.eup %4801 }
 0x23a   :  { %v513_v50 = vmul.f32 %v4802_v48, %v511_v49  ;;  %v520_v55 = vsub.f32 1.0, %v4802_v48  ;;  %v526_v57 = vmul.f32 0.0, %v4802_v48 }
 0x29b   :  { %v423_v46 = vpop.permute.xlu1 %422 }
 0x29c   :  { %v5403_v47 = vmul.f32 %v4796_v32, %v423_v46 }
 0x29e   :  { %529 = vrot.lane.b32.xlu1 %v5403_v47, %s5156_s2 }
 0x2a2   :  { %515 = vrot.lane.b32.xlu1 %v513_v50, %s5155_s1 }
 0x310   :  { %v530_v51 = vpop.permute.xlu1 %529 }
 0x311   :  { %4405 = vmatmul.mubr.msk.f32.vlgmr.msra.gmra.mxu0 %vm327_vm3, %v530_v51 }
 0x312   :  { %4419 = vmatpush3.msra.mxu0 %v5288_v3  ;;  %4426 = vmatprep.mubr.msk.f32.mxu0 %vm5154_vm0, %v5153_v1 }
 0x313   :  { %4420 = vmatprep.subr.mxu0 %v5153_v1 }
 0x314   :  { %v516_v52 = vpop.permute.xlu1 %515  ;;  %4421 = vmatpush3.msra.mxu0 %v5301_v6 }
 0x315   :  { %v518_v53 = vadd.f32 %v516_v52, %v5400_v41  ;;  %4422 = vmatprep.subr.mxu0 %v5153_v1 }
 0x316   :  { %4423 = vmatpush3.msra.mxu0 %v5310_v7 }
 0x317   :  { %4803 = vtanh.f32 %v518_v53  ;;  %4424 = vmatprep.subr.mxu0 %v5153_v1 }
 0x318   :  { %4425 = vmatpush3.msra.mxu0 %v5318_v8 }
 0x319   :  { %4440 = vmatprep.subr.mxu0 %v5153_v1 }
 0x324   :  { %v4804_v54 = vpop.eup %4803 }
 0x325   :  { %522 = vrot.lane.b32.xlu0 %v4804_v54, %s5157_s12 }
 0x397   :  { %v523_v56 = vpop.permute.xlu0 %522 }
 0x398   :  { %v525_v58 = vmul.f32 %v523_v56, %v520_v55 }
 0x39a   :  { %v5421_v59 = vadd.f32 %v526_v57, %v525_v58 }
 0x39c   :  { %635 = vrot.lane.b32.xlu1 %v5421_v59, %s5157_s12  ;;  %v735_v46 = vrot.slane %v5421_v59, 6 }
 0x3d1   :  { %v599_v60 = vpop.f32.mrf.mxu0 }
 0x3d2   :  { %v604_v61 = vrot.slane %v599_v60, 6 }
 0x3d3   :  { %v4406_v62 = vpop.f32.mrf.mxu0 }
 0x3d4   :  { %v606_v63 = vadd.f32 %v604_v61, %v5385_v18 }
 0x3d6   :  { %4805 = vtanh.f32 %v606_v63  ;;  %v4104_v4 = vmul.f32 -1.442695, %v606_v63 }
 0x3d8   :  { %4807 = vpow2.f32 %v4104_v4 }
 0x3e3   :  { %v4806_v0 = vpop.eup %4805 }
 0x3e4   :  { %619 = vrot.lane.b32.xlu0 %v4806_v0, %s5155_s1 }
 0x3e5   :  { %v4808_v5 = vpop.eup %4807 }
 0x3e6   :  { %v610_v9 = vadd.f32 1.0, %v4808_v5 }
 0x3e8   :  { %4809 = vrcp.f32 %v610_v9 }
 0x3f5   :  { %v4810_v14 = vpop.eup %4809 }
 0x3f6   :  { %v617_v20 = vmul.f32 %v4810_v14, %v615_v19 }
 0x40e   :  { %v636_v2 = vpop.permute.xlu1 %635 }
 0x40f   :  { %4416 = vmatmul.mubr.msk.f32.vlgmr.msra.gmra.mxu1 %vm327_vm3, %v636_v2 }
 0x410   :  { %4430 = vmatpush3.msra.mxu1 %v5342_v10  ;;  %4437 = vmatprep.mubr.msk.f32.mxu1 %vm5154_vm0, %v5153_v1 }
 0x411   :  { %4431 = vmatprep.subr.mxu1 %v5153_v1 }
 0x412   :  { %4432 = vmatpush3.msra.mxu1 %v5351_v11 }
 0x413   :  { %4433 = vmatprep.subr.mxu1 %v5153_v1 }
 0x414   :  { %4434 = vmatpush3.msra.mxu1 %v5356_v12 }
 0x415   :  { %4435 = vmatprep.subr.mxu1 %v5153_v1 }
 0x416   :  { %4436 = vmatpush3.msra.mxu1 %v5363_v13 }
 0x417   :  { %4451 = vmatprep.subr.mxu1 %v5153_v1 }
 0x456   :  { %v620_v15 = vpop.permute.xlu0 %619 }
 0x457   :  { %v622_v17 = vmul.f32 %v4810_v14, %v620_v15 }
 0x459   :  { %624 = vrot.lane.b32.xlu1 %v622_v17, %s5156_s2 }
 0x4cb   :  { %v625_v21 = vpop.permute.xlu1 %624 }
 0x4cc   :  { %v5440_v22 = vadd.f32 %v625_v21, %v617_v20 }
 0x4ce   :  { %4811 = vtanh.f32 %v5440_v22  ;;  %v827_v4 = vrot.slane %v5440_v22, 6 }
 0x4cf   :  { %v705_v23 = vpop.f32.mrf.mxu1 }
 0x4d0   :  { %v706_v26 = vadd.f32 %v5391_v34, %v705_v23 }
 0x4d1   :  { %v4417_v24 = vpop.f32.mrf.mxu1 }
 0x4d2   :  { %v710_v28 = vrot.slane %v706_v26, 6 }
 0x4d4   :  { %v712_v29 = vadd.f32 %v710_v28, %v5400_v41 }
 0x4d6   :  { %v4106_v30 = vmul.f32 -1.442695, %v712_v29 }
 0x4d8   :  { %4813 = vpow2.f32 %v4106_v30 }
 0x4db   :  { %v4812_v27 = vpop.eup %4811 }
 0x4dc   :  { %630 = vrot.lane.b32.xlu0 %v4812_v27, %s5155_s1 }
 0x4e0   :  { %719 = vrot.lane.b32.xlu0 %v710_v28, %s5155_s1 }
 0x4e5   :  { %v4814_v31 = vpop.eup %4813 }
 0x4e6   :  { %v716_v32 = vadd.f32 1.0, %v4814_v31 }
 0x4e8   :  { %4815 = vrcp.f32 %v716_v32 }
 0x4f5   :  { %v4816_v38 = vpop.eup %4815 }
 0x4f6   :  { %v729_v45 = vsub.f32 1.0, %v4816_v38  ;;  %v737_v49 = vmul.f32 %v4816_v38, %v735_v46 }
 0x54e   :  { %v631_v33 = vpop.permute.xlu0 %630 }
 0x54f   :  { %v5447_v35 = vmul.f32 %v4810_v14, %v631_v33 }
 0x551   :  { %v740_v36 = vrot.slane %v5447_v35, 2  ;;  %v2010_v29 = vsel %vm2009_vm4, %v5403_v47, %v5447_v35 }
 0x552   :  { %v720_v37 = vpop.permute.xlu0 %719 }
 0x553   :  { %741 = vrot.lane.b32.xlu1 %v740_v36, %s5156_s2  ;;  %v722_v39 = vmul.f32 %v4816_v38, %v720_v37 }
 0x557   :  { %724 = vrot.lane.b32.xlu1 %v722_v39, %s5155_s1 }
 0x5c5   :  { %v742_v40 = vpop.permute.xlu1 %741 }
 0x5c6   :  { %4427 = vmatmul.mubr.msk.f32.vlgmr.msra.gmra.mxu0 %vm327_vm3, %v742_v40 }
 0x5c7   :  { %4441 = vmatpush3.msra.mxu0 %v5288_v3  ;;  %4448 = vmatprep.mubr.msk.f32.mxu0 %vm5154_vm0, %v5153_v1 }
 0x5c8   :  { %4442 = vmatprep.subr.mxu0 %v5153_v1 }
 0x5c9   :  { %v725_v42 = vpop.permute.xlu1 %724  ;;  %4443 = vmatpush3.msra.mxu0 %v5301_v6 }
 0x5ca   :  { %v727_v43 = vadd.f32 %v725_v42, %v5400_v41  ;;  %4444 = vmatprep.subr.mxu0 %v5153_v1 }
 0x5cb   :  { %4445 = vmatpush3.msra.mxu0 %v5310_v7 }
 0x5cc   :  { %4817 = vtanh.f32 %v727_v43  ;;  %4446 = vmatprep.subr.mxu0 %v5153_v1 }
 0x5cd   :  { %4447 = vmatpush3.msra.mxu0 %v5318_v8 }
 0x5ce   :  { %4462 = vmatprep.subr.mxu0 %v5153_v1 }
 0x5d9   :  { %v4818_v44 = vpop.eup %4817 }
 0x5da   :  { %731 = vrot.lane.b32.xlu0 %v4818_v44, %s5157_s12 }
 0x64c   :  { %v732_v48 = vpop.permute.xlu0 %731 }
 0x64d   :  { %v734_v50 = vmul.f32 %v732_v48, %v729_v45 }
 0x64f   :  { %v5466_v51 = vadd.f32 %v737_v49, %v734_v50 }
 0x651   :  { %v847_v52 = vrot.slane %v5466_v51, 2  ;;  %v948_v40 = vrot.slane %v5466_v51, 6  ;;  %v2017_v46 = vsel %vm2009_vm4, %v5421_v59, %v5466_v51 }
 0x653   :  { %848 = vrot.lane.b32.xlu1 %v847_v52, %s5157_s12 }
 0x686   :  { %v811_v53 = vpop.f32.mrf.mxu0 }
 0x687   :  { %v816_v54 = vrot.slane %v811_v53, 4 }
 0x688   :  { %v4428_v55 = vpop.f32.mrf.mxu0 }
 0x689   :  { %v818_v56 = vadd.f32 %v816_v54, %v5385_v18 }
 0x68b   :  { %4819 = vtanh.f32 %v818_v56  ;;  %v4108_v60 = vmul.f32 -1.442695, %v818_v56 }
 0x68d   :  { %4821 = vpow2.f32 %v4108_v60 }
 0x698   :  { %v4820_v57 = vpop.eup %4819 }
 0x699   :  { %831 = vrot.lane.b32.xlu0 %v4820_v57, %s5155_s1 }
 0x69a   :  { %v4822_v61 = vpop.eup %4821 }
 0x69b   :  { %v822_v62 = vadd.f32 1.0, %v4822_v61 }
 0x69d   :  { %4823 = vrcp.f32 %v822_v62 }
 0x6aa   :  { %v4824_v63 = vpop.eup %4823 }
 0x6ab   :  { %v829_v5 = vmul.f32 %v4824_v63, %v827_v4 }
 0x6c5   :  { %v849_v58 = vpop.permute.xlu1 %848 }
 0x6c6   :  { %4438 = vmatmul.mubr.msk.f32.vlgmr.msra.gmra.mxu1 %vm327_vm3, %v849_v58 }
 0x6c7   :  { %4452 = vmatpush3.msra.mxu1 %v5342_v10  ;;  %4459 = vmatprep.mubr.msk.f32.mxu1 %vm5154_vm0, %v5153_v1 }
 0x6c8   :  { %4453 = vmatprep.subr.mxu1 %v5153_v1 }
 0x6c9   :  { %4454 = vmatpush3.msra.mxu1 %v5351_v11 }
 0x6ca   :  { %4455 = vmatprep.subr.mxu1 %v5153_v1 }
 0x6cb   :  { %4456 = vmatpush3.msra.mxu1 %v5356_v12 }
 0x6cc   :  { %4457 = vmatprep.subr.mxu1 %v5153_v1 }
 0x6cd   :  { %4458 = vmatpush3.msra.mxu1 %v5363_v13 }
 0x6ce   :  { %4473 = vmatprep.subr.mxu1 %v5153_v1 }
 0x70b   :  { %v832_v0 = vpop.permute.xlu0 %831 }
 0x70c   :  { %v834_v2 = vmul.f32 %v4824_v63, %v832_v0 }
 0x70e   :  { %836 = vrot.lane.b32.xlu1 %v834_v2, %s5156_s2 }
 0x780   :  { %v837_v9 = vpop.permute.xlu1 %836 }
 0x781   :  { %v5485_v14 = vadd.f32 %v837_v9, %v829_v5 }
 0x783   :  { %4825 = vtanh.f32 %v5485_v14  ;;  %v1040_v61 = vrot.slane %v5485_v14, 6 }
 0x786   :  { %v918_v15 = vpop.f32.mrf.mxu1 }
 0x787   :  { %v919_v19 = vadd.f32 %v5391_v34, %v918_v15 }
 0x788   :  { %v4439_v17 = vpop.f32.mrf.mxu1 }
 0x789   :  { %v923_v21 = vrot.slane %v919_v19, 4 }
 0x78b   :  { %v925_v23 = vadd.f32 %v923_v21, %v5400_v41 }
 0x78d   :  { %v4110_v24 = vmul.f32 -1.442695, %v925_v23 }
 0x78f   :  { %4827 = vpow2.f32 %v4110_v24 }
 0x790   :  { %v4826_v20 = vpop.eup %4825 }
 0x791   :  { %842 = vrot.lane.b32.xlu0 %v4826_v20, %s5155_s1 }
 0x795   :  { %932 = vrot.lane.b32.xlu0 %v923_v21, %s5155_s1 }
 0x79c   :  { %v4828_v22 = vpop.eup %4827 }
 0x79d   :  { %v929_v26 = vadd.f32 1.0, %v4828_v22 }
 0x79f   :  { %4829 = vrcp.f32 %v929_v26 }
 0x7ac   :  { %v4830_v33 = vpop.eup %4829 }
 0x7ad   :  { %v942_v39 = vsub.f32 1.0, %v4830_v33  ;;  %v950_v43 = vmul.f32 %v4830_v33, %v948_v40 }
 0x803   :  { %v843_v27 = vpop.permute.xlu0 %842 }
 0x804   :  { %v845_v28 = vmul.f32 %v4824_v63, %v843_v27 }
 0x806   :  { %v953_v30 = vrot.slane %v845_v28, 4  ;;  %v5496_v31 = vsel %vm162_vm1, %v2010_v29, %v845_v28 }
 0x807   :  { %v933_v32 = vpop.permute.xlu0 %932 }
 0x808   :  { %954 = vrot.lane.b32.xlu1 %v953_v30, %s5156_s2  ;;  %v935_v36 = vmul.f32 %v4830_v33, %v933_v32 }
 0x80c   :  { %937 = vrot.lane.b32.xlu1 %v935_v36, %s5155_s1 }
 0x87a   :  { %v955_v37 = vpop.permute.xlu1 %954 }
 0x87b   :  { %4449 = vmatmul.mubr.msk.f32.vlgmr.msra.gmra.mxu0 %vm327_vm3, %v955_v37 }
 0x87c   :  { %4463 = vmatpush3.msra.mxu0 %v5288_v3  ;;  %4470 = vmatprep.mubr.msk.f32.mxu0 %vm5154_vm0, %v5153_v1 }
 0x87d   :  { %4464 = vmatprep.subr.mxu0 %v5153_v1 }
 0x87e   :  { %v938_v47 = vpop.permute.xlu1 %937  ;;  %4465 = vmatpush3.msra.mxu0 %v5301_v6 }
 0x87f   :  { %v940_v35 = vadd.f32 %v938_v47, %v5400_v41  ;;  %4466 = vmatprep.subr.mxu0 %v5153_v1 }
 0x880   :  { %4467 = vmatpush3.msra.mxu0 %v5310_v7 }
 0x881   :  { %4831 = vtanh.f32 %v940_v35  ;;  %4468 = vmatprep.subr.mxu0 %v5153_v1 }
 0x882   :  { %4469 = vmatpush3.msra.mxu0 %v5318_v8 }
 0x883   :  { %4484 = vmatprep.subr.mxu0 %v5153_v1 }
 0x88e   :  { %v4832_v38 = vpop.eup %4831 }
 0x88f   :  { %944 = vrot.lane.b32.xlu0 %v4832_v38, %s5157_s12 }
 0x901   :  { %v945_v42 = vpop.permute.xlu0 %944 }
 0x902   :  { %v947_v44 = vmul.f32 %v945_v42, %v942_v39 }
 0x904   :  { %v5514_v45 = vadd.f32 %v950_v43, %v947_v44 }
 0x906   :  { %v1060_v48 = vrot.slane %v5514_v45, 4  ;;  %v5522_v49 = vsel %vm162_vm1, %v2017_v46, %v5514_v45  ;;  %v1161_v36 = vrot.slane %v5514_v45, 6 }
 0x908   :  { %1061 = vrot.lane.b32.xlu1 %v1060_v48, %s5157_s12 }
 0x93b   :  { %v1024_v50 = vpop.f32.mrf.mxu0 }
 0x93c   :  { %v1029_v52 = vrot.slane %v1024_v50, 2 }
 0x93d   :  { %v4450_v53 = vpop.f32.mrf.mxu0 }
 0x93e   :  { %v1031_v54 = vadd.f32 %v1029_v52, %v5385_v18 }
 0x940   :  { %4833 = vtanh.f32 %v1031_v54  ;;  %v4112_v18 = vmul.f32 -1.442695, %v1031_v54 }
 0x942   :  { %4835 = vpow2.f32 %v4112_v18 }
 0x94d   :  { %v4834_v55 = vpop.eup %4833 }
 0x94e   :  { %1044 = vrot.lane.b32.xlu0 %v4834_v55, %s5155_s1 }
 0x94f   :  { %v4836_v59 = vpop.eup %4835 }
 0x950   :  { %v1035_v51 = vadd.f32 1.0, %v4836_v59 }
 0x952   :  { %4837 = vrcp.f32 %v1035_v51 }
 0x95f   :  { %v4838_v57 = vpop.eup %4837 }
 0x960   :  { %v1042_v62 = vmul.f32 %v4838_v57, %v1040_v61 }
 0x97a   :  { %v1062_v56 = vpop.permute.xlu1 %1061 }
 0x97b   :  { %4460 = vmatmul.mubr.msk.f32.vlgmr.msra.gmra.mxu1 %vm327_vm3, %v1062_v56 }
 0x97c   :  { %4474 = vmatpush3.msra.mxu1 %v5342_v10  ;;  %4481 = vmatprep.mubr.msk.f32.mxu1 %vm5154_vm0, %v5153_v1 }
 0x97d   :  { %4475 = vmatprep.subr.mxu1 %v5153_v1 }
 0x97e   :  { %4476 = vmatpush3.msra.mxu1 %v5351_v11 }
 0x97f   :  { %4477 = vmatprep.subr.mxu1 %v5153_v1 }
 0x980   :  { %4478 = vmatpush3.msra.mxu1 %v5356_v12 }
 0x981   :  { %4479 = vmatprep.subr.mxu1 %v5153_v1 }
 0x982   :  { %4480 = vmatpush3.msra.mxu1 %v5363_v13 }
 0x983   :  { %4495 = vmatprep.subr.mxu1 %v5153_v1 }
 0x9c0   :  { %v1045_v58 = vpop.permute.xlu0 %1044 }
 0x9c1   :  { %v1047_v60 = vmul.f32 %v4838_v57, %v1045_v58 }
 0x9c3   :  { %1049 = vrot.lane.b32.xlu1 %v1047_v60, %s5156_s2 }
 0xa35   :  { %v1050_v63 = vpop.permute.xlu1 %1049 }
 0xa36   :  { %v5540_v0 = vadd.f32 %v1050_v63, %v1042_v62 }
 0xa38   :  { %4839 = vtanh.f32 %v5540_v0  ;;  %v1250_v54 = vrot.slane %v5540_v0, 6 }
 0xa3b   :  { %v1131_v2 = vpop.f32.mrf.mxu1 }
 0xa3c   :  { %v1132_v5 = vadd.f32 %v5391_v34, %v1131_v2 }
 0xa3d   :  { %v4461_v4 = vpop.f32.mrf.mxu1 }
 0xa3e   :  { %v1136_v15 = vrot.slane %v1132_v5, 2 }
 0xa40   :  { %v1138_v17 = vadd.f32 %v1136_v15, %v5400_v41 }
 0xa42   :  { %v4114_v19 = vmul.f32 -1.442695, %v1138_v17 }
 0xa44   :  { %4841 = vpow2.f32 %v4114_v19 }
 0xa45   :  { %v4840_v9 = vpop.eup %4839 }
 0xa46   :  { %1055 = vrot.lane.b32.xlu0 %v4840_v9, %s5155_s1 }
 0xa4a   :  { %1145 = vrot.lane.b32.xlu0 %v1136_v15, %s5155_s1 }
 0xa51   :  { %v4842_v14 = vpop.eup %4841 }
 0xa52   :  { %v1142_v20 = vadd.f32 1.0, %v4842_v14 }
 0xa54   :  { %4843 = vrcp.f32 %v1142_v20 }
 0xa61   :  { %v4844_v27 = vpop.eup %4843 }
 0xa62   :  { %v1155_v33 = vsub.f32 1.0, %v4844_v27  ;;  %v1163_v47 = vmul.f32 %v4844_v27, %v1161_v36 }
 0xab8   :  { %v1056_v21 = vpop.permute.xlu0 %1055 }
 0xab9   :  { %v1058_v23 = vmul.f32 %v4838_v57, %v1056_v21 }
 0xabb   :  { %v1166_v24 = vrot.slane %v1058_v23, 6  ;;  %v5549_v22 = vsel %vm2012_vm5, %v5496_v31, %v1058_v23 }
 0xabc   :  { %v1146_v26 = vpop.permute.xlu0 %1145 }
 0xabd   :  { %1167 = vrot.lane.b32.xlu1 %v1166_v24, %s5156_s2  ;;  %v1148_v28 = vmul.f32 %v4844_v27, %v1146_v26 }
 0xac1   :  { %1150 = vrot.lane.b32.xlu1 %v1148_v28, %s5155_s1 }
 0xb2f   :  { %v1168_v29 = vpop.permute.xlu1 %1167 }
 0xb30   :  { %4471 = vmatmul.mubr.msk.f32.vlgmr.msra.gmra.mxu0 %vm327_vm3, %v1168_v29 }
 0xb31   :  { %4485 = vmatpush3.msra.mxu0 %v5288_v3  ;;  %4492 = vmatprep.mubr.msk.f32.mxu0 %vm5154_vm0, %v5153_v1 }
 0xb32   :  { %4486 = vmatprep.subr.mxu0 %v5153_v1 }
 0xb33   :  { %v1151_v30 = vpop.permute.xlu1 %1150  ;;  %4487 = vmatpush3.msra.mxu0 %v5301_v6 }
 0xb34   :  { %v1153_v31 = vadd.f32 %v1151_v30, %v5400_v41  ;;  %4488 = vmatprep.subr.mxu0 %v5153_v1 }
 0xb35   :  { %4489 = vmatpush3.msra.mxu0 %v5310_v7 }
 0xb36   :  { %4845 = vtanh.f32 %v1153_v31  ;;  %4490 = vmatprep.subr.mxu0 %v5153_v1 }
 0xb37   :  { %4491 = vmatpush3.msra.mxu0 %v5318_v8 }
 0xb38   :  { %4506 = vmatprep.subr.mxu0 %v5153_v1 }
 0xb43   :  { %v4846_v32 = vpop.eup %4845 }
 0xb44   :  { %1157 = vrot.lane.b32.xlu0 %v4846_v32, %s5157_s12 }
 0xbb6   :  { %v1158_v37 = vpop.permute.xlu0 %1157 }
 0xbb7   :  { %v1160_v41 = vmul.f32 %v1158_v37, %v1155_v33 }
 0xbb9   :  { %v5567_v35 = vadd.f32 %v1163_v47, %v1160_v41 }
 0xbbb   :  { %v1270_v38 = vrot.slane %v5567_v35, 6  ;;  %v5573_v39 = vsel %vm2012_vm5, %v5522_v49, %v5567_v35 }
 0xbbd   :  { %1271 = vrot.lane.b32.xlu1 %v1270_v38, %s5157_s12 }
 0xbf0   :  { %v1237_v40 = vpop.f32.mrf.mxu0 }
 0xbf1   :  { %v1241_v42 = vadd.f32 %v1237_v40, %v5383_v16 }
 0xbf2   :  { %v4472_v43 = vpop.f32.mrf.mxu0 }
 0xbf3   :  { %4847 = vtanh.f32 %v1241_v42  ;;  %v4116_v46 = vmul.f32 -1.442695, %v1241_v42 }
 0xbf5   :  { %4849 = vpow2.f32 %v4116_v46 }
 0xc00   :  { %v4848_v44 = vpop.eup %4847 }
 0xc01   :  { %1254 = vrot.lane.b32.xlu0 %v4848_v44, %s5155_s1 }
 0xc02   :  { %v4850_v48 = vpop.eup %4849 }
 0xc03   :  { %v1245_v49 = vadd.f32 1.0, %v4850_v48 }
 0xc05   :  { %4851 = vrcp.f32 %v1245_v49 }
 0xc12   :  { %v4852_v50 = vpop.eup %4851 }
 0xc13   :  { %v1252_v55 = vmul.f32 %v4852_v50, %v1250_v54 }
 0xc2f   :  { %v1272_v45 = vpop.permute.xlu1 %1271 }
 0xc30   :  { %4482 = vmatmul.mubr.msk.f32.vlgmr.msra.gmra.mxu1 %vm327_vm3, %v1272_v45 }
 0xc31   :  { %4496 = vmatpush3.msra.mxu1 %v5342_v10  ;;  %4503 = vmatprep.mubr.msk.f32.mxu1 %vm5154_vm0, %v5153_v1 }
 0xc32   :  { %4497 = vmatprep.subr.mxu1 %v5153_v1 }
 0xc33   :  { %4498 = vmatpush3.msra.mxu1 %v5351_v11 }
 0xc34   :  { %4499 = vmatprep.subr.mxu1 %v5153_v1 }
 0xc35   :  { %4500 = vmatpush3.msra.mxu1 %v5356_v12 }
 0xc36   :  { %4501 = vmatprep.subr.mxu1 %v5153_v1 }
 0xc37   :  { %4502 = vmatpush3.msra.mxu1 %v5363_v13 }
 0xc38   :  { %4517 = vmatprep.subr.mxu1 %v5153_v1 }
 0xc73   :  { %v1255_v52 = vpop.permute.xlu0 %1254 }
 0xc74   :  { %v1257_v53 = vmul.f32 %v4852_v50, %v1255_v52 }
 0xc76   :  { %1259 = vrot.lane.b32.xlu1 %v1257_v53, %s5156_s2 }
 0xce8   :  { %v1260_v56 = vpop.permute.xlu1 %1259 }
 0xce9   :  { %v5593_v18 = vadd.f32 %v1260_v56, %v1252_v55 }
 0xceb   :  { %4853 = vtanh.f32 %v5593_v18  ;;  %v1459_v43 = vrot.slane %v5593_v18, 6 }
 0xcf0   :  { %v1341_v59 = vpop.f32.mrf.mxu1 }
 0xcf1   :  { %v1342_v51 = vadd.f32 %v5391_v34, %v1341_v59 }
 0xcf2   :  { %v4483_v57 = vpop.f32.mrf.mxu1 }
 0xcf3   :  { %1353 = vrot.lane.b32.xlu1 %v1342_v51, %s5155_s1  ;;  %v1345_v60 = vadd.f32 %v1342_v51, %v5389_v25 }
 0xcf5   :  { %v4118_v61 = vmul.f32 -1.442695, %v1345_v60 }
 0xcf7   :  { %4855 = vpow2.f32 %v4118_v61 }
 0xcf8   :  { %v4854_v58 = vpop.eup %4853 }
 0xcf9   :  { %1265 = vrot.lane.b32.xlu0 %v4854_v58, %s5155_s1 }
 0xd04   :  { %v4856_v62 = vpop.eup %4855 }
 0xd05   :  { %v1349_v63 = vadd.f32 1.0, %v4856_v62 }
 0xd07   :  { %4857 = vrcp.f32 %v1349_v63 }
 0xd14   :  { %v4858_v0 = vpop.eup %4857 }
 0xd15   :  { %v1363_v20 = vsub.f32 1.0, %v4858_v0  ;;  %v1370_v23 = vmul.f32 %v4858_v0, %v1270_v38 }
 0xd65   :  { %v1354_v2 = vpop.permute.xlu1 %1353 }
 0xd66   :  { %v1356_v4 = vmul.f32 %v4858_v0, %v1354_v2 }
 0xd68   :  { %1358 = vrot.lane.b32.xlu1 %v1356_v4, %s5155_s1 }
 0xd6b   :  { %v1266_v5 = vpop.permute.xlu0 %1265 }
 0xd6c   :  { %v5601_v9 = vmul.f32 %v4852_v50, %v1266_v5 }
 0xd6e   :  { %1373 = vrot.lane.b32.xlu0 %v5601_v9, %s5156_s2 }
 0xdda   :  { %v1359_v15 = vpop.permute.xlu1 %1358 }
 0xddb   :  { %v1361_v17 = vadd.f32 %v1359_v15, %v5389_v25 }
 0xddd   :  { %4859 = vtanh.f32 %v1361_v17 }
 0xde0   :  { %v1374_v19 = vpop.permute.xlu0 %1373 }
 0xde1   :  { %4493 = vmatmul.mubr.msk.f32.vlgmr.msra.gmra.mxu0 %vm327_vm3, %v1374_v19 }
 0xde2   :  { %4507 = vmatpush3.msra.mxu0 %v5288_v3  ;;  %4514 = vmatprep.mubr.msk.f32.mxu0 %vm5154_vm0, %v5153_v1 }
 0xde3   :  { %4508 = vmatprep.subr.mxu0 %v5153_v1 }
 0xde4   :  { %4509 = vmatpush3.msra.mxu0 %v5301_v6 }
 0xde5   :  { %4510 = vmatprep.subr.mxu0 %v5153_v1 }
 0xde6   :  { %4511 = vmatpush3.msra.mxu0 %v5310_v7 }
 0xde7   :  { %4512 = vmatprep.subr.mxu0 %v5153_v1 }
 0xde8   :  { %4513 = vmatpush3.msra.mxu0 %v5318_v8 }
 0xde9   :  { %4528 = vmatprep.subr.mxu0 %v5153_v1 }
 0xdea   :  { %v4860_v14 = vpop.eup %4859 }
 0xdeb   :  { %1365 = vrot.lane.b32.xlu0 %v4860_v14, %s5157_s12 }
 0xe5d   :  { %v1366_v21 = vpop.permute.xlu0 %1365 }
 0xe5e   :  { %v1368_v24 = vmul.f32 %v1366_v21, %v1363_v20 }
 0xe60   :  { %v5620_v26 = vadd.f32 %v1370_v23, %v1368_v24 }
 0xe62   :  { %1479 = vrot.lane.b32.xlu1 %v5620_v26, %s5157_s12  ;;  %v1579_v0 = vrot.slane %v5620_v26, 6 }
 0xea1   :  { %v1443_v27 = vpop.f32.mrf.mxu0 }
 0xea2   :  { %v1448_v28 = vrot.slane %v1443_v27, 6 }
 0xea3   :  { %v4494_v29 = vpop.f32.mrf.mxu0 }
 0xea4   :  { %v1450_v30 = vadd.f32 %v1448_v28, %v5383_v16 }
 0xea6   :  { %4861 = vtanh.f32 %v1450_v30  ;;  %v4120_v33 = vmul.f32 -1.442695, %v1450_v30 }
 0xea8   :  { %4863 = vpow2.f32 %v4120_v33 }
 0xeb3   :  { %v4862_v31 = vpop.eup %4861 }
 0xeb4   :  { %1463 = vrot.lane.b32.xlu0 %v4862_v31, %s5155_s1 }
 0xeb5   :  { %v4864_v36 = vpop.eup %4863 }
 0xeb6   :  { %v1454_v37 = vadd.f32 1.0, %v4864_v36 }
 0xeb8   :  { %4865 = vrcp.f32 %v1454_v37 }
 0xec5   :  { %v4866_v47 = vpop.eup %4865 }
 0xec6   :  { %v1461_v45 = vmul.f32 %v4866_v47, %v1459_v43 }
 0xed4   :  { %v1480_v32 = vpop.permute.xlu1 %1479 }
 0xed5   :  { %4504 = vmatmul.mubr.msk.f32.vlgmr.msra.gmra.mxu1 %vm327_vm3, %v1480_v32 }
 0xed6   :  { %4518 = vmatpush3.msra.mxu1 %v5342_v10  ;;  %4525 = vmatprep.mubr.msk.f32.mxu1 %vm5154_vm0, %v5153_v1 }
 0xed7   :  { %4519 = vmatprep.subr.mxu1 %v5153_v1 }
 0xed8   :  { %4520 = vmatpush3.msra.mxu1 %v5351_v11 }
 0xed9   :  { %4521 = vmatprep.subr.mxu1 %v5153_v1 }
 0xeda   :  { %4522 = vmatpush3.msra.mxu1 %v5356_v12 }
 0xedb   :  { %4523 = vmatprep.subr.mxu1 %v5153_v1 }
 0xedc   :  { %4524 = vmatpush3.msra.mxu1 %v5363_v13 }
 0xedd   :  { %4539 = vmatprep.subr.mxu1 %v5153_v1 }
 0xf26   :  { %v1464_v41 = vpop.permute.xlu0 %1463 }
 0xf27   :  { %v1466_v35 = vmul.f32 %v4866_v47, %v1464_v41 }
 0xf29   :  { %1468 = vrot.lane.b32.xlu1 %v1466_v35, %s5156_s2 }
 0xf95   :  { %v1549_v38 = vpop.f32.mrf.mxu1 }
 0xf96   :  { %v1550_v40 = vadd.f32 %v5391_v34, %v1549_v38 }
 0xf97   :  { %v4505_v42 = vpop.f32.mrf.mxu1 }
 0xf98   :  { %v1554_v44 = vrot.slane %v1550_v40, 6 }
 0xf9a   :  { %1563 = vrot.lane.b32.xlu1 %v1554_v44, %s5155_s1  ;;  %v1556_v50 = vadd.f32 %v1554_v44, %v5389_v25 }
 0xf9b   :  { %v1469_v46 = vpop.permute.xlu1 %1468 }
 0xf9c   :  { %v5641_v48 = vadd.f32 %v1469_v46, %v1461_v45  ;;  %v4122_v52 = vmul.f32 -1.442695, %v1556_v50 }
 0xf9e   :  { %4867 = vtanh.f32 %v5641_v48 }
 0xf9f   :  { %4869 = vpow2.f32 %v4122_v52 }
 0xfab   :  { %v4868_v49 = vpop.eup %4867 }
 0xfac   :  { %1474 = vrot.lane.b32.xlu0 %v4868_v49, %s5155_s1  ;;  %v4870_v53 = vpop.eup %4869 }
 0xfad   :  { %v1560_v54 = vadd.f32 1.0, %v4870_v53 }
 0xfaf   :  { %4871 = vrcp.f32 %v1560_v54 }
 0xfbc   :  { %v4872_v55 = vpop.eup %4871 }
 0xfbd   :  { %v1573_v63 = vsub.f32 1.0, %v4872_v55 }
0x100c   :  { %v1564_v56 = vpop.permute.xlu1 %1563 }
0x100d   :  { %v1566_v18 = vmul.f32 %v4872_v55, %v1564_v56 }
0x100f   :  { %1568 = vrot.lane.b32.xlu1 %v1566_v18, %s5155_s1 }
0x101e   :  { %v1475_v59 = vpop.permute.xlu0 %1474 }
0x101f   :  { %v5647_v51 = vmul.f32 %v4866_v47, %v1475_v59 }
0x1021   :  { %v1584_v57 = vrot.slane %v5647_v51, 2  ;;  %v2014_v43 = vsel %vm2009_vm4, %v5601_v9, %v5647_v51 }
0x1023   :  { %1585 = vrot.lane.b32.xlu0 %v1584_v57, %s5156_s2 }
0x1081   :  { %v1569_v58 = vpop.permute.xlu1 %1568 }
0x1082   :  { %v1571_v60 = vadd.f32 %v1569_v58, %v5389_v25 }
0x1084   :  { %4873 = vtanh.f32 %v1571_v60 }
0x1091   :  { %v4874_v61 = vpop.eup %4873 }
0x1092   :  { %1575 = vrot.lane.b32.xlu0 %v4874_v61, %s5157_s12 }
0x1095   :  { %v1586_v62 = vpop.permute.xlu0 %1585 }
0x1096   :  { %4515 = vmatmul.mubr.msk.f32.vlgmr.msra.gmra.mxu0 %vm327_vm3, %v1586_v62 }
0x1097   :  { %4529 = vmatpush3.msra.mxu0 %v5288_v3  ;;  %4536 = vmatprep.mubr.msk.f32.mxu0 %vm5154_vm0, %v5153_v1  ;;  %v1581_v3 = vmul.f32 %v4872_v55, %v1579_v0 }
0x1098   :  { %4530 = vmatprep.subr.mxu0 %v5153_v1 }
0x1099   :  { %4531 = vmatpush3.msra.mxu0 %v5301_v6 }
0x109a   :  { %4532 = vmatprep.subr.mxu0 %v5153_v1 }
0x109b   :  { %4533 = vmatpush3.msra.mxu0 %v5310_v7 }
0x109c   :  { %4534 = vmatprep.subr.mxu0 %v5153_v1 }
0x109d   :  { %4535 = vmatpush3.msra.mxu0 %v5318_v8 }
0x1104   :  { %v1576_v2 = vpop.permute.xlu0 %1575 }
0x1105   :  { %v1578_v4 = vmul.f32 %v1576_v2, %v1573_v63 }
0x1107   :  { %v5664_v5 = vadd.f32 %v1581_v3, %v1578_v4 }
0x1109   :  { %v1691_v15 = vrot.slane %v5664_v5, 2  ;;  %v1792_v53 = vrot.slane %v5664_v5, 6  ;;  %v2020_v18 = vsel %vm2009_vm4, %v5620_v26, %v5664_v5 }
0x110b   :  { %1692 = vrot.lane.b32.xlu1 %v1691_v15, %s5157_s12 }
0x1156   :  { %v1655_v6 = vpop.f32.mrf.mxu0 }
0x1157   :  { %v1660_v17 = vrot.slane %v1655_v6, 4  ;;  %v5015_v6 = vld [vmem:[#allocation7] ss:$0 sm:$0xff] }
0x1158   :  { %v4516_v19 = vpop.f32.mrf.mxu0 }
0x1159   :  { %v1662_v7 = vadd.f32 %v1660_v17, %v5383_v16 }
0x115b   :  { %4875 = vtanh.f32 %v1662_v7  ;;  %v4124_v20 = vmul.f32 -1.442695, %v1662_v7 }
0x115d   :  { %4877 = vpow2.f32 %v4124_v20 }
0x1168   :  { %v4876_v14 = vpop.eup %4875 }
0x1169   :  { %1675 = vrot.lane.b32.xlu0 %v4876_v14, %s5155_s1 }
0x116a   :  { %v4878_v21 = vpop.eup %4877 }
0x116b   :  { %v1666_v23 = vadd.f32 1.0, %v4878_v21 }
0x116d   :  { %4879 = vrcp.f32 %v1666_v23 }
0x117d   :  { %v1693_v8 = vpop.permute.xlu1 %1692 }
0x117e   :  { %4526 = vmatmul.mubr.msk.f32.vlgmr.msra.gmra.mxu1 %vm327_vm3, %v1693_v8 }
0x117f   :  { %4540 = vmatpush3.msra.mxu1 %v5342_v10  ;;  %4547 = vmatprep.mubr.msk.f32.mxu1 %vm5154_vm0, %v5153_v1  ;;  %v4880_v10 = vpop.eup %4879 }
0x1180   :  { %4541 = vmatprep.subr.mxu1 %v5153_v1 }
0x1181   :  { %4542 = vmatpush3.msra.mxu1 %v5351_v11 }
0x1182   :  { %4543 = vmatprep.subr.mxu1 %v5153_v1 }
0x1183   :  { %4544 = vmatpush3.msra.mxu1 %v5356_v12  ;;  %v1671_v12 = vrot.slane %v5641_v48, 6 }
0x1184   :  { %4545 = vmatprep.subr.mxu1 %v5153_v1 }
0x1185   :  { %4546 = vmatpush3.msra.mxu1 %v5363_v13  ;;  %v1673_v13 = vmul.f32 %v4880_v10, %v1671_v12  ;;  %v2033_v12 = vld [vmem:[%s6201_s4 + $0x8] sm:$0xff] }
0x11db   :  { %v1676_v24 = vpop.permute.xlu0 %1675 }
0x11dc   :  { %v1678_v27 = vmul.f32 %v4880_v10, %v1676_v24 }
0x11de   :  { %1680 = vrot.lane.b32.xlu1 %v1678_v27, %s5156_s2 }
0x123e   :  { %v1762_v28 = vpop.f32.mrf.mxu1 }
0x123f   :  { %v1763_v11 = vadd.f32 %v5391_v34, %v1762_v28 }
0x1240   :  { %v4527_v29 = vpop.f32.mrf.mxu1 }
0x1241   :  { %v1767_v30 = vrot.slane %v1763_v11, 4 }
0x1243   :  { %1776 = vrot.lane.b32.xlu1 %v1767_v30, %s5155_s1  ;;  %v1769_v36 = vadd.f32 %v1767_v30, %v5389_v25  ;;  %v2035_v30 = vld [vmem:[%s6201_s4 + $0x18] sm:$0xff] }
0x1244   :  { %4550 = vmatprep.subr.mxu0 %v2035_v30 }
0x1245   :  { %v4126_v37 = vmul.f32 -1.442695, %v1769_v36 }
0x1250   :  { %v1681_v31 = vpop.permute.xlu1 %1680 }
0x1251   :  { %v5684_v32 = vadd.f32 %v1681_v31, %v1673_v13  ;;  %v2032_v13 = vld [vmem:[%s6201_s4] sm:$0xff] }
0x1253   :  { %4881 = vtanh.f32 %v5684_v32  ;;  %v1884_v7 = vrot.slane %v5684_v32, 6 }
0x1254   :  { %4883 = vpow2.f32 %v4126_v37 }
0x1260   :  { %v4882_v33 = vpop.eup %4881 }
0x1261   :  { %1686 = vrot.lane.b32.xlu0 %v4882_v33, %s5155_s1  ;;  %v4884_v34 = vpop.eup %4883 }
0x1262   :  { %v1773_v47 = vadd.f32 1.0, %v4884_v34 }
0x1264   :  { %4885 = vrcp.f32 %v1773_v47 }
0x1271   :  { %v4886_v41 = vpop.eup %4885 }
0x1272   :  { %v1786_v52 = vsub.f32 1.0, %v4886_v41  ;;  %v1794_v54 = vmul.f32 %v4886_v41, %v1792_v53 }
0x12b5   :  { %v1777_v35 = vpop.permute.xlu1 %1776 }
0x12b6   :  { %v1779_v38 = vmul.f32 %v4886_v41, %v1777_v35  ;;  %v5751_v41 = vld [vmem:[%s6202_s5 + $0x18] sm:$0xff] }
0x12b8   :  { %1781 = vrot.lane.b32.xlu1 %v1779_v38, %s5155_s1  ;;  %v5757_v38 = vld [vmem:[%s6202_s5 + $0x10] sm:$0xff] }
0x12d3   :  { %v1687_v40 = vpop.permute.xlu0 %1686 }
0x12d4   :  { %v1689_v42 = vmul.f32 %v4880_v10, %v1687_v40  ;;  %v5773_v40 = vld [vmem:[%s6202_s5] sm:$0xff] }
0x12d6   :  { %v1797_v44 = vrot.slane %v1689_v42, 4  ;;  %v5694_v45 = vsel %vm162_vm1, %v2014_v43, %v1689_v42  ;;  %v2131_v42 = vld [vmem:[%s6208_s11 + $0x18] sm:$0xff]  ;;  %v2130_v43 = vld [vmem:[%s6208_s11 + $0x10] sm:$0xff] }
0x12d7   :  { %4561 = vmatprep.subr.mxu1 %v2131_v42 }
0x12d8   :  { %1798 = vrot.lane.b32.xlu0 %v1797_v44, %s5156_s2  ;;  %v2129_v44 = vld [vmem:[%s6208_s11 + $0x8] sm:$0xff] }
0x132a   :  { %v1782_v46 = vpop.permute.xlu1 %1781 }
0x132b   :  { %v1784_v48 = vadd.f32 %v1782_v46, %v5389_v25 }
0x132d   :  { %4887 = vtanh.f32 %v1784_v48 }
0x133a   :  { %v4888_v49 = vpop.eup %4887 }
0x133b   :  { %1788 = vrot.lane.b32.xlu0 %v4888_v49, %s5157_s12 }
0x134a   :  { %v1799_v50 = vpop.permute.xlu0 %1798 }
0x134b   :  { %4537 = vmatmul.mubr.msk.f32.vlgmr.msra.gmra.mxu0 %vm327_vm3, %v1799_v50 }
0x134c   :  { %4551 = vmatpush3.msra.mxu0 %v2035_v30 }
0x13ad   :  { %v1789_v9 = vpop.permute.xlu0 %1788 }
0x13ae   :  { %v1791_v55 = vmul.f32 %v1789_v9, %v1786_v52 }
0x13b0   :  { %v5701_v56 = vadd.f32 %v1794_v54, %v1791_v55  ;;  %v4131_v54 = vld [vmem:[%s6203_s6] ss:$0 sm:$0xff] }
0x13b2   :  { %v1904_v59 = vrot.slane %v5701_v56, 4  ;;  %v5709_v51 = vsel %vm162_vm1, %v2020_v18, %v5701_v56  ;;  %v2005_v48 = vrot.slane %v5701_v56, 6 }
0x13b4   :  { %1905 = vrot.lane.b32.xlu1 %v1904_v59, %s5157_s12 }
0x140b   :  { %v1868_v57 = vpop.f32.mrf.mxu0 }
0x140c   :  { %v1873_v58 = vrot.slane %v1868_v57, 2 }
0x140d   :  { %v4538_v60 = vpop.f32.mrf.mxu0 }
0x140e   :  { %v1875_v61 = vadd.f32 %v1873_v58, %v5383_v16 }
0x1410   :  { %4889 = vtanh.f32 %v1875_v61  ;;  %v4128_v26 = vmul.f32 -1.442695, %v1875_v61  ;;  %v5817_v61 = vld [vmem:[#allocation8 + $0x18] sm:$0xff] }
0x1412   :  { %4891 = vpow2.f32 %v4128_v26  ;;  %v5830_v26 = vld [vmem:[#allocation8] sm:$0xff] }
0x141d   :  { %v4890_v62 = vpop.eup %4889 }
0x141e   :  { %1888 = vrot.lane.b32.xlu0 %v4890_v62, %s5155_s1  ;;  %v5820_v62 = vld [vmem:[#allocation8 + $0x10] sm:$0xff] }
0x141f   :  { %v4892_v0 = vpop.eup %4891 }
0x1420   :  { %v1879_v2 = vadd.f32 1.0, %v4892_v0 }
0x1422   :  { %4893 = vrcp.f32 %v1879_v2 }
0x1426   :  { %v1906_v63 = vpop.permute.xlu1 %1905 }
0x1427   :  { %4548 = vmatmul.mubr.msk.f32.vlgmr.msra.gmra.mxu1 %vm327_vm3, %v1906_v63  ;;  %v5826_v63 = vld [vmem:[#allocation8 + $0x8] sm:$0xff] }
0x1428   :  { %4562 = vmatpush3.msra.mxu1 %v2131_v42 }
0x1429   :  { %4563 = vmatprep.subr.mxu1 %v2130_v43 }
0x142a   :  { %4564 = vmatpush3.msra.mxu1 %v2130_v43 }
0x142b   :  { %4565 = vmatprep.subr.mxu1 %v2129_v44 }
0x142c   :  { %4566 = vmatpush3.msra.mxu1 %v2129_v44 }
0x142f   :  { %v4894_v3 = vpop.eup %4893 }
0x1430   :  { %v1886_v14 = vmul.f32 %v4894_v3, %v1884_v7 }
0x1490   :  { %v1889_v4 = vpop.permute.xlu0 %1888 }
0x1491   :  { %v1891_v5 = vmul.f32 %v4894_v3, %v1889_v4 }
0x1493   :  { %1893 = vrot.lane.b32.xlu1 %v1891_v5, %s5156_s2 }
0x14e7   :  { %v1975_v15 = vpop.f32.mrf.mxu1 }
0x14e8   :  { %v1976_v16 = vadd.f32 %v5015_v6, %v1975_v15 }
0x14e9   :  { %v4549_v17 = vpop.f32.mrf.mxu1 }
0x14ea   :  { %v1980_v19 = vrot.slane %v1976_v16, 2  ;;  %v4134_v16 = vld [vmem:[#allocation10] ss:$0 sm:$0xff] }
0x14ec   :  { %1989 = vrot.lane.b32.xlu1 %v1980_v19, %s5155_s1  ;;  %v1982_v23 = vadd.f32 %v1980_v19, %v5389_v25 }
0x14ee   :  { %v4130_v10 = vmul.f32 -1.442695, %v1982_v23 }
0x1505   :  { %v1894_v8 = vpop.permute.xlu1 %1893 }
0x1506   :  { %v1896_v20 = vadd.f32 %v1894_v8, %v1886_v14  ;;  %v5851_v14 = vld [vmem:[#allocation11] ss:$0 sm:$0xff] }
0x1508   :  { %4895 = vtanh.f32 %v1896_v20 }
0x1509   :  { %4897 = vpow2.f32 %v4130_v10 }
0x1515   :  { %v4896_v21 = vpop.eup %4895 }
0x1516   :  { %1899 = vrot.lane.b32.xlu0 %v4896_v21, %s5155_s1  ;;  %v4898_v24 = vpop.eup %4897 }
0x1517   :  { %v1986_v27 = vadd.f32 1.0, %v4898_v24 }
0x1519   :  { %4899 = vrcp.f32 %v1986_v27 }
0x151a   :  { %2045 = vrot.lane.b32.xlu0 %v5549_v22, %s5156_s2  ;;  %v2034_v22 = vld [vmem:[%s6201_s4 + $0x10] sm:$0xff] }
0x151b   :  { %4552 = vmatprep.subr.mxu0 %v2034_v22 }
0x151c   :  { %4553 = vmatpush3.msra.mxu0 %v2034_v22 }
0x151d   :  { %4554 = vmatprep.subr.mxu0 %v2033_v12 }
0x151e   :  { %4555 = vmatpush3.msra.mxu0 %v2033_v12 }
0x151f   :  { %4556 = vmatprep.subr.mxu0 %v2032_v13 }
0x1520   :  { %4557 = vmatpush3.msra.mxu0 %v2032_v13 }
0x1521   :  { %4572 = vmatprep.subr.mxu0 %v5153_v1 }
0x1526   :  { %v5722_v28 = vpop.eup %4899 }
0x1527   :  { %v1999_v46 = vsub.f32 1.0, %v5722_v28  ;;  %v2007_v50 = vmul.f32 %v5722_v28, %v2005_v48 }
0x155e   :  { %v1990_v11 = vpop.permute.xlu1 %1989 }
0x155f   :  { %v1992_v29 = vmul.f32 %v5722_v28, %v1990_v11 }
0x1561   :  { %1994 = vrot.lane.b32.xlu0 %v1992_v29, %s5155_s1 }
0x1565   :  { %2141 = vrot.lane.b32.xlu0 %v5573_v39, %s5157_s12 }
0x1588   :  { %v1900_v31 = vpop.permute.xlu0 %1899 }
0x1589   :  { %v1902_v39 = vmul.f32 %v4894_v3, %v1900_v31 }
0x158b   :  { %v2016_v32 = vsel %vm2012_vm5, %v5694_v45, %v1902_v39  ;;  %v2128_v45 = vld [vmem:[%s6208_s11] sm:$0xff] }
0x158c   :  { %2047 = vrot.lane.b32.xlu1 %v2016_v32, %s5156_s2  ;;  %v2046_v33 = vpop.permute.xlu0 %2045  ;;  %4567 = vmatprep.subr.mxu1 %v2128_v45 }
0x158d   :  { %4558 = vmatprep.mubr.msk.f32.mxu0 %vm327_vm3, %v2046_v33  ;;  %4568 = vmatpush3.msra.mxu1 %v2128_v45 }
0x158e   :  { %4583 = vmatprep.subr.mxu1 %v5153_v1 }
0x15d3   :  { %v1995_v36 = vpop.permute.xlu0 %1994 }
0x15d4   :  { %v1997_v37 = vadd.f32 %v1995_v36, %v5389_v25  ;;  %v5766_v25 = vld [vmem:[%s6202_s5 + $0x8] sm:$0xff] }
0x15d6   :  { %4901 = vtanh.f32 %v1997_v37 }
0x15d7   :  { %v2142_v34 = vpop.permute.xlu0 %2141 }
0x15d8   :  { %4569 = vmatprep.mubr.msk.f32.mxu1 %vm327_vm3, %v2142_v34 }
0x15e3   :  { %v4902_v47 = vpop.eup %4901 }
0x15e4   :  { %2001 = vrot.lane.b32.xlu1 %v4902_v47, %s5157_s12 }
0x15fe   :  { %v2048_v35 = vpop.permute.xlu1 %2047 }
0x15ff   :  { %4559 = vmatmul.mubr.msk.f32.vlgmr.msra.gmra.mxu0 %vm327_vm3, %v2048_v35 }
0x1600   :  { %4573 = vmatpush3.msra.mxu0 %v5751_v41  ;;  %4580 = vmatprep.mubr.msk.f32.mxu0 %vm5154_vm0, %v5153_v1 }
0x1601   :  { %4574 = vmatprep.subr.mxu0 %v5153_v1 }
0x1602   :  { %4575 = vmatpush3.msra.mxu0 %v5757_v38 }
0x1603   :  { %4576 = vmatprep.subr.mxu0 %v5153_v1 }
0x1604   :  { %4577 = vmatpush3.msra.mxu0 %v5766_v25 }
0x1605   :  { %4578 = vmatprep.subr.mxu0 %v5153_v1 }
0x1606   :  { %4579 = vmatpush3.msra.mxu0 %v5773_v40 }
0x1607   :  { %4581 = vmatmul.mubr.f32.vlgmr.msra.gmra.mxu0 %v5153_v1  ;;  %4594 = vmatprep.subr.mxu0 %v5153_v1 }
0x1608   :  { %4595 = vmatpush3.msra.mxu0 %v5751_v41  ;;  %4602 = vmatprep.mubr.msk.f32.mxu0 %vm5154_vm0, %v5153_v1 }
0x1609   :  { %4596 = vmatprep.subr.mxu0 %v5153_v1 }
0x160a   :  { %4597 = vmatpush3.msra.mxu0 %v5757_v38 }
0x160b   :  { %4598 = vmatprep.subr.mxu0 %v5153_v1 }
0x160c   :  { %4599 = vmatpush3.msra.mxu0 %v5766_v25 }
0x160d   :  { %4600 = vmatprep.subr.mxu0 %v5153_v1 }
0x160e   :  { %4601 = vmatpush3.msra.mxu0 %v5773_v40 }
0x160f   :  { %4616 = vmatprep.subr.mxu0 %v5153_v1 }
0x1656   :  { %v2002_v49 = vpop.permute.xlu1 %2001 }
0x1657   :  { %v2004_v52 = vmul.f32 %v2002_v49, %v1999_v46 }
0x1659   :  { %v2008_v53 = vadd.f32 %v2007_v50, %v2004_v52 }
0x165b   :  { %v2022_v9 = vsel %vm2012_vm5, %v5709_v51, %v2008_v53 }
0x165c   :  { %2143 = vrot.lane.b32.xlu1 %v2022_v9, %s5157_s12 }
0x16bf   :  { %v4560_v55 = vpop.f32.mrf.mxu0 }
0x16c0   :  { %v5812_v18 = vadd.f32 %v4560_v55, %v4131_v54 }
0x16c1   :  { %v2119_v59 = vpop.f32.mrf.mxu0 }
0x16c2   :  { %v5814_v57 = vadd.f32 %v4131_v54, %v2119_v59 }
0x16c7   :  { %v2290_v56 = vpop.f32.mrf.mxu0 }
0x16c8   :  { %v2294_v58 = vadd.f32 %v2290_v56, %v5814_v57 }
0x16c9   :  { %v4582_v60 = vpop.f32.mrf.mxu0 }
0x16ca   :  { %4903 = vtanh.f32 %v2294_v58  ;;  %v4137_v2 = vmul.f32 -1.442695, %v2294_v58 }
0x16cc   :  { %4905 = vpow2.f32 %v4137_v2 }
0x16ce   :  { %v2144_v51 = vpop.permute.xlu1 %2143 }
0x16cf   :  { %4570 = vmatmul.mubr.msk.f32.vlgmr.msra.gmra.mxu1 %vm327_vm3, %v2144_v51 }
0x16d0   :  { %4584 = vmatpush3.msra.mxu1 %v5817_v61  ;;  %4591 = vmatprep.mubr.msk.f32.mxu1 %vm5154_vm0, %v5153_v1 }
0x16d1   :  { %4585 = vmatprep.subr.mxu1 %v5153_v1 }
0x16d2   :  { %4586 = vmatpush3.msra.mxu1 %v5820_v62 }
0x16d3   :  { %4587 = vmatprep.subr.mxu1 %v5153_v1 }
0x16d4   :  { %4588 = vmatpush3.msra.mxu1 %v5826_v63 }
0x16d5   :  { %4589 = vmatprep.subr.mxu1 %v5153_v1 }
0x16d6   :  { %4590 = vmatpush3.msra.mxu1 %v5830_v26 }
0x16d7   :  { %4592 = vmatmul.mubr.f32.vlgmr.msra.gmra.mxu1 %v5153_v1  ;;  %4605 = vmatprep.subr.mxu1 %v5153_v1  ;;  %v4904_v0 = vpop.eup %4903 }
0x16d8   :  { %4606 = vmatpush3.msra.mxu1 %v5817_v61  ;;  %4613 = vmatprep.mubr.msk.f32.mxu1 %vm5154_vm0, %v5153_v1 }
0x16d9   :  { %2304 = vrot.lane.b32.xlu0 %v4904_v0, %s5155_s1  ;;  %4607 = vmatprep.subr.mxu1 %v5153_v1  ;;  %v4906_v3 = vpop.eup %4905 }
0x16da   :  { %4608 = vmatpush3.msra.mxu1 %v5820_v62  ;;  %v2298_v4 = vadd.f32 1.0, %v4906_v3 }
0x16db   :  { %4609 = vmatprep.subr.mxu1 %v5153_v1 }
0x16dc   :  { %4610 = vmatpush3.msra.mxu1 %v5826_v63  ;;  %4907 = vrcp.f32 %v2298_v4 }
0x16dd   :  { %4611 = vmatprep.subr.mxu1 %v5153_v1 }
0x16de   :  { %4612 = vmatpush3.msra.mxu1 %v5830_v26 }
0x16df   :  { %4627 = vmatprep.subr.mxu1 %v5153_v1 }
0x16e9   :  { %v4908_v5 = vpop.eup %4907 }
0x16ea   :  { %v2302_v23 = vmul.f32 0.0, %v4908_v5 }
0x174b   :  { %v2305_v15 = vpop.permute.xlu0 %2304 }
0x174c   :  { %v2307_v6 = vmul.f32 %v4908_v5, %v2305_v15 }
0x174e   :  { %2309 = vrot.lane.b32.xlu1 %v2307_v6, %s5156_s2 }
0x178f   :  { %v4571_v17 = vpop.f32.mrf.mxu1 }
0x1790   :  { %v5849_v19 = vadd.f32 %v4571_v17, %v4134_v16 }
0x1791   :  { %v2215_v7 = vpop.f32.mrf.mxu1 }
0x1792   :  { %v5859_v28 = vadd.f32 %v4134_v16, %v2215_v7 }
0x1797   :  { %v2391_v8 = vpop.f32.mrf.mxu1 }
0x1798   :  { %v2392_v20 = vadd.f32 %v5851_v14, %v2391_v8 }
0x1799   :  { %v4593_v21 = vpop.f32.mrf.mxu1 }
0x179a   :  { %2403 = vrot.lane.b32.xlu1 %v2392_v20, %s5155_s1  ;;  %v2395_v11 = vadd.f32 %v2392_v20, %v5859_v28 }
0x179c   :  { %v4139_v29 = vmul.f32 -1.442695, %v2395_v11 }
0x17c0   :  { %v2310_v10 = vpop.permute.xlu1 %2309 }
0x17c1   :  { %v5855_v24 = vadd.f32 %v2310_v10, %v2302_v23 }
0x17c3   :  { %4909 = vtanh.f32 %v5855_v24  ;;  %v2508_v2 = vrot.slane %v5855_v24, 6 }
0x17c4   :  { %4911 = vpow2.f32 %v4139_v29 }
0x17d0   :  { %v4910_v27 = vpop.eup %4909 }
0x17d1   :  { %2315 = vrot.lane.b32.xlu0 %v4910_v27, %s5155_s1  ;;  %v4912_v30 = vpop.eup %4911 }
0x17d2   :  { %v2399_v22 = vadd.f32 1.0, %v4912_v30 }
0x17d4   :  { %4913 = vrcp.f32 %v2399_v22 }
0x17e1   :  { %v4914_v12 = vpop.eup %4913 }
0x17e2   :  { %v2413_v47 = vsub.f32 1.0, %v4914_v12  ;;  %v2419_v42 = vmul.f32 0.0, %v4914_v12 }
0x180c   :  { %v2404_v13 = vpop.permute.xlu1 %2403 }
0x180d   :  { %v2406_v31 = vmul.f32 %v4914_v12, %v2404_v13 }
0x180f   :  { %2408 = vrot.lane.b32.xlu1 %v2406_v31, %s5155_s1 }
0x1843   :  { %v2316_v39 = vpop.permute.xlu0 %2315 }
0x1844   :  { %v2318_v32 = vmul.f32 %v4908_v5, %v2316_v39 }
0x1846   :  { %2422 = vrot.lane.b32.xlu0 %v2318_v32, %s5156_s2 }
0x1881   :  { %v2409_v33 = vpop.permute.xlu1 %2408 }
0x1882   :  { %v2411_v36 = vadd.f32 %v2409_v33, %v5859_v28 }
0x1884   :  { %4915 = vtanh.f32 %v2411_v36 }
0x1891   :  { %v4916_v37 = vpop.eup %4915 }
0x1892   :  { %2415 = vrot.lane.b32.xlu0 %v4916_v37, %s5157_s12 }
0x18b8   :  { %v2423_v34 = vpop.permute.xlu0 %2422 }
0x18b9   :  { %4603 = vmatmul.mubr.msk.f32.vlgmr.msra.gmra.mxu0 %vm327_vm3, %v2423_v34 }
0x18ba   :  { %4617 = vmatpush3.msra.mxu0 %v5751_v41  ;;  %4624 = vmatprep.mubr.msk.f32.mxu0 %vm5154_vm0, %v5153_v1 }
0x18bb   :  { %4618 = vmatprep.subr.mxu0 %v5153_v1 }
0x18bc   :  { %4619 = vmatpush3.msra.mxu0 %v5757_v38 }
0x18bd   :  { %4620 = vmatprep.subr.mxu0 %v5153_v1 }
0x18be   :  { %4621 = vmatpush3.msra.mxu0 %v5766_v25 }
0x18bf   :  { %4622 = vmatprep.subr.mxu0 %v5153_v1 }
0x18c0   :  { %4623 = vmatpush3.msra.mxu0 %v5773_v40 }
0x18c1   :  { %4638 = vmatprep.subr.mxu0 %v5153_v1 }
0x1904   :  { %v2416_v35 = vpop.permute.xlu0 %2415 }
0x1905   :  { %v2418_v43 = vmul.f32 %v2416_v35, %v2413_v47 }
0x1907   :  { %v5877_v44 = vadd.f32 %v2419_v42, %v2418_v43 }
0x1909   :  { %2528 = vrot.lane.b32.xlu1 %v5877_v44, %s5157_s12  ;;  %v2628_v22 = vrot.slane %v5877_v44, 6 }
0x1979   :  { %v2492_v45 = vpop.f32.mrf.mxu0 }
0x197a   :  { %v2497_v46 = vrot.slane %v2492_v45, 6 }
0x197b   :  { %v4604_v48 = vpop.f32.mrf.mxu0  ;;  %v2529_v49 = vpop.permute.xlu1 %2528 }
0x197c   :  { %v2499_v50 = vadd.f32 %v2497_v46, %v5814_v57  ;;  %4614 = vmatmul.mubr.msk.f32.vlgmr.msra.gmra.mxu1 %vm327_vm3, %v2529_v49 }
0x197d   :  { %4628 = vmatpush3.msra.mxu1 %v5817_v61  ;;  %4635 = vmatprep.mubr.msk.f32.mxu1 %vm5154_vm0, %v5153_v1 }
0x197e   :  { %4917 = vtanh.f32 %v2499_v50  ;;  %4629 = vmatprep.subr.mxu1 %v5153_v1  ;;  %v4141_v53 = vmul.f32 -1.442695, %v2499_v50 }
0x197f   :  { %4630 = vmatpush3.msra.mxu1 %v5820_v62 }
0x1980   :  { %4631 = vmatprep.subr.mxu1 %v5153_v1  ;;  %4919 = vpow2.f32 %v4141_v53 }
0x1981   :  { %4632 = vmatpush3.msra.mxu1 %v5826_v63 }
0x1982   :  { %4633 = vmatprep.subr.mxu1 %v5153_v1 }
0x1983   :  { %4634 = vmatpush3.msra.mxu1 %v5830_v26 }
0x1984   :  { %4649 = vmatprep.subr.mxu1 %v5153_v1 }
0x198b   :  { %v4918_v52 = vpop.eup %4917 }
0x198c   :  { %2512 = vrot.lane.b32.xlu0 %v4918_v52, %s5155_s1 }
0x198d   :  { %v4920_v9 = vpop.eup %4919 }
0x198e   :  { %v2503_v54 = vadd.f32 1.0, %v4920_v9 }
0x1990   :  { %4921 = vrcp.f32 %v2503_v54 }
0x199d   :  { %v4922_v55 = vpop.eup %4921 }
0x199e   :  { %v2510_v3 = vmul.f32 %v4922_v55, %v2508_v2 }
0x19fe   :  { %v2513_v59 = vpop.permute.xlu0 %2512 }
0x19ff   :  { %v2515_v56 = vmul.f32 %v4922_v55, %v2513_v59 }
0x1a01   :  { %2517 = vrot.lane.b32.xlu1 %v2515_v56, %s5156_s2 }
0x1a3c   :  { %v2598_v58 = vpop.f32.mrf.mxu1 }
0x1a3d   :  { %v2599_v60 = vadd.f32 %v5851_v14, %v2598_v58 }
0x1a3e   :  { %v4615_v51 = vpop.f32.mrf.mxu1 }
0x1a3f   :  { %v2603_v0 = vrot.slane %v2599_v60, 6 }
0x1a41   :  { %2612 = vrot.lane.b32.xlu0 %v2603_v0, %s5155_s1  ;;  %v2605_v6 = vadd.f32 %v2603_v0, %v5859_v28 }
0x1a43   :  { %v4143_v16 = vmul.f32 -1.442695, %v2605_v6 }
0x1a73   :  { %v2518_v4 = vpop.permute.xlu1 %2517 }
0x1a74   :  { %v5898_v5 = vadd.f32 %v2518_v4, %v2510_v3 }
0x1a76   :  { %4923 = vtanh.f32 %v5898_v5  ;;  %v2720_v54 = vrot.slane %v5898_v5, 6 }
0x1a77   :  { %4925 = vpow2.f32 %v4143_v16 }
0x1a83   :  { %v4924_v15 = vpop.eup %4923 }
0x1a84   :  { %2523 = vrot.lane.b32.xlu1 %v4924_v15, %s5155_s1  ;;  %v4926_v17 = vpop.eup %4925 }
0x1a85   :  { %v2609_v7 = vadd.f32 1.0, %v4926_v17 }
0x1a87   :  { %4927 = vrcp.f32 %v2609_v7 }
0x1a94   :  { %v4928_v8 = vpop.eup %4927 }
0x1a95   :  { %v2622_v12 = vsub.f32 1.0, %v4928_v8  ;;  %v2630_v31 = vmul.f32 %v4928_v8, %v2628_v22 }
0x1ab3   :  { %v2613_v20 = vpop.permute.xlu0 %2612 }
0x1ab4   :  { %v2615_v21 = vmul.f32 %v4928_v8, %v2613_v20 }
0x1ab6   :  { %2617 = vrot.lane.b32.xlu0 %v2615_v21, %s5155_s1 }
0x1af6   :  { %v2524_v23 = vpop.permute.xlu1 %2523 }
0x1af7   :  { %v2526_v10 = vmul.f32 %v4922_v55, %v2524_v23 }
0x1af9   :  { %v2633_v24 = vrot.slane %v2526_v10, 2 }
0x1afb   :  { %2634 = vrot.lane.b32.xlu1 %v2633_v24, %s5156_s2 }
0x1b28   :  { %v2618_v27 = vpop.permute.xlu0 %2617 }
0x1b29   :  { %v2620_v11 = vadd.f32 %v2618_v27, %v5859_v28 }
0x1b2b   :  { %4929 = vtanh.f32 %v2620_v11 }
0x1b38   :  { %v4930_v29 = vpop.eup %4929 }
0x1b39   :  { %2624 = vrot.lane.b32.xlu0 %v4930_v29, %s5157_s12 }
0x1b6d   :  { %v2635_v30 = vpop.permute.xlu1 %2634 }
0x1b6e   :  { %4625 = vmatmul.mubr.msk.f32.vlgmr.msra.gmra.mxu0 %vm327_vm3, %v2635_v30 }
0x1b6f   :  { %4639 = vmatpush3.msra.mxu0 %v5751_v41  ;;  %4646 = vmatprep.mubr.msk.f32.mxu0 %vm5154_vm0, %v5153_v1 }
0x1b70   :  { %4640 = vmatprep.subr.mxu0 %v5153_v1 }
0x1b71   :  { %4641 = vmatpush3.msra.mxu0 %v5757_v38 }
0x1b72   :  { %4642 = vmatprep.subr.mxu0 %v5153_v1 }
0x1b73   :  { %4643 = vmatpush3.msra.mxu0 %v5766_v25 }
0x1b74   :  { %4644 = vmatprep.subr.mxu0 %v5153_v1 }
0x1b75   :  { %4645 = vmatpush3.msra.mxu0 %v5773_v40 }
0x1b76   :  { %4660 = vmatprep.subr.mxu0 %v5153_v1 }
0x1bab   :  { %v2625_v13 = vpop.permute.xlu0 %2624 }
0x1bac   :  { %v2627_v39 = vmul.f32 %v2625_v13, %v2622_v12 }
0x1bae   :  { %v5919_v32 = vadd.f32 %v2630_v31, %v2627_v39 }
0x1bb0   :  { %v2740_v33 = vrot.slane %v5919_v32, 2  ;;  %v2841_v21 = vrot.slane %v5919_v32, 6 }
0x1bb2   :  { %2741 = vrot.lane.b32.xlu1 %v2740_v33, %s5157_s12 }
0x1c24   :  { %v2742_v36 = vpop.permute.xlu1 %2741 }
0x1c25   :  { %4636 = vmatmul.mubr.msk.f32.vlgmr.msra.gmra.mxu1 %vm327_vm3, %v2742_v36 }
0x1c26   :  { %4650 = vmatpush3.msra.mxu1 %v5817_v61  ;;  %4657 = vmatprep.mubr.msk.f32.mxu1 %vm5154_vm0, %v5153_v1 }
0x1c27   :  { %4651 = vmatprep.subr.mxu1 %v5153_v1 }
0x1c28   :  { %4652 = vmatpush3.msra.mxu1 %v5820_v62 }
0x1c29   :  { %4653 = vmatprep.subr.mxu1 %v5153_v1 }
0x1c2a   :  { %4654 = vmatpush3.msra.mxu1 %v5826_v63 }
0x1c2b   :  { %4655 = vmatprep.subr.mxu1 %v5153_v1 }
0x1c2c   :  { %4656 = vmatpush3.msra.mxu1 %v5830_v26 }
0x1c2d   :  { %4671 = vmatprep.subr.mxu1 %v5153_v1 }
0x1c2e   :  { %v2704_v37 = vpop.f32.mrf.mxu0 }
0x1c2f   :  { %v2709_v34 = vrot.slane %v2704_v37, 4 }
0x1c30   :  { %v4626_v47 = vpop.f32.mrf.mxu0 }
0x1c31   :  { %v2711_v35 = vadd.f32 %v2709_v34, %v5814_v57 }
0x1c33   :  { %4931 = vtanh.f32 %v2711_v35  ;;  %v4145_v43 = vmul.f32 -1.442695, %v2711_v35 }
0x1c35   :  { %4933 = vpow2.f32 %v4145_v43 }
0x1c40   :  { %v4932_v42 = vpop.eup %4931 }
0x1c41   :  { %2724 = vrot.lane.b32.xlu0 %v4932_v42, %s5155_s1 }
0x1c42   :  { %v4934_v44 = vpop.eup %4933 }
0x1c43   :  { %v2715_v45 = vadd.f32 1.0, %v4934_v44 }
0x1c45   :  { %4935 = vrcp.f32 %v2715_v45 }
0x1c52   :  { %v4936_v46 = vpop.eup %4935 }
0x1c53   :  { %v2722_v55 = vmul.f32 %v4936_v46, %v2720_v54 }
0x1cb3   :  { %v2725_v48 = vpop.permute.xlu0 %2724 }
0x1cb4   :  { %v2727_v49 = vmul.f32 %v4936_v46, %v2725_v48 }
0x1cb6   :  { %2729 = vrot.lane.b32.xlu1 %v2727_v49, %s5156_s2 }
0x1ce5   :  { %v2811_v50 = vpop.f32.mrf.mxu1 }
0x1ce6   :  { %v2812_v52 = vadd.f32 %v5851_v14, %v2811_v50 }
0x1ce7   :  { %v4637_v53 = vpop.f32.mrf.mxu1 }
0x1ce8   :  { %v2816_v9 = vrot.slane %v2812_v52, 4 }
0x1cea   :  { %2825 = vrot.lane.b32.xlu0 %v2816_v9, %s5155_s1  ;;  %v2818_v58 = vadd.f32 %v2816_v9, %v5859_v28 }
0x1cec   :  { %v4147_v60 = vmul.f32 -1.442695, %v2818_v58 }
0x1d28   :  { %v2730_v59 = vpop.permute.xlu1 %2729 }
0x1d29   :  { %v5940_v56 = vadd.f32 %v2730_v59, %v2722_v55 }
0x1d2b   :  { %4937 = vtanh.f32 %v5940_v56 }
0x1d2c   :  { %4939 = vpow2.f32 %v4147_v60 }
0x1d38   :  { %v4938_v51 = vpop.eup %4937 }
0x1d39   :  { %2735 = vrot.lane.b32.xlu1 %v4938_v51, %s5155_s1  ;;  %v4940_v0 = vpop.eup %4939 }
0x1d3a   :  { %v2822_v2 = vadd.f32 1.0, %v4940_v0 }
0x1d3c   :  { %4941 = vrcp.f32 %v2822_v2 }
0x1d49   :  { %v4942_v3 = vpop.eup %4941 }
0x1d4a   :  { %v2835_v23 = vsub.f32 1.0, %v4942_v3  ;;  %v2843_v24 = vmul.f32 %v4942_v3, %v2841_v21 }
0x1d5c   :  { %v2826_v4 = vpop.permute.xlu0 %2825 }
0x1d5d   :  { %v2828_v15 = vmul.f32 %v4942_v3, %v2826_v4 }
0x1d5f   :  { %2830 = vrot.lane.b32.xlu0 %v2828_v15, %s5155_s1 }
0x1dab   :  { %v2736_v5 = vpop.permute.xlu1 %2735 }
0x1dac   :  { %v2738_v6 = vmul.f32 %v4936_v46, %v2736_v5 }
0x1dae   :  { %v2846_v16 = vrot.slane %v2738_v6, 4 }
0x1db0   :  { %2847 = vrot.lane.b32.xlu1 %v2846_v16, %s5156_s2 }
0x1dd1   :  { %v2831_v17 = vpop.permute.xlu0 %2830 }
0x1dd2   :  { %v2833_v7 = vadd.f32 %v2831_v17, %v5859_v28 }
0x1dd4   :  { %4943 = vtanh.f32 %v2833_v7 }
0x1de1   :  { %v4944_v8 = vpop.eup %4943 }
0x1de2   :  { %2837 = vrot.lane.b32.xlu0 %v4944_v8, %s5157_s12 }
0x1e22   :  { %v2848_v20 = vpop.permute.xlu1 %2847 }
0x1e23   :  { %4647 = vmatmul.mubr.msk.f32.vlgmr.msra.gmra.mxu0 %vm327_vm3, %v2848_v20 }
0x1e24   :  { %4661 = vmatpush3.msra.mxu0 %v5751_v41  ;;  %4668 = vmatprep.mubr.msk.f32.mxu0 %vm5154_vm0, %v5153_v1 }
0x1e25   :  { %4662 = vmatprep.subr.mxu0 %v5153_v1 }
0x1e26   :  { %4663 = vmatpush3.msra.mxu0 %v5757_v38 }
0x1e27   :  { %4664 = vmatprep.subr.mxu0 %v5153_v1 }
0x1e28   :  { %4665 = vmatpush3.msra.mxu0 %v5766_v25 }
0x1e29   :  { %4666 = vmatprep.subr.mxu0 %v5153_v1 }
0x1e2a   :  { %4667 = vmatpush3.msra.mxu0 %v5773_v40 }
0x1e2b   :  { %4682 = vmatprep.subr.mxu0 %v5153_v1 }
0x1e54   :  { %v2838_v10 = vpop.permute.xlu0 %2837 }
0x1e55   :  { %v2840_v27 = vmul.f32 %v2838_v10, %v2835_v23 }
0x1e57   :  { %v5961_v11 = vadd.f32 %v2843_v24, %v2840_v27 }
0x1e59   :  { %v2953_v29 = vrot.slane %v5961_v11, 4 }
0x1e5b   :  { %2954 = vrot.lane.b32.xlu1 %v2953_v29, %s5157_s12 }
0x1ecd   :  { %v2955_v30 = vpop.permute.xlu1 %2954 }
0x1ece   :  { %4658 = vmatmul.mubr.msk.f32.vlgmr.msra.gmra.mxu1 %vm327_vm3, %v2955_v30 }
0x1ecf   :  { %4672 = vmatpush3.msra.mxu1 %v5817_v61  ;;  %4679 = vmatprep.mubr.msk.f32.mxu1 %vm5154_vm0, %v5153_v1 }
0x1ed0   :  { %4673 = vmatprep.subr.mxu1 %v5153_v1 }
0x1ed1   :  { %4674 = vmatpush3.msra.mxu1 %v5820_v62 }
0x1ed2   :  { %4675 = vmatprep.subr.mxu1 %v5153_v1 }
0x1ed3   :  { %4676 = vmatpush3.msra.mxu1 %v5826_v63 }
0x1ed4   :  { %4677 = vmatprep.subr.mxu1 %v5153_v1 }
0x1ed5   :  { %4678 = vmatpush3.msra.mxu1 %v5830_v26 }
0x1ed6   :  { %4693 = vmatprep.subr.mxu1 %v5153_v1 }
0x1ee3   :  { %v2917_v22 = vpop.f32.mrf.mxu0 }
0x1ee4   :  { %v2922_v12 = vrot.slane %v2917_v22, 2 }
0x1ee5   :  { %v4648_v13 = vpop.f32.mrf.mxu0 }
0x1ee6   :  { %v2924_v31 = vadd.f32 %v2922_v12, %v5814_v57  ;;  %v2933_v57 = vrot.slane %v5940_v56, 6 }
0x1ee8   :  { %4945 = vtanh.f32 %v2924_v31  ;;  %v4149_v32 = vmul.f32 -1.442695, %v2924_v31 }
0x1eea   :  { %4947 = vpow2.f32 %v4149_v32 }
0x1ef5   :  { %v4946_v39 = vpop.eup %4945 }
0x1ef6   :  { %2937 = vrot.lane.b32.xlu0 %v4946_v39, %s5155_s1 }
0x1ef7   :  { %v4948_v33 = vpop.eup %4947 }
0x1ef8   :  { %v2928_v36 = vadd.f32 1.0, %v4948_v33 }
0x1efa   :  { %4949 = vrcp.f32 %v2928_v36 }
0x1f07   :  { %v4950_v37 = vpop.eup %4949 }
0x1f08   :  { %v2935_v46 = vmul.f32 %v4950_v37, %v2933_v57 }
0x1f68   :  { %v2938_v34 = vpop.permute.xlu0 %2937 }
0x1f69   :  { %v2940_v47 = vmul.f32 %v4950_v37, %v2938_v34 }
0x1f6b   :  { %2942 = vrot.lane.b32.xlu1 %v2940_v47, %s5156_s2 }
0x1f8e   :  { %v3024_v35 = vpop.f32.mrf.mxu1 }
0x1f8f   :  { %v3025_v42 = vadd.f32 %v5851_v14, %v3024_v35 }
0x1f90   :  { %v4659_v43 = vpop.f32.mrf.mxu1 }
0x1f91   :  { %v3029_v44 = vrot.slane %v3025_v42, 2 }
0x1f93   :  { %3038 = vrot.lane.b32.xlu0 %v3029_v44, %s5155_s1  ;;  %v3031_v45 = vadd.f32 %v3029_v44, %v5859_v28 }
0x1f95   :  { %v4151_v50 = vmul.f32 -1.442695, %v3031_v45 }
0x1fdd   :  { %v2943_v48 = vpop.permute.xlu1 %2942 }
0x1fde   :  { %v5983_v49 = vadd.f32 %v2943_v48, %v2935_v46 }
0x1fe0   :  { %4951 = vtanh.f32 %v5983_v49  ;;  %v3143_v32 = vrot.slane %v5983_v49, 6 }
0x1fe1   :  { %4953 = vpow2.f32 %v4151_v50 }
0x1fed   :  { %v4952_v52 = vpop.eup %4951 }
0x1fee   :  { %2948 = vrot.lane.b32.xlu1 %v4952_v52, %s5155_s1  ;;  %v4954_v53 = vpop.eup %4953 }
0x1fef   :  { %v3035_v9 = vadd.f32 1.0, %v4954_v53 }
0x1ff1   :  { %4955 = vrcp.f32 %v3035_v9 }
0x1ffe   :  { %v4956_v54 = vpop.eup %4955 }
0x1fff   :  { %v3048_v4 = vsub.f32 1.0, %v4956_v54 }
0x2005   :  { %v3039_v55 = vpop.permute.xlu0 %3038 }
0x2006   :  { %v3041_v59 = vmul.f32 %v4956_v54, %v3039_v55 }
0x2008   :  { %3043 = vrot.lane.b32.xlu0 %v3041_v59, %s5155_s1 }
0x2060   :  { %v2949_v56 = vpop.permute.xlu1 %2948 }
0x2061   :  { %v2951_v58 = vmul.f32 %v4950_v37, %v2949_v56 }
0x2063   :  { %v3059_v60 = vrot.slane %v2951_v58, 6 }
0x2065   :  { %3060 = vrot.lane.b32.xlu1 %v3059_v60, %s5156_s2 }
0x207a   :  { %v3044_v51 = vpop.permute.xlu0 %3043 }
0x207b   :  { %v3046_v0 = vadd.f32 %v3044_v51, %v5859_v28  ;;  %v3054_v28 = vrot.slane %v5961_v11, 6 }
0x207d   :  { %4957 = vtanh.f32 %v3046_v0  ;;  %v3056_v5 = vmul.f32 %v4956_v54, %v3054_v28 }
0x208a   :  { %v4958_v2 = vpop.eup %4957 }
0x208b   :  { %3050 = vrot.lane.b32.xlu0 %v4958_v2, %s5157_s12 }
0x20d7   :  { %v3061_v3 = vpop.permute.xlu1 %3060 }
0x20d8   :  { %4669 = vmatmul.mubr.msk.f32.vlgmr.msra.gmra.mxu0 %vm327_vm3, %v3061_v3 }
0x20d9   :  { %4683 = vmatpush3.msra.mxu0 %v5751_v41  ;;  %4690 = vmatprep.mubr.msk.f32.mxu0 %vm5154_vm0, %v5153_v1 }
0x20da   :  { %4684 = vmatprep.subr.mxu0 %v5153_v1 }
0x20db   :  { %4685 = vmatpush3.msra.mxu0 %v5757_v38 }
0x20dc   :  { %4686 = vmatprep.subr.mxu0 %v5153_v1 }
0x20dd   :  { %4687 = vmatpush3.msra.mxu0 %v5766_v25 }
0x20de   :  { %4688 = vmatprep.subr.mxu0 %v5153_v1 }
0x20df   :  { %4689 = vmatpush3.msra.mxu0 %v5773_v40 }
0x20e0   :  { %4704 = vmatprep.subr.mxu0 %v5153_v1 }
0x20fd   :  { %v3051_v15 = vpop.permute.xlu0 %3050 }
0x20fe   :  { %v3053_v6 = vmul.f32 %v3051_v15, %v3048_v4 }
0x2100   :  { %v6003_v16 = vadd.f32 %v3056_v5, %v3053_v6 }
0x2102   :  { %v3163_v17 = vrot.slane %v6003_v16, 6 }
0x2104   :  { %3164 = vrot.lane.b32.xlu1 %v3163_v17, %s5157_s12 }
0x2176   :  { %v3165_v7 = vpop.permute.xlu1 %3164 }
0x2177   :  { %4680 = vmatmul.mubr.msk.f32.vlgmr.msra.gmra.mxu1 %vm327_vm3, %v3165_v7 }
0x2178   :  { %4694 = vmatpush3.msra.mxu1 %v5817_v61  ;;  %4701 = vmatprep.mubr.msk.f32.mxu1 %vm5154_vm0, %v5153_v1 }
0x2179   :  { %4695 = vmatprep.subr.mxu1 %v5153_v1 }
0x217a   :  { %4696 = vmatpush3.msra.mxu1 %v5820_v62 }
0x217b   :  { %4697 = vmatprep.subr.mxu1 %v5153_v1 }
0x217c   :  { %4698 = vmatpush3.msra.mxu1 %v5826_v63 }
0x217d   :  { %4699 = vmatprep.subr.mxu1 %v5153_v1 }
0x217e   :  { %4700 = vmatpush3.msra.mxu1 %v5830_v26 }
0x217f   :  { %4715 = vmatprep.subr.mxu1 %v5153_v1 }
0x2198   :  { %v3130_v8 = vpop.f32.mrf.mxu0 }
0x2199   :  { %v3134_v20 = vadd.f32 %v3130_v8, %v5812_v18 }
0x219a   :  { %v4670_v21 = vpop.f32.mrf.mxu0 }
0x219b   :  { %4959 = vtanh.f32 %v3134_v20  ;;  %v4153_v10 = vmul.f32 -1.442695, %v3134_v20 }
0x219d   :  { %4961 = vpow2.f32 %v4153_v10 }
0x21a8   :  { %v4960_v23 = vpop.eup %4959 }
0x21a9   :  { %3147 = vrot.lane.b32.xlu0 %v4960_v23, %s5155_s1 }
0x21aa   :  { %v4962_v24 = vpop.eup %4961 }
0x21ab   :  { %v3138_v27 = vadd.f32 1.0, %v4962_v24 }
0x21ad   :  { %4963 = vrcp.f32 %v3138_v27 }
0x21ba   :  { %v4964_v11 = vpop.eup %4963 }
0x21bb   :  { %v3145_v33 = vmul.f32 %v4964_v11, %v3143_v32 }
0x221b   :  { %v3148_v29 = vpop.permute.xlu0 %3147 }
0x221c   :  { %v3150_v30 = vmul.f32 %v4964_v11, %v3148_v29 }
0x221e   :  { %3152 = vrot.lane.b32.xlu1 %v3150_v30, %s5156_s2 }
0x2237   :  { %v3234_v22 = vpop.f32.mrf.mxu1 }
0x2238   :  { %v3235_v12 = vadd.f32 %v5851_v14, %v3234_v22 }
0x2239   :  { %v4681_v13 = vpop.f32.mrf.mxu1 }
0x223a   :  { %3246 = vrot.lane.b32.xlu0 %v3235_v12, %s5155_s1  ;;  %v3238_v31 = vadd.f32 %v3235_v12, %v5849_v19 }
0x223c   :  { %v4155_v39 = vmul.f32 -1.442695, %v3238_v31 }
0x223e   :  { %4965 = vpow2.f32 %v4155_v39 }
0x224b   :  { %v4966_v34 = vpop.eup %4965 }
0x224c   :  { %v3242_v47 = vadd.f32 1.0, %v4966_v34 }
0x2290   :  { %v3153_v36 = vpop.permute.xlu1 %3152 }
0x2291   :  { %v6027_v37 = vadd.f32 %v3153_v36, %v3145_v33 }
0x2293   :  { %4967 = vtanh.f32 %v6027_v37  ;;  %v3352_v23 = vrot.slane %v6027_v37, 6 }
0x2294   :  { %4969 = vrcp.f32 %v3242_v47 }
0x22a0   :  { %v4968_v35 = vpop.eup %4967 }
0x22a1   :  { %3158 = vrot.lane.b32.xlu1 %v4968_v35, %s5155_s1  ;;  %v4970_v42 = vpop.eup %4969 }
0x22a2   :  { %v3256_v52 = vsub.f32 1.0, %v4970_v42  ;;  %v3263_v9 = vmul.f32 %v4970_v42, %v3163_v17 }
0x22ac   :  { %v3247_v43 = vpop.permute.xlu0 %3246 }
0x22ad   :  { %v3249_v44 = vmul.f32 %v4970_v42, %v3247_v43 }
0x22af   :  { %3251 = vrot.lane.b32.xlu0 %v3249_v44, %s5155_s1 }
0x2313   :  { %v3159_v57 = vpop.permute.xlu1 %3158 }
0x2314   :  { %v3161_v45 = vmul.f32 %v4964_v11, %v3159_v57 }
0x2316   :  { %3266 = vrot.lane.b32.xlu1 %v3161_v45, %s5156_s2 }
0x2321   :  { %v3252_v46 = vpop.permute.xlu0 %3251 }
0x2322   :  { %v3254_v48 = vadd.f32 %v3252_v46, %v5849_v19 }
0x2324   :  { %4971 = vtanh.f32 %v3254_v48 }
0x2331   :  { %v4972_v49 = vpop.eup %4971 }
0x2332   :  { %3258 = vrot.lane.b32.xlu0 %v4972_v49, %s5157_s12 }
0x2388   :  { %v3267_v50 = vpop.permute.xlu1 %3266 }
0x2389   :  { %4691 = vmatmul.mubr.msk.f32.vlgmr.msra.gmra.mxu0 %vm327_vm3, %v3267_v50 }
0x238a   :  { %4705 = vmatpush3.msra.mxu0 %v5751_v41  ;;  %4712 = vmatprep.mubr.msk.f32.mxu0 %vm5154_vm0, %v5153_v1 }
0x238b   :  { %4706 = vmatprep.subr.mxu0 %v5153_v1 }
0x238c   :  { %4707 = vmatpush3.msra.mxu0 %v5757_v38 }
0x238d   :  { %4708 = vmatprep.subr.mxu0 %v5153_v1 }
0x238e   :  { %4709 = vmatpush3.msra.mxu0 %v5766_v25 }
0x238f   :  { %4710 = vmatprep.subr.mxu0 %v5153_v1 }
0x2390   :  { %4711 = vmatpush3.msra.mxu0 %v5773_v40 }
0x2391   :  { %4726 = vmatprep.subr.mxu0 %v5153_v1 }
0x23a4   :  { %v3259_v53 = vpop.permute.xlu0 %3258 }
0x23a5   :  { %v3261_v54 = vmul.f32 %v3259_v53, %v3256_v52 }
0x23a7   :  { %v6048_v55 = vadd.f32 %v3263_v9, %v3261_v54 }
0x23a9   :  { %3372 = vrot.lane.b32.xlu1 %v6048_v55, %s5157_s12  ;;  %v3472_v34 = vrot.slane %v6048_v55, 6 }
0x241b   :  { %v3373_v59 = vpop.permute.xlu1 %3372 }
0x241c   :  { %4702 = vmatmul.mubr.msk.f32.vlgmr.msra.gmra.mxu1 %vm327_vm3, %v3373_v59 }
0x241d   :  { %4716 = vmatpush3.msra.mxu1 %v5817_v61  ;;  %4723 = vmatprep.mubr.msk.f32.mxu1 %vm5154_vm0, %v5153_v1 }
0x241e   :  { %4717 = vmatprep.subr.mxu1 %v5153_v1 }
0x241f   :  { %4718 = vmatpush3.msra.mxu1 %v5820_v62 }
0x2420   :  { %4719 = vmatprep.subr.mxu1 %v5153_v1 }
0x2421   :  { %4720 = vmatpush3.msra.mxu1 %v5826_v63 }
0x2422   :  { %4721 = vmatprep.subr.mxu1 %v5153_v1 }
0x2423   :  { %4722 = vmatpush3.msra.mxu1 %v5830_v26 }
0x2424   :  { %4737 = vmatprep.subr.mxu1 %v5153_v1 }
0x2449   :  { %v3336_v56 = vpop.f32.mrf.mxu0 }
0x244a   :  { %v3341_v58 = vrot.slane %v3336_v56, 6 }
0x244b   :  { %v4692_v60 = vpop.f32.mrf.mxu0 }
0x244c   :  { %v3343_v51 = vadd.f32 %v3341_v58, %v5812_v18 }
0x244e   :  { %4973 = vtanh.f32 %v3343_v51  ;;  %v4157_v2 = vmul.f32 -1.442695, %v3343_v51 }
0x2450   :  { %4975 = vpow2.f32 %v4157_v2 }
0x245b   :  { %v4974_v0 = vpop.eup %4973 }
0x245c   :  { %3356 = vrot.lane.b32.xlu0 %v4974_v0, %s5155_s1 }
0x245d   :  { %v4976_v3 = vpop.eup %4975 }
0x245e   :  { %v3347_v28 = vadd.f32 1.0, %v4976_v3 }
0x2460   :  { %4977 = vrcp.f32 %v3347_v28 }
0x246d   :  { %v4978_v4 = vpop.eup %4977 }
0x246e   :  { %v3354_v24 = vmul.f32 %v4978_v4, %v3352_v23 }
0x24ce   :  { %v3357_v15 = vpop.permute.xlu0 %3356 }
0x24cf   :  { %v3359_v5 = vmul.f32 %v4978_v4, %v3357_v15 }
0x24d1   :  { %3361 = vrot.lane.b32.xlu1 %v3359_v5, %s5156_s2 }
0x24dc   :  { %v3442_v6 = vpop.f32.mrf.mxu1 }
0x24dd   :  { %v3443_v16 = vadd.f32 %v5851_v14, %v3442_v6 }
0x24de   :  { %v4703_v17 = vpop.f32.mrf.mxu1 }
0x24df   :  { %v3447_v7 = vrot.slane %v3443_v16, 6 }
0x24e1   :  { %3456 = vrot.lane.b32.xlu0 %v3447_v7, %s5155_s1  ;;  %v3449_v8 = vadd.f32 %v3447_v7, %v5849_v19 }
0x24e3   :  { %v4159_v20 = vmul.f32 -1.442695, %v3449_v8 }
0x24e5   :  { %4979 = vpow2.f32 %v4159_v20 }
0x24f2   :  { %v4980_v21 = vpop.eup %4979 }
0x24f3   :  { %v3453_v10 = vadd.f32 1.0, %v4980_v21 }
0x24f5   :  { %4981 = vrcp.f32 %v3453_v10 }
0x2502   :  { %v4982_v29 = vpop.eup %4981 }
0x2503   :  { %v3474_v35 = vmul.f32 %v4982_v29, %v3472_v34 }
0x2543   :  { %v3362_v27 = vpop.permute.xlu1 %3361 }
0x2544   :  { %v6070_v11 = vadd.f32 %v3362_v27, %v3354_v24 }
0x2546   :  { %4983 = vtanh.f32 %v6070_v11  ;;  %v3564_v58 = vrot.slane %v6070_v11, 6 }
0x2553   :  { %v4984_v30 = vpop.eup %4983  ;;  %v3457_v22 = vpop.permute.xlu0 %3456 }
0x2554   :  { %3367 = vrot.lane.b32.xlu1 %v4984_v30, %s5155_s1  ;;  %v3459_v12 = vmul.f32 %v4982_v29, %v3457_v22 }
0x2556   :  { %3461 = vrot.lane.b32.xlu0 %v3459_v12, %s5155_s1 }
0x25c6   :  { %v3368_v13 = vpop.permute.xlu1 %3367 }
0x25c7   :  { %v3370_v31 = vmul.f32 %v4978_v4, %v3368_v13 }
0x25c8   :  { %v3462_v39 = vpop.permute.xlu0 %3461 }
0x25c9   :  { %v3477_v32 = vrot.slane %v3370_v31, 2  ;;  %v3464_v33 = vadd.f32 %v3462_v39, %v5849_v19 }
0x25cb   :  { %4985 = vtanh.f32 %v3464_v33  ;;  %3478 = vrot.lane.b32.xlu1 %v3477_v32, %s5156_s2 }
0x25d8   :  { %v4986_v36 = vpop.eup %4985 }
0x25d9   :  { %3468 = vrot.lane.b32.xlu0 %v4986_v36, %s5157_s12  ;;  %v5016_v36 = vld [vmem:[#allocation11] ss:$0 sm:$0xff] }
0x263d   :  { %v3479_v37 = vpop.permute.xlu1 %3478 }
0x263e   :  { %4713 = vmatmul.mubr.msk.f32.vlgmr.msra.gmra.mxu0 %vm327_vm3, %v3479_v37 }
0x263f   :  { %4727 = vmatpush3.msra.mxu0 %v5751_v41  ;;  %4734 = vmatprep.mubr.msk.f32.mxu0 %vm5154_vm0, %v5153_v1  ;;  %v3466_v41 = vsub.f32 1.0, %v4982_v29 }
0x2640   :  { %4728 = vmatprep.subr.mxu0 %v5153_v1 }
0x2641   :  { %4729 = vmatpush3.msra.mxu0 %v5757_v38 }
0x2642   :  { %4730 = vmatprep.subr.mxu0 %v5153_v1 }
0x2643   :  { %4731 = vmatpush3.msra.mxu0 %v5766_v25 }
0x2644   :  { %4732 = vmatprep.subr.mxu0 %v5153_v1 }
0x2645   :  { %4733 = vmatpush3.msra.mxu0 %v5773_v40 }
0x2646   :  { %4748 = vmatprep.subr.mxu0 %v5153_v1 }
0x264b   :  { %v3469_v47 = vpop.permute.xlu0 %3468 }
0x264c   :  { %v3471_v42 = vmul.f32 %v3469_v47, %v3466_v41 }
0x264e   :  { %v6090_v43 = vadd.f32 %v3474_v35, %v3471_v42 }
0x2650   :  { %v3584_v38 = vrot.slane %v6090_v43, 2  ;;  %v3685_v8 = vrot.slane %v6090_v43, 6 }
0x2652   :  { %3585 = vrot.lane.b32.xlu1 %v3584_v38, %s5157_s12 }
0x26c4   :  { %v3586_v44 = vpop.permute.xlu1 %3585 }
0x26c5   :  { %4724 = vmatmul.mubr.msk.f32.vlgmr.msra.gmra.mxu1 %vm327_vm3, %v3586_v44 }
0x26c6   :  { %4738 = vmatpush3.msra.mxu1 %v5817_v61  ;;  %4745 = vmatprep.mubr.msk.f32.mxu1 %vm5154_vm0, %v5153_v1 }
0x26c7   :  { %4739 = vmatprep.subr.mxu1 %v5153_v1 }
0x26c8   :  { %4740 = vmatpush3.msra.mxu1 %v5820_v62 }
0x26c9   :  { %4741 = vmatprep.subr.mxu1 %v5153_v1 }
0x26ca   :  { %4742 = vmatpush3.msra.mxu1 %v5826_v63 }
0x26cb   :  { %4743 = vmatprep.subr.mxu1 %v5153_v1 }
0x26cc   :  { %4744 = vmatpush3.msra.mxu1 %v5830_v26 }
0x26cd   :  { %4767 = vmatprep.subr.mxu1 %v5153_v1 }
0x26fe   :  { %v3548_v25 = vpop.f32.mrf.mxu0 }
0x26ff   :  { %v3553_v40 = vrot.slane %v3548_v25, 4 }
0x2700   :  { %v4714_v61 = vpop.f32.mrf.mxu0 }
0x2701   :  { %v3555_v57 = vadd.f32 %v3553_v40, %v5812_v18 }
0x2703   :  { %4987 = vtanh.f32 %v3555_v57  ;;  %v4161_v62 = vmul.f32 -1.442695, %v3555_v57 }
0x2705   :  { %4989 = vpow2.f32 %v4161_v62 }
0x2710   :  { %v4988_v45 = vpop.eup %4987 }
0x2711   :  { %3568 = vrot.lane.b32.xlu0 %v4988_v45, %s5155_s1 }
0x2712   :  { %v4990_v46 = vpop.eup %4989 }
0x2713   :  { %v3559_v48 = vadd.f32 1.0, %v4990_v46 }
0x2715   :  { %4991 = vrcp.f32 %v3559_v48  ;;  %v3914_v48 = vld [vmem:[%s6212_s15 + $0x38] sm:$0xff] }
0x2722   :  { %v4992_v63 = vpop.eup %4991 }
0x2723   :  { %v3566_v60 = vmul.f32 %v4992_v63, %v3564_v58 }
0x2783   :  { %v3569_v49 = vpop.permute.xlu0 %3568 }
0x2784   :  { %v3571_v50 = vmul.f32 %v4992_v63, %v3569_v49  ;;  %v3912_v49 = vld [vmem:[%s6212_s15 + $0x28] sm:$0xff] }
0x2785   :  { %v3655_v26 = vpop.f32.mrf.mxu1 }
0x2786   :  { %v3656_v52 = vadd.f32 %v5851_v14, %v3655_v26  ;;  %3573 = vrot.lane.b32.xlu1 %v3571_v50, %s5156_s2 }
0x2787   :  { %v4725_v53 = vpop.f32.mrf.mxu1 }
0x2788   :  { %v3660_v9 = vrot.slane %v3656_v52, 4  ;;  %v3911_v53 = vld [vmem:[%s6212_s15 + $0x20] sm:$0xff] }
0x278a   :  { %3669 = vrot.lane.b32.xlu0 %v3660_v9, %s5155_s1  ;;  %v3662_v54 = vadd.f32 %v3660_v9, %v5849_v19  ;;  %v3910_v9 = vld [vmem:[%s6212_s15 + $0x18] sm:$0xff] }
0x278c   :  { %v4163_v55 = vmul.f32 -1.442695, %v3662_v54  ;;  %v3909_v54 = vld [vmem:[%s6212_s15 + $0x10] sm:$0xff] }
0x278e   :  { %4993 = vpow2.f32 %v4163_v55  ;;  %v3907_v55 = vld [vmem:[%s6212_s15] sm:$0xff] }
0x279b   :  { %v4994_v59 = vpop.eup %4993 }
0x279c   :  { %v3666_v56 = vadd.f32 1.0, %v4994_v59  ;;  %v4001_v59 = vld [vmem:[%s6214_s17 + $0x18] sm:$0xff] }
0x279e   :  { %4995 = vrcp.f32 %v3666_v56 }
0x27ab   :  { %v4996_v14 = vpop.eup %4995 }
0x27ac   :  { %v3679_v20 = vsub.f32 1.0, %v4996_v14  ;;  %v3687_v23 = vmul.f32 %v4996_v14, %v3685_v8 }
0x27f8   :  { %v3574_v51 = vpop.permute.xlu1 %3573 }
0x27f9   :  { %v6112_v0 = vadd.f32 %v3574_v51, %v3566_v60 }
0x27fb   :  { %4997 = vtanh.f32 %v6112_v0  ;;  %v3777_v57 = vrot.slane %v6112_v0, 6 }
0x27fc   :  { %v3670_v2 = vpop.permute.xlu0 %3669 }
0x27fd   :  { %v3672_v3 = vmul.f32 %v4996_v14, %v3670_v2 }
0x27ff   :  { %3674 = vrot.lane.b32.xlu1 %v3672_v3, %s5155_s1 }
0x2808   :  { %v4998_v28 = vpop.eup %4997 }
0x2809   :  { %3579 = vrot.lane.b32.xlu0 %v4998_v28, %s5155_s1 }
0x2871   :  { %v3675_v4 = vpop.permute.xlu1 %3674 }
0x2872   :  { %v3677_v15 = vadd.f32 %v3675_v4, %v5849_v19 }
0x2874   :  { %4999 = vtanh.f32 %v3677_v15 }
0x287b   :  { %v3580_v5 = vpop.permute.xlu0 %3579 }
0x287c   :  { %v3582_v6 = vmul.f32 %v4992_v63, %v3580_v5  ;;  %v3913_v63 = vld [vmem:[%s6212_s15 + $0x30] sm:$0xff] }
0x287e   :  { %v3690_v16 = vrot.slane %v3582_v6, 4  ;;  %v4000_v6 = vld [vmem:[%s6214_s17 + $0x10] sm:$0xff] }
0x2880   :  { %3691 = vrot.lane.b32.xlu1 %v3690_v16, %s5156_s2  ;;  %v3999_v16 = vld [vmem:[%s6214_s17 + $0x8] sm:$0xff] }
0x2881   :  { %v5000_v17 = vpop.eup %4999 }
0x2882   :  { %3681 = vrot.lane.b32.xlu0 %v5000_v17, %s5157_s12  ;;  %v3998_v17 = vld [vmem:[%s6214_s17] sm:$0xff] }
0x28f2   :  { %v3692_v7 = vpop.permute.xlu1 %3691 }
0x28f3   :  { %4735 = vmatmul.mubr.msk.f32.vlgmr.msra.gmra.mxu0 %vm327_vm3, %v3692_v7  ;;  %v4168_v7 = vld [vmem:[%s6213_s16] ss:$0 sm:$0xff] }
0x28f4   :  { %v3682_v21 = vpop.permute.xlu0 %3681  ;;  %4764 = vmatprep.mubr.msk.f32.mxu0 %vm5154_vm0, %v5153_v1  ;;  %4749 = vmatpush3.msra.mxu0 %v3914_v48 }
0x28f5   :  { %v3684_v10 = vmul.f32 %v3682_v21, %v3679_v20  ;;  %4750 = vmatprep.subr.mxu0 %v5153_v1 }
0x28f6   :  { %4751 = vmatpush3.msra.mxu0 %v3913_v63 }
0x28f7   :  { %v6124_v24 = vadd.f32 %v3687_v23, %v3684_v10  ;;  %4752 = vmatprep.subr.mxu0 %v5153_v1  ;;  %v4170_v10 = vld [vmem:[#allocation2] ss:$0 sm:$0xff] }
0x28f8   :  { %4753 = vmatpush3.msra.mxu0 %v3912_v49 }
0x28f9   :  { %v3797_v27 = vrot.slane %v6124_v24, 4  ;;  %4754 = vmatprep.subr.mxu0 %v5153_v1  ;;  %v3898_v14 = vrot.slane %v6124_v24, 6 }
0x28fa   :  { %4755 = vmatpush3.msra.mxu0 %v3911_v53 }
0x28fb   :  { %3798 = vrot.lane.b32.xlu1 %v3797_v27, %s5157_s12  ;;  %4756 = vmatprep.subr.mxu0 %v5153_v1 }
0x28fc   :  { %4757 = vmatpush3.msra.mxu0 %v3910_v9 }
0x28fd   :  { %4758 = vmatprep.subr.mxu0 %v5153_v1 }
0x28fe   :  { %4759 = vmatpush3.msra.mxu0 %v3909_v54 }
0x28ff   :  { %4760 = vmatprep.subr.mxu0 %v5153_v1 }
0x296d   :  { %v3799_v11 = vpop.permute.xlu1 %3798 }
0x296e   :  { %4746 = vmatmul.mubr.msk.f32.vlgmr.msra.gmra.mxu1 %vm327_vm3, %v3799_v11 }
0x296f   :  { %4775 = vmatprep.mubr.msk.f32.mxu1 %vm5154_vm0, %v5153_v1  ;;  %4768 = vmatpush3.msra.mxu1 %v4001_v59 }
0x2970   :  { %4769 = vmatprep.subr.mxu1 %v5153_v1 }
0x2971   :  { %4770 = vmatpush3.msra.mxu1 %v4000_v6 }
0x2972   :  { %4771 = vmatprep.subr.mxu1 %v5153_v1 }
0x2973   :  { %4772 = vmatpush3.msra.mxu1 %v3999_v16 }
0x2974   :  { %4773 = vmatprep.subr.mxu1 %v5153_v1 }
0x2975   :  { %4774 = vmatpush3.msra.mxu1 %v3998_v17 }
0x29b3   :  { %v3761_v29 = vpop.f32.mrf.mxu0 }
0x29b4   :  { %v3766_v30 = vrot.slane %v3761_v29, 2 }
0x29b5   :  { %v4736_v22 = vpop.f32.mrf.mxu0 }
0x29b6   :  { %v3768_v12 = vadd.f32 %v3766_v30, %v5812_v18 }
0x29b8   :  { %5001 = vtanh.f32 %v3768_v12  ;;  %v4165_v31 = vmul.f32 -1.442695, %v3768_v12 }
0x29ba   :  { %5003 = vpow2.f32 %v4165_v31 }
0x29c5   :  { %v5002_v13 = vpop.eup %5001 }
0x29c6   :  { %3781 = vrot.lane.b32.xlu0 %v5002_v13, %s5155_s1 }
0x29c7   :  { %v5004_v39 = vpop.eup %5003 }
0x29c8   :  { %v3772_v32 = vadd.f32 1.0, %v5004_v39 }
0x29ca   :  { %5005 = vrcp.f32 %v3772_v32 }
0x29d7   :  { %v5006_v47 = vpop.eup %5005 }
0x29d8   :  { %v3779_v45 = vmul.f32 %v5006_v47, %v3777_v57 }
0x2a2e   :  { %v3868_v33 = vpop.f32.mrf.mxu1 }
0x2a2f   :  { %v3869_v37 = vadd.f32 %v5016_v36, %v3868_v33 }
0x2a30   :  { %v4747_v34 = vpop.f32.mrf.mxu1 }
0x2a31   :  { %v3873_v41 = vrot.slane %v3869_v37, 2 }
0x2a33   :  { %3882 = vrot.lane.b32.xlu1 %v3873_v41, %s5155_s1  ;;  %v3875_v18 = vadd.f32 %v3873_v41, %v5849_v19 }
0x2a35   :  { %v4167_v43 = vmul.f32 -1.442695, %v3875_v18 }
0x2a37   :  { %5007 = vpow2.f32 %v4167_v43 }
0x2a38   :  { %v3782_v35 = vpop.permute.xlu0 %3781 }
0x2a39   :  { %v3784_v42 = vmul.f32 %v5006_v47, %v3782_v35 }
0x2a3b   :  { %3786 = vrot.lane.b32.xlu0 %v3784_v42, %s5156_s2 }
0x2a44   :  { %v5008_v38 = vpop.eup %5007 }
0x2a45   :  { %v3879_v44 = vadd.f32 1.0, %v5008_v38 }
0x2a47   :  { %5009 = vrcp.f32 %v3879_v44 }
0x2a54   :  { %v5010_v25 = vpop.eup %5009 }
0x2a55   :  { %v3892_v0 = vsub.f32 1.0, %v5010_v25  ;;  %v3900_v3 = vmul.f32 %v5010_v25, %v3898_v14 }
0x2aa5   :  { %v3883_v40 = vpop.permute.xlu1 %3882 }
0x2aa6   :  { %v3885_v61 = vmul.f32 %v5010_v25, %v3883_v40 }
0x2aa8   :  { %3887 = vrot.lane.b32.xlu1 %v3885_v61, %s5155_s1 }
0x2aad   :  { %v3787_v62 = vpop.permute.xlu0 %3786 }
0x2aae   :  { %v3789_v46 = vadd.f32 %v3787_v62, %v3779_v45 }
0x2ab0   :  { %5011 = vtanh.f32 %v3789_v46 }
0x2abd   :  { %v5012_v50 = vpop.eup %5011 }
0x2abe   :  { %3792 = vrot.lane.b32.xlu0 %v5012_v50, %s5155_s1 }
0x2b1a   :  { %v3888_v26 = vpop.permute.xlu1 %3887 }
0x2b1b   :  { %v3890_v52 = vadd.f32 %v3888_v26, %v5849_v19  ;;  %v3908_v19 = vld [vmem:[%s6212_s15 + $0x8] sm:$0xff] }
0x2b1c   :  { %4761 = vmatpush3.msra.mxu0 %v3908_v19 }
0x2b1d   :  { %5013 = vtanh.f32 %v3890_v52  ;;  %4762 = vmatprep.subr.mxu0 %v5153_v1 }
0x2b1e   :  { %4763 = vmatpush3.msra.mxu0 %v3907_v55 }
0x2b2a   :  { %v5014_v56 = vpop.eup %5013 }
0x2b2b   :  { %3894 = vrot.lane.b32.xlu1 %v5014_v56, %s5157_s12 }
0x2b30   :  { %v3793_v58 = vpop.permute.xlu0 %3792 }
0x2b31   :  { %v3795_v60 = vmul.f32 %v5006_v47, %v3793_v58 }
0x2b33   :  { %3903 = vrot.lane.b32.xlu0 %v3795_v60, %s5156_s2 }
0x2b9d   :  { %v3895_v51 = vpop.permute.xlu1 %3894 }
0x2b9e   :  { %v3897_v2 = vmul.f32 %v3895_v51, %v3892_v0 }
0x2ba0   :  { %v3901_v28 = vadd.f32 %v3900_v3, %v3897_v2 }
0x2ba5   :  { %v3904_v4 = vpop.permute.xlu0 %3903 }
0x2ba6   :  { %v3906_v15 = vsel %vm327_vm3, %v3904_v4, %v3901_v28 }
0x2ba7   :  { %v3923_v5 = vrot.slane %v3906_v15, 6 }
0x2ba9   :  { %4765 = vmatmul.mubr.msk.f32.vlgmr.msra.gmra.mxu0 %vm3924_vm6, %v3923_v5 }
0x2c69   :  { %v3993_v8 = vpop.f32.mrf.mxu0 }
0x2c6a   :  { %v3994_v20 = vadd.f32 %v4168_v7, %v3993_v8 }
0x2c6b   :  { %v4766_v21 = vpop.f32.mrf.mxu0 }
0x2c6c   :  { %v3997_v23 = vmax.f32 %v3994_v20, 0.0 }
0x2c6e   :  { %4776 = vmatmul.mubr.msk.f32.vlgmr.msra.gmra.mxu1 %vm327_vm3, %v3997_v23 }
0x2d2e   :  { %v4078_v24 = vpop.f32.mrf.mxu1 }
0x2d2f   :  { %v4079_v27 = vadd.f32 %v4170_v10, %v4078_v24 }
0x2d30   :  { %v4777_v1 = vpop.f32.mrf.mxu1 }
0x2d31   :  { %4083 = vst.msk [vmem:[%s6216_s19] sm:$0x3] %vm4082_vm7, %v4079_v27 }
0x2d32   :  { %4088 = vsyncpa [#allocation4], 1 }
0x2d33   :  { %4089 = vsyncpa [#allocation6], 1 }
0x2d34   :  { %4090 = vsyncpa [#allocation9], 1 }
0x2d35   :  { %4091 = vsyncpa [#allocation12], 1 }

</bundles_post_ra>
